<compile_context>
chip_gen: v6e
topology: v6e:2x2x1
jax: 0.10.0
libtpu: 0.0.40
codegen_flags: <defaults>
</compile_context>

<pallas_src>
import functools

import jax
import jax.numpy as jnp
from jax import lax
from jax.experimental import pallas as pl
from jax.experimental.pallas import tpu as pltpu


def _lstm_chunk_kernel(xp_ref, whh_ref, out_ref, hn_ref, cn_ref,
                       h_s, c_s, *, time_chunk, hidden):
    """One grid step = `time_chunk` timesteps of one LSTM layer.

    xp_ref : (TT, B, 4H) bf16  hoisted input projection (bias folded in),
                               gate order i|f|g|o along the lane axis
    whh_ref: (H, 4H)     bf16  fused recurrent weights (== w_hh.T)
    out_ref: (TT, B, H)        hidden states for this chunk
    hn_ref, cn_ref: (B, H)     resident final-state blocks (written last chunk)
    h_s, c_s: (B, H) f32       VMEM scratch carrying state across grid steps
    """
    step = pl.program_id(0)
    H = hidden

    @pl.when(step == 0)
    def _():
        h_s[...] = jnp.zeros_like(h_s)
        c_s[...] = jnp.zeros_like(c_s)

    # Hoisted weight load: one VMEM read per chunk, closed over by the body.
    w = whh_ref[...]                                     # (H, 4H) bf16

    def body(tt, carry):
        h_prev, c_prev = carry                           # f32 (B, H)
        xp = xp_ref[tt]                                  # bf16 (B, 4H)
        # Single fused recurrent matmul, f32 accumulation on the MXU.
        rec = jnp.dot(h_prev.astype(w.dtype), w,
                      preferred_element_type=jnp.float32)     # (B, 4H) f32
        gates = xp.astype(jnp.float32) + rec             # f32 gate math (v5e)

        i_g = jax.nn.sigmoid(gates[:, 0 * H:1 * H])
        f_g = jax.nn.sigmoid(gates[:, 1 * H:2 * H])
        g_g = jnp.tanh(gates[:, 2 * H:3 * H])
        o_g = jax.nn.sigmoid(gates[:, 3 * H:4 * H])

        c_new = f_g * c_prev + i_g * g_g
        h_new = o_g * jnp.tanh(c_new)

        out_ref[tt] = h_new.astype(out_ref.dtype)
        return (h_new, c_new)

    h_f, c_f = lax.fori_loop(0, time_chunk, body,
                             (h_s[...], c_s[...]), unroll=True)

    # Carry state to the next chunk.
    h_s[...] = h_f
    c_s[...] = c_f

    # Only the last chunk's state matters.
    @pl.when(step == pl.num_programs(0) - 1)
    def _():
        hn_ref[...] = h_f.astype(hn_ref.dtype)
        cn_ref[...] = c_f.astype(cn_ref.dtype)


def _pick_time_chunk(T, B, H, out_itemsize, *,
                     vmem_budget_bytes=12 * 1024 * 1024, max_unroll=64):
    """Largest TT dividing T whose double-buffered xp/out chunks fit budget."""
    per_t = 2 * (B * 4 * H * 2) + 2 * (B * H * out_itemsize)   # bf16 xp + out
    tt = max(1, min(T, max_unroll, vmem_budget_bytes // max(per_t, 1)))
    while T % tt != 0:
        tt -= 1
    return tt


def lstm_layer(x, w_ih, w_hh, b_ih, b_hh):
    """One LSTM layer.  x: (T, B, F).  w_ih: (4H, F), w_hh: (4H, H)."""
    T, B, F = x.shape
    H = w_hh.shape[1]
    TT = _pick_time_chunk(T, B, H, jnp.dtype(x.dtype).itemsize)
    n_chunks = T // TT

    # Hoisted input projection: one MXU-friendly GEMM over all timesteps in
    # f32, bias folded in once; result cast to bf16 (halves kernel DMA bytes).
    # Layout stays GEMM-contiguous (T, B, 4H): lane-dense, no transpose.
    xp = jnp.matmul(x.astype(jnp.float32),
                    jnp.transpose(w_ih).astype(jnp.float32))      # (T, B, 4H)
    xp = (xp + (b_ih + b_hh).astype(jnp.float32)).astype(jnp.bfloat16)

    # Fused recurrent weights: h @ w_hh.T gives (B, 4H) in gate order i|f|g|o.
    whh_fused = jnp.transpose(w_hh).astype(jnp.bfloat16)          # (H, 4H)

    kernel = functools.partial(_lstm_chunk_kernel, time_chunk=TT, hidden=H)

    out, h_n, c_n = pl.pallas_call(
        kernel,
        out_shape=(
            jax.ShapeDtypeStruct((T, B, H), x.dtype),
            jax.ShapeDtypeStruct((B, H), x.dtype),
            jax.ShapeDtypeStruct((B, H), x.dtype),
        ),
        grid_spec=pltpu.PrefetchScalarGridSpec(
            num_scalar_prefetch=0,
            grid=(n_chunks,),
            in_specs=[
                pl.BlockSpec((TT, B, 4 * H), lambda s: (s, 0, 0)),
                pl.BlockSpec((H, 4 * H), lambda s: (0, 0)),
            ],
            out_specs=[
                pl.BlockSpec((TT, B, H), lambda s: (s, 0, 0)),
                pl.BlockSpec((B, H), lambda s: (0, 0)),
                pl.BlockSpec((B, H), lambda s: (0, 0)),
            ],
            scratch_shapes=[
                pltpu.VMEM((B, H), jnp.float32),
                pltpu.VMEM((B, H), jnp.float32),
            ],
        ),
        compiler_params=pltpu.CompilerParams(
            dimension_semantics=("arbitrary",),
            vmem_limit_bytes=32 * 1024 * 1024),
    )(xp, whh_fused)
    return out, h_n, c_n


def init_encoder_params(key, features_size, hidden_size, num_layers):
    """Deterministic params, same shapes as nn.LSTM(features, hidden, layers)."""
    params = []
    k = 1.0 / jnp.sqrt(hidden_size)
    for layer in range(num_layers):
        in_size = features_size if layer == 0 else hidden_size
        key, k1, k2, k3, k4 = jax.random.split(key, 5)
        params.append(dict(
            w_ih=jax.random.uniform(k1, (4 * hidden_size, in_size),
                                    jnp.float32, -k, k),
            w_hh=jax.random.uniform(k2, (4 * hidden_size, hidden_size),
                                    jnp.float32, -k, k),
            b_ih=jax.random.uniform(k3, (4 * hidden_size,),
                                    jnp.float32, -k, k),
            b_hh=jax.random.uniform(k4, (4 * hidden_size,),
                                    jnp.float32, -k, k),
        ))
    return params


def encoder_forward(params, X):
    """Encoder.forward: returns (output, (h_n, c_n)) like nn.LSTM."""
    h_ns, c_ns = [], []
    layer_in = X
    for p in params:
        layer_in, h_n, c_n = lstm_layer(
            layer_in, p["w_ih"], p["w_hh"], p["b_ih"], p["b_hh"])
        h_ns.append(h_n)
        c_ns.append(c_n)
    output = layer_in
    state = (jnp.stack(h_ns, axis=0), jnp.stack(c_ns, axis=0))
    return output, state


# --- pure-JAX reference for correctness check ------------------------------
def _ref_lstm_layer(x, w_ih, w_hh, b_ih, b_hh):
    T, B, F = x.shape
    H = w_hh.shape[1]

    def step(carry, x_t):
        h, c = carry
        gates = x_t @ w_ih.T + h @ w_hh.T + b_ih + b_hh
        i, f, g, o = jnp.split(gates, 4, axis=-1)
        i, f, o = jax.nn.sigmoid(i), jax.nn.sigmoid(f), jax.nn.sigmoid(o)
        g = jnp.tanh(g)
        c_new = f * c + i * g
        h_new = o * jnp.tanh(c_new)
        return (h_new, c_new), h_new

    init = (jnp.zeros((B, H), x.dtype), jnp.zeros((B, H), x.dtype))
    (h_n, c_n), out = jax.lax.scan(step, init, x)
    return out, h_n, c_n


def _ref_encoder(params, X):
    h_ns, c_ns = [], []
    layer_in = X
    for p in params:
        layer_in, h_n, c_n = _ref_lstm_layer(
            layer_in, p["w_ih"], p["w_hh"], p["b_ih"], p["b_hh"])
        h_ns.append(h_n)
        c_ns.append(c_n)
    return layer_in, (jnp.stack(h_ns, 0), jnp.stack(c_ns, 0))


if __name__ == "__main__":
    features_size = 8
    hidden_size = 32
    num_layers = 2
    seq_len = 16
    batch = 4

    key = jax.random.PRNGKey(0)
    key, xk = jax.random.split(key)
    X = jax.random.normal(xk, (seq_len, batch, features_size), jnp.float32)

    params = init_encoder_params(key, features_size, hidden_size, num_layers)

    encoder_fn = jax.jit(encoder_forward)
    output, (h_n, c_n) = encoder_fn(params, X)
    jax.block_until_ready((output, h_n, c_n))

    # Sanity check against the pure-f32 JAX reference.  bf16 MXU inputs with
    # f32 accumulation -> loosened tolerance (per review).
    ref_out, (ref_h, ref_c) = _ref_encoder(params, X)
    assert output.shape == (seq_len, batch, hidden_size)
    assert h_n.shape == (num_layers, batch, hidden_size)
    assert c_n.shape == (num_layers, batch, hidden_size)
    assert jnp.allclose(output, ref_out, atol=5e-2, rtol=5e-2)
    assert jnp.allclose(h_n, ref_h, atol=5e-2, rtol=5e-2)
    assert jnp.allclose(c_n, ref_c, atol=5e-2, rtol=5e-2)

    print("KERNEL_OK")
</pallas_src>

<mosaic_0001>
module attributes {stable_mosaic.version = 11 : i64} {
  func.func @_lstm_chunk_kernel(%arg0: i32, %arg1: memref<16x4x128xbf16, #tpu.memory_space<vmem>>, %arg2: memref<32x128xbf16, #tpu.memory_space<vmem>>, %arg3: memref<16x4x32xf32, #tpu.memory_space<vmem>>, %arg4: memref<4x32xf32, #tpu.memory_space<vmem>>, %arg5: memref<4x32xf32, #tpu.memory_space<vmem>>, %arg6: memref<4x32xf32, #tpu.memory_space<vmem>>, %arg7: memref<4x32xf32, #tpu.memory_space<vmem>>) attributes {dimension_semantics = [#tpu.dimension_semantics<arbitrary>], iteration_bounds = array<i64: 1>, scalar_prefetch = 0 : i64, scratch_operands = 2 : i64, tpu.core_type = #tpu.core_type<tc>, window_params = [{transform_indices = @transform_0, window_bounds = array<i64: 16, 4, 128>}, {pipeline_mode = #tpu.pipeline_mode<synchronous>, transform_indices = @transform_1, window_bounds = array<i64: 32, 128>}, {transform_indices = @transform_2, window_bounds = array<i64: 16, 4, 32>}, {pipeline_mode = #tpu.pipeline_mode<synchronous>, transform_indices = @transform_3, window_bounds = array<i64: 4, 32>}, {pipeline_mode = #tpu.pipeline_mode<synchronous>, transform_indices = @transform_4, window_bounds = array<i64: 4, 32>}]} {
    %c0_i32 = arith.constant 0 : i32
    %0 = arith.cmpi eq, %arg0, %c0_i32 : i32
    %1 = arith.extui %0 : i1 to i32
    %c0_i32_0 = arith.constant 0 : i32
    %2 = arith.cmpi ne, %1, %c0_i32_0 : i32
    scf.if %2 {
      %cst_140 = arith.constant 0.000000e+00 : f32
      %587 = vector.broadcast %cst_140 : f32 to vector<4x32xf32>
      %c0_141 = arith.constant 0 : index
      %c0_142 = arith.constant 0 : index
      %588 = vector.load %arg6[%c0_141, %c0_142] : memref<4x32xf32, #tpu.memory_space<vmem>>, vector<4x32xf32>
      tpu.vector_store %arg6[%c0_141, %c0_142], %587 {strides = array<i32>} : memref<4x32xf32, #tpu.memory_space<vmem>>, vector<4x32xf32>,
      %cst_143 = arith.constant 0.000000e+00 : f32
      %589 = vector.broadcast %cst_143 : f32 to vector<4x32xf32>
      %c0_144 = arith.constant 0 : index
      %c0_145 = arith.constant 0 : index
      %590 = vector.load %arg7[%c0_144, %c0_145] : memref<4x32xf32, #tpu.memory_space<vmem>>, vector<4x32xf32>
      tpu.vector_store %arg7[%c0_144, %c0_145], %589 {strides = array<i32>} : memref<4x32xf32, #tpu.memory_space<vmem>>, vector<4x32xf32>,
    } else {
    }
    %c0 = arith.constant 0 : index
    %c0_1 = arith.constant 0 : index
    %3 = vector.load %arg2[%c0, %c0_1] : memref<32x128xbf16, #tpu.memory_space<vmem>>, vector<32x128xbf16>
    %c0_2 = arith.constant 0 : index
    %c0_3 = arith.constant 0 : index
    %4 = vector.load %arg6[%c0_2, %c0_3] : memref<4x32xf32, #tpu.memory_space<vmem>>, vector<4x32xf32>
    %c0_4 = arith.constant 0 : index
    %c0_5 = arith.constant 0 : index
    %5 = vector.load %arg7[%c0_4, %c0_5] : memref<4x32xf32, #tpu.memory_space<vmem>>, vector<4x32xf32>
    %c0_i32_6 = arith.constant 0 : i32
    %6 = arith.index_cast %c0_i32_6 : i32 to index
    %c0_7 = arith.constant 0 : index
    %c0_8 = arith.constant 0 : index
    %7 = vector.load %arg1[%6, %c0_7, %c0_8] : memref<16x4x128xbf16, #tpu.memory_space<vmem>>, vector<1x4x128xbf16>
    %8 = vector.shape_cast %7 : vector<1x4x128xbf16> to vector<4x128xbf16>
    %9 = arith.truncf %4 : vector<4x32xf32> to vector<4x32xbf16>
    %cst = arith.constant dense<0.000000e+00> : vector<4x128xf32>
    %10 = tpu.matmul %9, %3, %cst {dimension_numbers = #tpu.dot_dimension_numbers<[1], [0], [0], [1], [0, 0, 1, 1], [], []>} : vector<4x32xbf16>, vector<32x128xbf16>, vector<4x128xf32> -> vector<4x128xf32>
    %11 = arith.extf %8 : vector<4x128xbf16> to vector<4x128xf32>
    %12 = arith.addf %11, %10 : vector<4x128xf32>
    %13 = vector.extract_strided_slice %12 {offsets = [0, 0], sizes = [4, 32], strides = [1, 1]} : vector<4x128xf32> to vector<4x32xf32>
    %14 = arith.negf %13 : vector<4x32xf32>
    %15 = math.exp %14 : vector<4x32xf32>
    %cst_9 = arith.constant 1.000000e+00 : f32
    %16 = vector.broadcast %cst_9 : f32 to vector<4x32xf32>
    %17 = arith.addf %16, %15 : vector<4x32xf32>
    %18 = arith.divf %16, %17 : vector<4x32xf32>
    %19 = vector.extract_strided_slice %12 {offsets = [0, 32], sizes = [4, 32], strides = [1, 1]} : vector<4x128xf32> to vector<4x32xf32>
    %20 = arith.negf %19 : vector<4x32xf32>
    %21 = math.exp %20 : vector<4x32xf32>
    %cst_10 = arith.constant 1.000000e+00 : f32
    %22 = vector.broadcast %cst_10 : f32 to vector<4x32xf32>
    %23 = arith.addf %22, %21 : vector<4x32xf32>
    %24 = arith.divf %22, %23 : vector<4x32xf32>
    %25 = vector.extract_strided_slice %12 {offsets = [0, 64], sizes = [4, 32], strides = [1, 1]} : vector<4x128xf32> to vector<4x32xf32>
    %26 = math.tanh %25 : vector<4x32xf32>
    %27 = vector.extract_strided_slice %12 {offsets = [0, 96], sizes = [4, 32], strides = [1, 1]} : vector<4x128xf32> to vector<4x32xf32>
    %28 = arith.negf %27 : vector<4x32xf32>
    %29 = math.exp %28 : vector<4x32xf32>
    %cst_11 = arith.constant 1.000000e+00 : f32
    %30 = vector.broadcast %cst_11 : f32 to vector<4x32xf32>
    %31 = arith.addf %30, %29 : vector<4x32xf32>
    %32 = arith.divf %30, %31 : vector<4x32xf32>
    %33 = arith.mulf %24, %5 : vector<4x32xf32>
    %34 = arith.mulf %18, %26 : vector<4x32xf32>
    %35 = arith.addf %33, %34 : vector<4x32xf32>
    %36 = math.tanh %35 : vector<4x32xf32>
    %37 = arith.mulf %32, %36 : vector<4x32xf32>
    %38 = arith.index_cast %c0_i32_6 : i32 to index
    %c0_12 = arith.constant 0 : index
    %c0_13 = arith.constant 0 : index
    %39 = vector.load %arg3[%38, %c0_12, %c0_13] : memref<16x4x32xf32, #tpu.memory_space<vmem>>, vector<1x4x32xf32>
    %40 = vector.shape_cast %39 : vector<1x4x32xf32> to vector<4x32xf32>
    %41 = vector.shape_cast %37 : vector<4x32xf32> to vector<1x4x32xf32>
    tpu.vector_store %arg3[%38, %c0_12, %c0_13], %41 {strides = array<i32>} : memref<16x4x32xf32, #tpu.memory_space<vmem>>, vector<1x4x32xf32>,
    %c1_i32 = arith.constant 1 : i32
    %42 = arith.index_cast %c1_i32 : i32 to index
    %c0_14 = arith.constant 0 : index
    %c0_15 = arith.constant 0 : index
    %43 = vector.load %arg1[%42, %c0_14, %c0_15] : memref<16x4x128xbf16, #tpu.memory_space<vmem>>, vector<1x4x128xbf16>
    %44 = vector.shape_cast %43 : vector<1x4x128xbf16> to vector<4x128xbf16>
    %45 = arith.truncf %37 : vector<4x32xf32> to vector<4x32xbf16>
    %cst_16 = arith.constant dense<0.000000e+00> : vector<4x128xf32>
    %46 = tpu.matmul %45, %3, %cst_16 {dimension_numbers = #tpu.dot_dimension_numbers<[1], [0], [0], [1], [0, 0, 1, 1], [], []>} : vector<4x32xbf16>, vector<32x128xbf16>, vector<4x128xf32> -> vector<4x128xf32>
    %47 = arith.extf %44 : vector<4x128xbf16> to vector<4x128xf32>
    %48 = arith.addf %47, %46 : vector<4x128xf32>
    %49 = vector.extract_strided_slice %48 {offsets = [0, 0], sizes = [4, 32], strides = [1, 1]} : vector<4x128xf32> to vector<4x32xf32>
    %50 = arith.negf %49 : vector<4x32xf32>
    %51 = math.exp %50 : vector<4x32xf32>
    %cst_17 = arith.constant 1.000000e+00 : f32
    %52 = vector.broadcast %cst_17 : f32 to vector<4x32xf32>
    %53 = arith.addf %52, %51 : vector<4x32xf32>
    %54 = arith.divf %52, %53 : vector<4x32xf32>
    %55 = vector.extract_strided_slice %48 {offsets = [0, 32], sizes = [4, 32], strides = [1, 1]} : vector<4x128xf32> to vector<4x32xf32>
    %56 = arith.negf %55 : vector<4x32xf32>
    %57 = math.exp %56 : vector<4x32xf32>
    %cst_18 = arith.constant 1.000000e+00 : f32
    %58 = vector.broadcast %cst_18 : f32 to vector<4x32xf32>
    %59 = arith.addf %58, %57 : vector<4x32xf32>
    %60 = arith.divf %58, %59 : vector<4x32xf32>
    %61 = vector.extract_strided_slice %48 {offsets = [0, 64], sizes = [4, 32], strides = [1, 1]} : vector<4x128xf32> to vector<4x32xf32>
    %62 = math.tanh %61 : vector<4x32xf32>
    %63 = vector.extract_strided_slice %48 {offsets = [0, 96], sizes = [4, 32], strides = [1, 1]} : vector<4x128xf32> to vector<4x32xf32>
    %64 = arith.negf %63 : vector<4x32xf32>
    %65 = math.exp %64 : vector<4x32xf32>
    %cst_19 = arith.constant 1.000000e+00 : f32
    %66 = vector.broadcast %cst_19 : f32 to vector<4x32xf32>
    %67 = arith.addf %66, %65 : vector<4x32xf32>
    %68 = arith.divf %66, %67 : vector<4x32xf32>
    %69 = arith.mulf %60, %35 : vector<4x32xf32>
    %70 = arith.mulf %54, %62 : vector<4x32xf32>
    %71 = arith.addf %69, %70 : vector<4x32xf32>
    %72 = math.tanh %71 : vector<4x32xf32>
    %73 = arith.mulf %68, %72 : vector<4x32xf32>
    %74 = arith.index_cast %c1_i32 : i32 to index
    %c0_20 = arith.constant 0 : index
    %c0_21 = arith.constant 0 : index
    %75 = vector.load %arg3[%74, %c0_20, %c0_21] : memref<16x4x32xf32, #tpu.memory_space<vmem>>, vector<1x4x32xf32>
    %76 = vector.shape_cast %75 : vector<1x4x32xf32> to vector<4x32xf32>
    %77 = vector.shape_cast %73 : vector<4x32xf32> to vector<1x4x32xf32>
    tpu.vector_store %arg3[%74, %c0_20, %c0_21], %77 {strides = array<i32>} : memref<16x4x32xf32, #tpu.memory_space<vmem>>, vector<1x4x32xf32>,
    %c2_i32 = arith.constant 2 : i32
    %78 = arith.index_cast %c2_i32 : i32 to index
    %c0_22 = arith.constant 0 : index
    %c0_23 = arith.constant 0 : index
    %79 = vector.load %arg1[%78, %c0_22, %c0_23] : memref<16x4x128xbf16, #tpu.memory_space<vmem>>, vector<1x4x128xbf16>
    %80 = vector.shape_cast %79 : vector<1x4x128xbf16> to vector<4x128xbf16>
    %81 = arith.truncf %73 : vector<4x32xf32> to vector<4x32xbf16>
    %cst_24 = arith.constant dense<0.000000e+00> : vector<4x128xf32>
    %82 = tpu.matmul %81, %3, %cst_24 {dimension_numbers = #tpu.dot_dimension_numbers<[1], [0], [0], [1], [0, 0, 1, 1], [], []>} : vector<4x32xbf16>, vector<32x128xbf16>, vector<4x128xf32> -> vector<4x128xf32>
    %83 = arith.extf %80 : vector<4x128xbf16> to vector<4x128xf32>
    %84 = arith.addf %83, %82 : vector<4x128xf32>
    %85 = vector.extract_strided_slice %84 {offsets = [0, 0], sizes = [4, 32], strides = [1, 1]} : vector<4x128xf32> to vector<4x32xf32>
    %86 = arith.negf %85 : vector<4x32xf32>
    %87 = math.exp %86 : vector<4x32xf32>
    %cst_25 = arith.constant 1.000000e+00 : f32
    %88 = vector.broadcast %cst_25 : f32 to vector<4x32xf32>
    %89 = arith.addf %88, %87 : vector<4x32xf32>
    %90 = arith.divf %88, %89 : vector<4x32xf32>
    %91 = vector.extract_strided_slice %84 {offsets = [0, 32], sizes = [4, 32], strides = [1, 1]} : vector<4x128xf32> to vector<4x32xf32>
    %92 = arith.negf %91 : vector<4x32xf32>
    %93 = math.exp %92 : vector<4x32xf32>
    %cst_26 = arith.constant 1.000000e+00 : f32
    %94 = vector.broadcast %cst_26 : f32 to vector<4x32xf32>
    %95 = arith.addf %94, %93 : vector<4x32xf32>
    %96 = arith.divf %94, %95 : vector<4x32xf32>
    %97 = vector.extract_strided_slice %84 {offsets = [0, 64], sizes = [4, 32], strides = [1, 1]} : vector<4x128xf32> to vector<4x32xf32>
    %98 = math.tanh %97 : vector<4x32xf32>
    %99 = vector.extract_strided_slice %84 {offsets = [0, 96], sizes = [4, 32], strides = [1, 1]} : vector<4x128xf32> to vector<4x32xf32>
    %100 = arith.negf %99 : vector<4x32xf32>
    %101 = math.exp %100 : vector<4x32xf32>
    %cst_27 = arith.constant 1.000000e+00 : f32
    %102 = vector.broadcast %cst_27 : f32 to vector<4x32xf32>
    %103 = arith.addf %102, %101 : vector<4x32xf32>
    %104 = arith.divf %102, %103 : vector<4x32xf32>
    %105 = arith.mulf %96, %71 : vector<4x32xf32>
    %106 = arith.mulf %90, %98 : vector<4x32xf32>
    %107 = arith.addf %105, %106 : vector<4x32xf32>
    %108 = math.tanh %107 : vector<4x32xf32>
    %109 = arith.mulf %104, %108 : vector<4x32xf32>
    %110 = arith.index_cast %c2_i32 : i32 to index
    %c0_28 = arith.constant 0 : index
    %c0_29 = arith.constant 0 : index
    %111 = vector.load %arg3[%110, %c0_28, %c0_29] : memref<16x4x32xf32, #tpu.memory_space<vmem>>, vector<1x4x32xf32>
    %112 = vector.shape_cast %111 : vector<1x4x32xf32> to vector<4x32xf32>
    %113 = vector.shape_cast %109 : vector<4x32xf32> to vector<1x4x32xf32>
    tpu.vector_store %arg3[%110, %c0_28, %c0_29], %113 {strides = array<i32>} : memref<16x4x32xf32, #tpu.memory_space<vmem>>, vector<1x4x32xf32>,
    %c3_i32 = arith.constant 3 : i32
    %114 = arith.index_cast %c3_i32 : i32 to index
    %c0_30 = arith.constant 0 : index
    %c0_31 = arith.constant 0 : index
    %115 = vector.load %arg1[%114, %c0_30, %c0_31] : memref<16x4x128xbf16, #tpu.memory_space<vmem>>, vector<1x4x128xbf16>
    %116 = vector.shape_cast %115 : vector<1x4x128xbf16> to vector<4x128xbf16>
    %117 = arith.truncf %109 : vector<4x32xf32> to vector<4x32xbf16>
    %cst_32 = arith.constant dense<0.000000e+00> : vector<4x128xf32>
    %118 = tpu.matmul %117, %3, %cst_32 {dimension_numbers = #tpu.dot_dimension_numbers<[1], [0], [0], [1], [0, 0, 1, 1], [], []>} : vector<4x32xbf16>, vector<32x128xbf16>, vector<4x128xf32> -> vector<4x128xf32>
    %119 = arith.extf %116 : vector<4x128xbf16> to vector<4x128xf32>
    %120 = arith.addf %119, %118 : vector<4x128xf32>
    %121 = vector.extract_strided_slice %120 {offsets = [0, 0], sizes = [4, 32], strides = [1, 1]} : vector<4x128xf32> to vector<4x32xf32>
    %122 = arith.negf %121 : vector<4x32xf32>
    %123 = math.exp %122 : vector<4x32xf32>
    %cst_33 = arith.constant 1.000000e+00 : f32
    %124 = vector.broadcast %cst_33 : f32 to vector<4x32xf32>
    %125 = arith.addf %124, %123 : vector<4x32xf32>
    %126 = arith.divf %124, %125 : vector<4x32xf32>
    %127 = vector.extract_strided_slice %120 {offsets = [0, 32], sizes = [4, 32], strides = [1, 1]} : vector<4x128xf32> to vector<4x32xf32>
    %128 = arith.negf %127 : vector<4x32xf32>
    %129 = math.exp %128 : vector<4x32xf32>
    %cst_34 = arith.constant 1.000000e+00 : f32
    %130 = vector.broadcast %cst_34 : f32 to vector<4x32xf32>
    %131 = arith.addf %130, %129 : vector<4x32xf32>
    %132 = arith.divf %130, %131 : vector<4x32xf32>
    %133 = vector.extract_strided_slice %120 {offsets = [0, 64], sizes = [4, 32], strides = [1, 1]} : vector<4x128xf32> to vector<4x32xf32>
    %134 = math.tanh %133 : vector<4x32xf32>
    %135 = vector.extract_strided_slice %120 {offsets = [0, 96], sizes = [4, 32], strides = [1, 1]} : vector<4x128xf32> to vector<4x32xf32>
    %136 = arith.negf %135 : vector<4x32xf32>
    %137 = math.exp %136 : vector<4x32xf32>
    %cst_35 = arith.constant 1.000000e+00 : f32
    %138 = vector.broadcast %cst_35 : f32 to vector<4x32xf32>
    %139 = arith.addf %138, %137 : vector<4x32xf32>
    %140 = arith.divf %138, %139 : vector<4x32xf32>
    %141 = arith.mulf %132, %107 : vector<4x32xf32>
    %142 = arith.mulf %126, %134 : vector<4x32xf32>
    %143 = arith.addf %141, %142 : vector<4x32xf32>
    %144 = math.tanh %143 : vector<4x32xf32>
    %145 = arith.mulf %140, %144 : vector<4x32xf32>
    %146 = arith.index_cast %c3_i32 : i32 to index
    %c0_36 = arith.constant 0 : index
    %c0_37 = arith.constant 0 : index
    %147 = vector.load %arg3[%146, %c0_36, %c0_37] : memref<16x4x32xf32, #tpu.memory_space<vmem>>, vector<1x4x32xf32>
    %148 = vector.shape_cast %147 : vector<1x4x32xf32> to vector<4x32xf32>
    %149 = vector.shape_cast %145 : vector<4x32xf32> to vector<1x4x32xf32>
    tpu.vector_store %arg3[%146, %c0_36, %c0_37], %149 {strides = array<i32>} : memref<16x4x32xf32, #tpu.memory_space<vmem>>, vector<1x4x32xf32>,
    %c4_i32 = arith.constant 4 : i32
    %150 = arith.index_cast %c4_i32 : i32 to index
    %c0_38 = arith.constant 0 : index
    %c0_39 = arith.constant 0 : index
    %151 = vector.load %arg1[%150, %c0_38, %c0_39] : memref<16x4x128xbf16, #tpu.memory_space<vmem>>, vector<1x4x128xbf16>
    %152 = vector.shape_cast %151 : vector<1x4x128xbf16> to vector<4x128xbf16>
    %153 = arith.truncf %145 : vector<4x32xf32> to vector<4x32xbf16>
    %cst_40 = arith.constant dense<0.000000e+00> : vector<4x128xf32>
    %154 = tpu.matmul %153, %3, %cst_40 {dimension_numbers = #tpu.dot_dimension_numbers<[1], [0], [0], [1], [0, 0, 1, 1], [], []>} : vector<4x32xbf16>, vector<32x128xbf16>, vector<4x128xf32> -> vector<4x128xf32>
    %155 = arith.extf %152 : vector<4x128xbf16> to vector<4x128xf32>
    %156 = arith.addf %155, %154 : vector<4x128xf32>
    %157 = vector.extract_strided_slice %156 {offsets = [0, 0], sizes = [4, 32], strides = [1, 1]} : vector<4x128xf32> to vector<4x32xf32>
    %158 = arith.negf %157 : vector<4x32xf32>
    %159 = math.exp %158 : vector<4x32xf32>
    %cst_41 = arith.constant 1.000000e+00 : f32
    %160 = vector.broadcast %cst_41 : f32 to vector<4x32xf32>
    %161 = arith.addf %160, %159 : vector<4x32xf32>
    %162 = arith.divf %160, %161 : vector<4x32xf32>
    %163 = vector.extract_strided_slice %156 {offsets = [0, 32], sizes = [4, 32], strides = [1, 1]} : vector<4x128xf32> to vector<4x32xf32>
    %164 = arith.negf %163 : vector<4x32xf32>
    %165 = math.exp %164 : vector<4x32xf32>
    %cst_42 = arith.constant 1.000000e+00 : f32
    %166 = vector.broadcast %cst_42 : f32 to vector<4x32xf32>
    %167 = arith.addf %166, %165 : vector<4x32xf32>
    %168 = arith.divf %166, %167 : vector<4x32xf32>
    %169 = vector.extract_strided_slice %156 {offsets = [0, 64], sizes = [4, 32], strides = [1, 1]} : vector<4x128xf32> to vector<4x32xf32>
    %170 = math.tanh %169 : vector<4x32xf32>
    %171 = vector.extract_strided_slice %156 {offsets = [0, 96], sizes = [4, 32], strides = [1, 1]} : vector<4x128xf32> to vector<4x32xf32>
    %172 = arith.negf %171 : vector<4x32xf32>
    %173 = math.exp %172 : vector<4x32xf32>
    %cst_43 = arith.constant 1.000000e+00 : f32
    %174 = vector.broadcast %cst_43 : f32 to vector<4x32xf32>
    %175 = arith.addf %174, %173 : vector<4x32xf32>
    %176 = arith.divf %174, %175 : vector<4x32xf32>
    %177 = arith.mulf %168, %143 : vector<4x32xf32>
    %178 = arith.mulf %162, %170 : vector<4x32xf32>
    %179 = arith.addf %177, %178 : vector<4x32xf32>
    %180 = math.tanh %179 : vector<4x32xf32>
    %181 = arith.mulf %176, %180 : vector<4x32xf32>
    %182 = arith.index_cast %c4_i32 : i32 to index
    %c0_44 = arith.constant 0 : index
    %c0_45 = arith.constant 0 : index
    %183 = vector.load %arg3[%182, %c0_44, %c0_45] : memref<16x4x32xf32, #tpu.memory_space<vmem>>, vector<1x4x32xf32>
    %184 = vector.shape_cast %183 : vector<1x4x32xf32> to vector<4x32xf32>
    %185 = vector.shape_cast %181 : vector<4x32xf32> to vector<1x4x32xf32>
    tpu.vector_store %arg3[%182, %c0_44, %c0_45], %185 {strides = array<i32>} : memref<16x4x32xf32, #tpu.memory_space<vmem>>, vector<1x4x32xf32>,
    %c5_i32 = arith.constant 5 : i32
    %186 = arith.index_cast %c5_i32 : i32 to index
    %c0_46 = arith.constant 0 : index
    %c0_47 = arith.constant 0 : index
    %187 = vector.load %arg1[%186, %c0_46, %c0_47] : memref<16x4x128xbf16, #tpu.memory_space<vmem>>, vector<1x4x128xbf16>
    %188 = vector.shape_cast %187 : vector<1x4x128xbf16> to vector<4x128xbf16>
    %189 = arith.truncf %181 : vector<4x32xf32> to vector<4x32xbf16>
    %cst_48 = arith.constant dense<0.000000e+00> : vector<4x128xf32>
    %190 = tpu.matmul %189, %3, %cst_48 {dimension_numbers = #tpu.dot_dimension_numbers<[1], [0], [0], [1], [0, 0, 1, 1], [], []>} : vector<4x32xbf16>, vector<32x128xbf16>, vector<4x128xf32> -> vector<4x128xf32>
    %191 = arith.extf %188 : vector<4x128xbf16> to vector<4x128xf32>
    %192 = arith.addf %191, %190 : vector<4x128xf32>
    %193 = vector.extract_strided_slice %192 {offsets = [0, 0], sizes = [4, 32], strides = [1, 1]} : vector<4x128xf32> to vector<4x32xf32>
    %194 = arith.negf %193 : vector<4x32xf32>
    %195 = math.exp %194 : vector<4x32xf32>
    %cst_49 = arith.constant 1.000000e+00 : f32
    %196 = vector.broadcast %cst_49 : f32 to vector<4x32xf32>
    %197 = arith.addf %196, %195 : vector<4x32xf32>
    %198 = arith.divf %196, %197 : vector<4x32xf32>
    %199 = vector.extract_strided_slice %192 {offsets = [0, 32], sizes = [4, 32], strides = [1, 1]} : vector<4x128xf32> to vector<4x32xf32>
    %200 = arith.negf %199 : vector<4x32xf32>
    %201 = math.exp %200 : vector<4x32xf32>
    %cst_50 = arith.constant 1.000000e+00 : f32
    %202 = vector.broadcast %cst_50 : f32 to vector<4x32xf32>
    %203 = arith.addf %202, %201 : vector<4x32xf32>
    %204 = arith.divf %202, %203 : vector<4x32xf32>
    %205 = vector.extract_strided_slice %192 {offsets = [0, 64], sizes = [4, 32], strides = [1, 1]} : vector<4x128xf32> to vector<4x32xf32>
    %206 = math.tanh %205 : vector<4x32xf32>
    %207 = vector.extract_strided_slice %192 {offsets = [0, 96], sizes = [4, 32], strides = [1, 1]} : vector<4x128xf32> to vector<4x32xf32>
    %208 = arith.negf %207 : vector<4x32xf32>
    %209 = math.exp %208 : vector<4x32xf32>
    %cst_51 = arith.constant 1.000000e+00 : f32
    %210 = vector.broadcast %cst_51 : f32 to vector<4x32xf32>
    %211 = arith.addf %210, %209 : vector<4x32xf32>
    %212 = arith.divf %210, %211 : vector<4x32xf32>
    %213 = arith.mulf %204, %179 : vector<4x32xf32>
    %214 = arith.mulf %198, %206 : vector<4x32xf32>
    %215 = arith.addf %213, %214 : vector<4x32xf32>
    %216 = math.tanh %215 : vector<4x32xf32>
    %217 = arith.mulf %212, %216 : vector<4x32xf32>
    %218 = arith.index_cast %c5_i32 : i32 to index
    %c0_52 = arith.constant 0 : index
    %c0_53 = arith.constant 0 : index
    %219 = vector.load %arg3[%218, %c0_52, %c0_53] : memref<16x4x32xf32, #tpu.memory_space<vmem>>, vector<1x4x32xf32>
    %220 = vector.shape_cast %219 : vector<1x4x32xf32> to vector<4x32xf32>
    %221 = vector.shape_cast %217 : vector<4x32xf32> to vector<1x4x32xf32>
    tpu.vector_store %arg3[%218, %c0_52, %c0_53], %221 {strides = array<i32>} : memref<16x4x32xf32, #tpu.memory_space<vmem>>, vector<1x4x32xf32>,
    %c6_i32 = arith.constant 6 : i32
    %222 = arith.index_cast %c6_i32 : i32 to index
    %c0_54 = arith.constant 0 : index
    %c0_55 = arith.constant 0 : index
    %223 = vector.load %arg1[%222, %c0_54, %c0_55] : memref<16x4x128xbf16, #tpu.memory_space<vmem>>, vector<1x4x128xbf16>
    %224 = vector.shape_cast %223 : vector<1x4x128xbf16> to vector<4x128xbf16>
    %225 = arith.truncf %217 : vector<4x32xf32> to vector<4x32xbf16>
    %cst_56 = arith.constant dense<0.000000e+00> : vector<4x128xf32>
    %226 = tpu.matmul %225, %3, %cst_56 {dimension_numbers = #tpu.dot_dimension_numbers<[1], [0], [0], [1], [0, 0, 1, 1], [], []>} : vector<4x32xbf16>, vector<32x128xbf16>, vector<4x128xf32> -> vector<4x128xf32>
    %227 = arith.extf %224 : vector<4x128xbf16> to vector<4x128xf32>
    %228 = arith.addf %227, %226 : vector<4x128xf32>
    %229 = vector.extract_strided_slice %228 {offsets = [0, 0], sizes = [4, 32], strides = [1, 1]} : vector<4x128xf32> to vector<4x32xf32>
    %230 = arith.negf %229 : vector<4x32xf32>
    %231 = math.exp %230 : vector<4x32xf32>
    %cst_57 = arith.constant 1.000000e+00 : f32
    %232 = vector.broadcast %cst_57 : f32 to vector<4x32xf32>
    %233 = arith.addf %232, %231 : vector<4x32xf32>
    %234 = arith.divf %232, %233 : vector<4x32xf32>
    %235 = vector.extract_strided_slice %228 {offsets = [0, 32], sizes = [4, 32], strides = [1, 1]} : vector<4x128xf32> to vector<4x32xf32>
    %236 = arith.negf %235 : vector<4x32xf32>
    %237 = math.exp %236 : vector<4x32xf32>
    %cst_58 = arith.constant 1.000000e+00 : f32
    %238 = vector.broadcast %cst_58 : f32 to vector<4x32xf32>
    %239 = arith.addf %238, %237 : vector<4x32xf32>
    %240 = arith.divf %238, %239 : vector<4x32xf32>
    %241 = vector.extract_strided_slice %228 {offsets = [0, 64], sizes = [4, 32], strides = [1, 1]} : vector<4x128xf32> to vector<4x32xf32>
    %242 = math.tanh %241 : vector<4x32xf32>
    %243 = vector.extract_strided_slice %228 {offsets = [0, 96], sizes = [4, 32], strides = [1, 1]} : vector<4x128xf32> to vector<4x32xf32>
    %244 = arith.negf %243 : vector<4x32xf32>
    %245 = math.exp %244 : vector<4x32xf32>
    %cst_59 = arith.constant 1.000000e+00 : f32
    %246 = vector.broadcast %cst_59 : f32 to vector<4x32xf32>
    %247 = arith.addf %246, %245 : vector<4x32xf32>
    %248 = arith.divf %246, %247 : vector<4x32xf32>
    %249 = arith.mulf %240, %215 : vector<4x32xf32>
    %250 = arith.mulf %234, %242 : vector<4x32xf32>
    %251 = arith.addf %249, %250 : vector<4x32xf32>
    %252 = math.tanh %251 : vector<4x32xf32>
    %253 = arith.mulf %248, %252 : vector<4x32xf32>
    %254 = arith.index_cast %c6_i32 : i32 to index
    %c0_60 = arith.constant 0 : index
    %c0_61 = arith.constant 0 : index
    %255 = vector.load %arg3[%254, %c0_60, %c0_61] : memref<16x4x32xf32, #tpu.memory_space<vmem>>, vector<1x4x32xf32>
    %256 = vector.shape_cast %255 : vector<1x4x32xf32> to vector<4x32xf32>
    %257 = vector.shape_cast %253 : vector<4x32xf32> to vector<1x4x32xf32>
    tpu.vector_store %arg3[%254, %c0_60, %c0_61], %257 {strides = array<i32>} : memref<16x4x32xf32, #tpu.memory_space<vmem>>, vector<1x4x32xf32>,
    %c7_i32 = arith.constant 7 : i32
    %258 = arith.index_cast %c7_i32 : i32 to index
    %c0_62 = arith.constant 0 : index
    %c0_63 = arith.constant 0 : index
    %259 = vector.load %arg1[%258, %c0_62, %c0_63] : memref<16x4x128xbf16, #tpu.memory_space<vmem>>, vector<1x4x128xbf16>
    %260 = vector.shape_cast %259 : vector<1x4x128xbf16> to vector<4x128xbf16>
    %261 = arith.truncf %253 : vector<4x32xf32> to vector<4x32xbf16>
    %cst_64 = arith.constant dense<0.000000e+00> : vector<4x128xf32>
    %262 = tpu.matmul %261, %3, %cst_64 {dimension_numbers = #tpu.dot_dimension_numbers<[1], [0], [0], [1], [0, 0, 1, 1], [], []>} : vector<4x32xbf16>, vector<32x128xbf16>, vector<4x128xf32> -> vector<4x128xf32>
    %263 = arith.extf %260 : vector<4x128xbf16> to vector<4x128xf32>
    %264 = arith.addf %263, %262 : vector<4x128xf32>
    %265 = vector.extract_strided_slice %264 {offsets = [0, 0], sizes = [4, 32], strides = [1, 1]} : vector<4x128xf32> to vector<4x32xf32>
    %266 = arith.negf %265 : vector<4x32xf32>
    %267 = math.exp %266 : vector<4x32xf32>
    %cst_65 = arith.constant 1.000000e+00 : f32
    %268 = vector.broadcast %cst_65 : f32 to vector<4x32xf32>
    %269 = arith.addf %268, %267 : vector<4x32xf32>
    %270 = arith.divf %268, %269 : vector<4x32xf32>
    %271 = vector.extract_strided_slice %264 {offsets = [0, 32], sizes = [4, 32], strides = [1, 1]} : vector<4x128xf32> to vector<4x32xf32>
    %272 = arith.negf %271 : vector<4x32xf32>
    %273 = math.exp %272 : vector<4x32xf32>
    %cst_66 = arith.constant 1.000000e+00 : f32
    %274 = vector.broadcast %cst_66 : f32 to vector<4x32xf32>
    %275 = arith.addf %274, %273 : vector<4x32xf32>
    %276 = arith.divf %274, %275 : vector<4x32xf32>
    %277 = vector.extract_strided_slice %264 {offsets = [0, 64], sizes = [4, 32], strides = [1, 1]} : vector<4x128xf32> to vector<4x32xf32>
    %278 = math.tanh %277 : vector<4x32xf32>
    %279 = vector.extract_strided_slice %264 {offsets = [0, 96], sizes = [4, 32], strides = [1, 1]} : vector<4x128xf32> to vector<4x32xf32>
    %280 = arith.negf %279 : vector<4x32xf32>
    %281 = math.exp %280 : vector<4x32xf32>
    %cst_67 = arith.constant 1.000000e+00 : f32
    %282 = vector.broadcast %cst_67 : f32 to vector<4x32xf32>
    %283 = arith.addf %282, %281 : vector<4x32xf32>
    %284 = arith.divf %282, %283 : vector<4x32xf32>
    %285 = arith.mulf %276, %251 : vector<4x32xf32>
    %286 = arith.mulf %270, %278 : vector<4x32xf32>
    %287 = arith.addf %285, %286 : vector<4x32xf32>
    %288 = math.tanh %287 : vector<4x32xf32>
    %289 = arith.mulf %284, %288 : vector<4x32xf32>
    %290 = arith.index_cast %c7_i32 : i32 to index
    %c0_68 = arith.constant 0 : index
    %c0_69 = arith.constant 0 : index
    %291 = vector.load %arg3[%290, %c0_68, %c0_69] : memref<16x4x32xf32, #tpu.memory_space<vmem>>, vector<1x4x32xf32>
    %292 = vector.shape_cast %291 : vector<1x4x32xf32> to vector<4x32xf32>
    %293 = vector.shape_cast %289 : vector<4x32xf32> to vector<1x4x32xf32>
    tpu.vector_store %arg3[%290, %c0_68, %c0_69], %293 {strides = array<i32>} : memref<16x4x32xf32, #tpu.memory_space<vmem>>, vector<1x4x32xf32>,
    %c8_i32 = arith.constant 8 : i32
    %294 = arith.index_cast %c8_i32 : i32 to index
    %c0_70 = arith.constant 0 : index
    %c0_71 = arith.constant 0 : index
    %295 = vector.load %arg1[%294, %c0_70, %c0_71] : memref<16x4x128xbf16, #tpu.memory_space<vmem>>, vector<1x4x128xbf16>
    %296 = vector.shape_cast %295 : vector<1x4x128xbf16> to vector<4x128xbf16>
    %297 = arith.truncf %289 : vector<4x32xf32> to vector<4x32xbf16>
    %cst_72 = arith.constant dense<0.000000e+00> : vector<4x128xf32>
    %298 = tpu.matmul %297, %3, %cst_72 {dimension_numbers = #tpu.dot_dimension_numbers<[1], [0], [0], [1], [0, 0, 1, 1], [], []>} : vector<4x32xbf16>, vector<32x128xbf16>, vector<4x128xf32> -> vector<4x128xf32>
    %299 = arith.extf %296 : vector<4x128xbf16> to vector<4x128xf32>
    %300 = arith.addf %299, %298 : vector<4x128xf32>
    %301 = vector.extract_strided_slice %300 {offsets = [0, 0], sizes = [4, 32], strides = [1, 1]} : vector<4x128xf32> to vector<4x32xf32>
    %302 = arith.negf %301 : vector<4x32xf32>
    %303 = math.exp %302 : vector<4x32xf32>
    %cst_73 = arith.constant 1.000000e+00 : f32
    %304 = vector.broadcast %cst_73 : f32 to vector<4x32xf32>
    %305 = arith.addf %304, %303 : vector<4x32xf32>
    %306 = arith.divf %304, %305 : vector<4x32xf32>
    %307 = vector.extract_strided_slice %300 {offsets = [0, 32], sizes = [4, 32], strides = [1, 1]} : vector<4x128xf32> to vector<4x32xf32>
    %308 = arith.negf %307 : vector<4x32xf32>
    %309 = math.exp %308 : vector<4x32xf32>
    %cst_74 = arith.constant 1.000000e+00 : f32
    %310 = vector.broadcast %cst_74 : f32 to vector<4x32xf32>
    %311 = arith.addf %310, %309 : vector<4x32xf32>
    %312 = arith.divf %310, %311 : vector<4x32xf32>
    %313 = vector.extract_strided_slice %300 {offsets = [0, 64], sizes = [4, 32], strides = [1, 1]} : vector<4x128xf32> to vector<4x32xf32>
    %314 = math.tanh %313 : vector<4x32xf32>
    %315 = vector.extract_strided_slice %300 {offsets = [0, 96], sizes = [4, 32], strides = [1, 1]} : vector<4x128xf32> to vector<4x32xf32>
    %316 = arith.negf %315 : vector<4x32xf32>
    %317 = math.exp %316 : vector<4x32xf32>
    %cst_75 = arith.constant 1.000000e+00 : f32
    %318 = vector.broadcast %cst_75 : f32 to vector<4x32xf32>
    %319 = arith.addf %318, %317 : vector<4x32xf32>
    %320 = arith.divf %318, %319 : vector<4x32xf32>
    %321 = arith.mulf %312, %287 : vector<4x32xf32>
    %322 = arith.mulf %306, %314 : vector<4x32xf32>
    %323 = arith.addf %321, %322 : vector<4x32xf32>
    %324 = math.tanh %323 : vector<4x32xf32>
    %325 = arith.mulf %320, %324 : vector<4x32xf32>
    %326 = arith.index_cast %c8_i32 : i32 to index
    %c0_76 = arith.constant 0 : index
    %c0_77 = arith.constant 0 : index
    %327 = vector.load %arg3[%326, %c0_76, %c0_77] : memref<16x4x32xf32, #tpu.memory_space<vmem>>, vector<1x4x32xf32>
    %328 = vector.shape_cast %327 : vector<1x4x32xf32> to vector<4x32xf32>
    %329 = vector.shape_cast %325 : vector<4x32xf32> to vector<1x4x32xf32>
    tpu.vector_store %arg3[%326, %c0_76, %c0_77], %329 {strides = array<i32>} : memref<16x4x32xf32, #tpu.memory_space<vmem>>, vector<1x4x32xf32>,
    %c9_i32 = arith.constant 9 : i32
    %330 = arith.index_cast %c9_i32 : i32 to index
    %c0_78 = arith.constant 0 : index
    %c0_79 = arith.constant 0 : index
    %331 = vector.load %arg1[%330, %c0_78, %c0_79] : memref<16x4x128xbf16, #tpu.memory_space<vmem>>, vector<1x4x128xbf16>
    %332 = vector.shape_cast %331 : vector<1x4x128xbf16> to vector<4x128xbf16>
    %333 = arith.truncf %325 : vector<4x32xf32> to vector<4x32xbf16>
    %cst_80 = arith.constant dense<0.000000e+00> : vector<4x128xf32>
    %334 = tpu.matmul %333, %3, %cst_80 {dimension_numbers = #tpu.dot_dimension_numbers<[1], [0], [0], [1], [0, 0, 1, 1], [], []>} : vector<4x32xbf16>, vector<32x128xbf16>, vector<4x128xf32> -> vector<4x128xf32>
    %335 = arith.extf %332 : vector<4x128xbf16> to vector<4x128xf32>
    %336 = arith.addf %335, %334 : vector<4x128xf32>
    %337 = vector.extract_strided_slice %336 {offsets = [0, 0], sizes = [4, 32], strides = [1, 1]} : vector<4x128xf32> to vector<4x32xf32>
    %338 = arith.negf %337 : vector<4x32xf32>
    %339 = math.exp %338 : vector<4x32xf32>
    %cst_81 = arith.constant 1.000000e+00 : f32
    %340 = vector.broadcast %cst_81 : f32 to vector<4x32xf32>
    %341 = arith.addf %340, %339 : vector<4x32xf32>
    %342 = arith.divf %340, %341 : vector<4x32xf32>
    %343 = vector.extract_strided_slice %336 {offsets = [0, 32], sizes = [4, 32], strides = [1, 1]} : vector<4x128xf32> to vector<4x32xf32>
    %344 = arith.negf %343 : vector<4x32xf32>
    %345 = math.exp %344 : vector<4x32xf32>
    %cst_82 = arith.constant 1.000000e+00 : f32
    %346 = vector.broadcast %cst_82 : f32 to vector<4x32xf32>
    %347 = arith.addf %346, %345 : vector<4x32xf32>
    %348 = arith.divf %346, %347 : vector<4x32xf32>
    %349 = vector.extract_strided_slice %336 {offsets = [0, 64], sizes = [4, 32], strides = [1, 1]} : vector<4x128xf32> to vector<4x32xf32>
    %350 = math.tanh %349 : vector<4x32xf32>
    %351 = vector.extract_strided_slice %336 {offsets = [0, 96], sizes = [4, 32], strides = [1, 1]} : vector<4x128xf32> to vector<4x32xf32>
    %352 = arith.negf %351 : vector<4x32xf32>
    %353 = math.exp %352 : vector<4x32xf32>
    %cst_83 = arith.constant 1.000000e+00 : f32
    %354 = vector.broadcast %cst_83 : f32 to vector<4x32xf32>
    %355 = arith.addf %354, %353 : vector<4x32xf32>
    %356 = arith.divf %354, %355 : vector<4x32xf32>
    %357 = arith.mulf %348, %323 : vector<4x32xf32>
    %358 = arith.mulf %342, %350 : vector<4x32xf32>
    %359 = arith.addf %357, %358 : vector<4x32xf32>
    %360 = math.tanh %359 : vector<4x32xf32>
    %361 = arith.mulf %356, %360 : vector<4x32xf32>
    %362 = arith.index_cast %c9_i32 : i32 to index
    %c0_84 = arith.constant 0 : index
    %c0_85 = arith.constant 0 : index
    %363 = vector.load %arg3[%362, %c0_84, %c0_85] : memref<16x4x32xf32, #tpu.memory_space<vmem>>, vector<1x4x32xf32>
    %364 = vector.shape_cast %363 : vector<1x4x32xf32> to vector<4x32xf32>
    %365 = vector.shape_cast %361 : vector<4x32xf32> to vector<1x4x32xf32>
    tpu.vector_store %arg3[%362, %c0_84, %c0_85], %365 {strides = array<i32>} : memref<16x4x32xf32, #tpu.memory_space<vmem>>, vector<1x4x32xf32>,
    %c10_i32 = arith.constant 10 : i32
    %366 = arith.index_cast %c10_i32 : i32 to index
    %c0_86 = arith.constant 0 : index
    %c0_87 = arith.constant 0 : index
    %367 = vector.load %arg1[%366, %c0_86, %c0_87] : memref<16x4x128xbf16, #tpu.memory_space<vmem>>, vector<1x4x128xbf16>
    %368 = vector.shape_cast %367 : vector<1x4x128xbf16> to vector<4x128xbf16>
    %369 = arith.truncf %361 : vector<4x32xf32> to vector<4x32xbf16>
    %cst_88 = arith.constant dense<0.000000e+00> : vector<4x128xf32>
    %370 = tpu.matmul %369, %3, %cst_88 {dimension_numbers = #tpu.dot_dimension_numbers<[1], [0], [0], [1], [0, 0, 1, 1], [], []>} : vector<4x32xbf16>, vector<32x128xbf16>, vector<4x128xf32> -> vector<4x128xf32>
    %371 = arith.extf %368 : vector<4x128xbf16> to vector<4x128xf32>
    %372 = arith.addf %371, %370 : vector<4x128xf32>
    %373 = vector.extract_strided_slice %372 {offsets = [0, 0], sizes = [4, 32], strides = [1, 1]} : vector<4x128xf32> to vector<4x32xf32>
    %374 = arith.negf %373 : vector<4x32xf32>
    %375 = math.exp %374 : vector<4x32xf32>
    %cst_89 = arith.constant 1.000000e+00 : f32
    %376 = vector.broadcast %cst_89 : f32 to vector<4x32xf32>
    %377 = arith.addf %376, %375 : vector<4x32xf32>
    %378 = arith.divf %376, %377 : vector<4x32xf32>
    %379 = vector.extract_strided_slice %372 {offsets = [0, 32], sizes = [4, 32], strides = [1, 1]} : vector<4x128xf32> to vector<4x32xf32>
    %380 = arith.negf %379 : vector<4x32xf32>
    %381 = math.exp %380 : vector<4x32xf32>
    %cst_90 = arith.constant 1.000000e+00 : f32
    %382 = vector.broadcast %cst_90 : f32 to vector<4x32xf32>
    %383 = arith.addf %382, %381 : vector<4x32xf32>
    %384 = arith.divf %382, %383 : vector<4x32xf32>
    %385 = vector.extract_strided_slice %372 {offsets = [0, 64], sizes = [4, 32], strides = [1, 1]} : vector<4x128xf32> to vector<4x32xf32>
    %386 = math.tanh %385 : vector<4x32xf32>
    %387 = vector.extract_strided_slice %372 {offsets = [0, 96], sizes = [4, 32], strides = [1, 1]} : vector<4x128xf32> to vector<4x32xf32>
    %388 = arith.negf %387 : vector<4x32xf32>
    %389 = math.exp %388 : vector<4x32xf32>
    %cst_91 = arith.constant 1.000000e+00 : f32
    %390 = vector.broadcast %cst_91 : f32 to vector<4x32xf32>
    %391 = arith.addf %390, %389 : vector<4x32xf32>
    %392 = arith.divf %390, %391 : vector<4x32xf32>
    %393 = arith.mulf %384, %359 : vector<4x32xf32>
    %394 = arith.mulf %378, %386 : vector<4x32xf32>
    %395 = arith.addf %393, %394 : vector<4x32xf32>
    %396 = math.tanh %395 : vector<4x32xf32>
    %397 = arith.mulf %392, %396 : vector<4x32xf32>
    %398 = arith.index_cast %c10_i32 : i32 to index
    %c0_92 = arith.constant 0 : index
    %c0_93 = arith.constant 0 : index
    %399 = vector.load %arg3[%398, %c0_92, %c0_93] : memref<16x4x32xf32, #tpu.memory_space<vmem>>, vector<1x4x32xf32>
    %400 = vector.shape_cast %399 : vector<1x4x32xf32> to vector<4x32xf32>
    %401 = vector.shape_cast %397 : vector<4x32xf32> to vector<1x4x32xf32>
    tpu.vector_store %arg3[%398, %c0_92, %c0_93], %401 {strides = array<i32>} : memref<16x4x32xf32, #tpu.memory_space<vmem>>, vector<1x4x32xf32>,
    %c11_i32 = arith.constant 11 : i32
    %402 = arith.index_cast %c11_i32 : i32 to index
    %c0_94 = arith.constant 0 : index
    %c0_95 = arith.constant 0 : index
    %403 = vector.load %arg1[%402, %c0_94, %c0_95] : memref<16x4x128xbf16, #tpu.memory_space<vmem>>, vector<1x4x128xbf16>
    %404 = vector.shape_cast %403 : vector<1x4x128xbf16> to vector<4x128xbf16>
    %405 = arith.truncf %397 : vector<4x32xf32> to vector<4x32xbf16>
    %cst_96 = arith.constant dense<0.000000e+00> : vector<4x128xf32>
    %406 = tpu.matmul %405, %3, %cst_96 {dimension_numbers = #tpu.dot_dimension_numbers<[1], [0], [0], [1], [0, 0, 1, 1], [], []>} : vector<4x32xbf16>, vector<32x128xbf16>, vector<4x128xf32> -> vector<4x128xf32>
    %407 = arith.extf %404 : vector<4x128xbf16> to vector<4x128xf32>
    %408 = arith.addf %407, %406 : vector<4x128xf32>
    %409 = vector.extract_strided_slice %408 {offsets = [0, 0], sizes = [4, 32], strides = [1, 1]} : vector<4x128xf32> to vector<4x32xf32>
    %410 = arith.negf %409 : vector<4x32xf32>
    %411 = math.exp %410 : vector<4x32xf32>
    %cst_97 = arith.constant 1.000000e+00 : f32
    %412 = vector.broadcast %cst_97 : f32 to vector<4x32xf32>
    %413 = arith.addf %412, %411 : vector<4x32xf32>
    %414 = arith.divf %412, %413 : vector<4x32xf32>
    %415 = vector.extract_strided_slice %408 {offsets = [0, 32], sizes = [4, 32], strides = [1, 1]} : vector<4x128xf32> to vector<4x32xf32>
    %416 = arith.negf %415 : vector<4x32xf32>
    %417 = math.exp %416 : vector<4x32xf32>
    %cst_98 = arith.constant 1.000000e+00 : f32
    %418 = vector.broadcast %cst_98 : f32 to vector<4x32xf32>
    %419 = arith.addf %418, %417 : vector<4x32xf32>
    %420 = arith.divf %418, %419 : vector<4x32xf32>
    %421 = vector.extract_strided_slice %408 {offsets = [0, 64], sizes = [4, 32], strides = [1, 1]} : vector<4x128xf32> to vector<4x32xf32>
    %422 = math.tanh %421 : vector<4x32xf32>
    %423 = vector.extract_strided_slice %408 {offsets = [0, 96], sizes = [4, 32], strides = [1, 1]} : vector<4x128xf32> to vector<4x32xf32>
    %424 = arith.negf %423 : vector<4x32xf32>
    %425 = math.exp %424 : vector<4x32xf32>
    %cst_99 = arith.constant 1.000000e+00 : f32
    %426 = vector.broadcast %cst_99 : f32 to vector<4x32xf32>
    %427 = arith.addf %426, %425 : vector<4x32xf32>
    %428 = arith.divf %426, %427 : vector<4x32xf32>
    %429 = arith.mulf %420, %395 : vector<4x32xf32>
    %430 = arith.mulf %414, %422 : vector<4x32xf32>
    %431 = arith.addf %429, %430 : vector<4x32xf32>
    %432 = math.tanh %431 : vector<4x32xf32>
    %433 = arith.mulf %428, %432 : vector<4x32xf32>
    %434 = arith.index_cast %c11_i32 : i32 to index
    %c0_100 = arith.constant 0 : index
    %c0_101 = arith.constant 0 : index
    %435 = vector.load %arg3[%434, %c0_100, %c0_101] : memref<16x4x32xf32, #tpu.memory_space<vmem>>, vector<1x4x32xf32>
    %436 = vector.shape_cast %435 : vector<1x4x32xf32> to vector<4x32xf32>
    %437 = vector.shape_cast %433 : vector<4x32xf32> to vector<1x4x32xf32>
    tpu.vector_store %arg3[%434, %c0_100, %c0_101], %437 {strides = array<i32>} : memref<16x4x32xf32, #tpu.memory_space<vmem>>, vector<1x4x32xf32>,
    %c12_i32 = arith.constant 12 : i32
    %438 = arith.index_cast %c12_i32 : i32 to index
    %c0_102 = arith.constant 0 : index
    %c0_103 = arith.constant 0 : index
    %439 = vector.load %arg1[%438, %c0_102, %c0_103] : memref<16x4x128xbf16, #tpu.memory_space<vmem>>, vector<1x4x128xbf16>
    %440 = vector.shape_cast %439 : vector<1x4x128xbf16> to vector<4x128xbf16>
    %441 = arith.truncf %433 : vector<4x32xf32> to vector<4x32xbf16>
    %cst_104 = arith.constant dense<0.000000e+00> : vector<4x128xf32>
    %442 = tpu.matmul %441, %3, %cst_104 {dimension_numbers = #tpu.dot_dimension_numbers<[1], [0], [0], [1], [0, 0, 1, 1], [], []>} : vector<4x32xbf16>, vector<32x128xbf16>, vector<4x128xf32> -> vector<4x128xf32>
    %443 = arith.extf %440 : vector<4x128xbf16> to vector<4x128xf32>
    %444 = arith.addf %443, %442 : vector<4x128xf32>
    %445 = vector.extract_strided_slice %444 {offsets = [0, 0], sizes = [4, 32], strides = [1, 1]} : vector<4x128xf32> to vector<4x32xf32>
    %446 = arith.negf %445 : vector<4x32xf32>
    %447 = math.exp %446 : vector<4x32xf32>
    %cst_105 = arith.constant 1.000000e+00 : f32
    %448 = vector.broadcast %cst_105 : f32 to vector<4x32xf32>
    %449 = arith.addf %448, %447 : vector<4x32xf32>
    %450 = arith.divf %448, %449 : vector<4x32xf32>
    %451 = vector.extract_strided_slice %444 {offsets = [0, 32], sizes = [4, 32], strides = [1, 1]} : vector<4x128xf32> to vector<4x32xf32>
    %452 = arith.negf %451 : vector<4x32xf32>
    %453 = math.exp %452 : vector<4x32xf32>
    %cst_106 = arith.constant 1.000000e+00 : f32
    %454 = vector.broadcast %cst_106 : f32 to vector<4x32xf32>
    %455 = arith.addf %454, %453 : vector<4x32xf32>
    %456 = arith.divf %454, %455 : vector<4x32xf32>
    %457 = vector.extract_strided_slice %444 {offsets = [0, 64], sizes = [4, 32], strides = [1, 1]} : vector<4x128xf32> to vector<4x32xf32>
    %458 = math.tanh %457 : vector<4x32xf32>
    %459 = vector.extract_strided_slice %444 {offsets = [0, 96], sizes = [4, 32], strides = [1, 1]} : vector<4x128xf32> to vector<4x32xf32>
    %460 = arith.negf %459 : vector<4x32xf32>
    %461 = math.exp %460 : vector<4x32xf32>
    %cst_107 = arith.constant 1.000000e+00 : f32
    %462 = vector.broadcast %cst_107 : f32 to vector<4x32xf32>
    %463 = arith.addf %462, %461 : vector<4x32xf32>
    %464 = arith.divf %462, %463 : vector<4x32xf32>
    %465 = arith.mulf %456, %431 : vector<4x32xf32>
    %466 = arith.mulf %450, %458 : vector<4x32xf32>
    %467 = arith.addf %465, %466 : vector<4x32xf32>
    %468 = math.tanh %467 : vector<4x32xf32>
    %469 = arith.mulf %464, %468 : vector<4x32xf32>
    %470 = arith.index_cast %c12_i32 : i32 to index
    %c0_108 = arith.constant 0 : index
    %c0_109 = arith.constant 0 : index
    %471 = vector.load %arg3[%470, %c0_108, %c0_109] : memref<16x4x32xf32, #tpu.memory_space<vmem>>, vector<1x4x32xf32>
    %472 = vector.shape_cast %471 : vector<1x4x32xf32> to vector<4x32xf32>
    %473 = vector.shape_cast %469 : vector<4x32xf32> to vector<1x4x32xf32>
    tpu.vector_store %arg3[%470, %c0_108, %c0_109], %473 {strides = array<i32>} : memref<16x4x32xf32, #tpu.memory_space<vmem>>, vector<1x4x32xf32>,
    %c13_i32 = arith.constant 13 : i32
    %474 = arith.index_cast %c13_i32 : i32 to index
    %c0_110 = arith.constant 0 : index
    %c0_111 = arith.constant 0 : index
    %475 = vector.load %arg1[%474, %c0_110, %c0_111] : memref<16x4x128xbf16, #tpu.memory_space<vmem>>, vector<1x4x128xbf16>
    %476 = vector.shape_cast %475 : vector<1x4x128xbf16> to vector<4x128xbf16>
    %477 = arith.truncf %469 : vector<4x32xf32> to vector<4x32xbf16>
    %cst_112 = arith.constant dense<0.000000e+00> : vector<4x128xf32>
    %478 = tpu.matmul %477, %3, %cst_112 {dimension_numbers = #tpu.dot_dimension_numbers<[1], [0], [0], [1], [0, 0, 1, 1], [], []>} : vector<4x32xbf16>, vector<32x128xbf16>, vector<4x128xf32> -> vector<4x128xf32>
    %479 = arith.extf %476 : vector<4x128xbf16> to vector<4x128xf32>
    %480 = arith.addf %479, %478 : vector<4x128xf32>
    %481 = vector.extract_strided_slice %480 {offsets = [0, 0], sizes = [4, 32], strides = [1, 1]} : vector<4x128xf32> to vector<4x32xf32>
    %482 = arith.negf %481 : vector<4x32xf32>
    %483 = math.exp %482 : vector<4x32xf32>
    %cst_113 = arith.constant 1.000000e+00 : f32
    %484 = vector.broadcast %cst_113 : f32 to vector<4x32xf32>
    %485 = arith.addf %484, %483 : vector<4x32xf32>
    %486 = arith.divf %484, %485 : vector<4x32xf32>
    %487 = vector.extract_strided_slice %480 {offsets = [0, 32], sizes = [4, 32], strides = [1, 1]} : vector<4x128xf32> to vector<4x32xf32>
    %488 = arith.negf %487 : vector<4x32xf32>
    %489 = math.exp %488 : vector<4x32xf32>
    %cst_114 = arith.constant 1.000000e+00 : f32
    %490 = vector.broadcast %cst_114 : f32 to vector<4x32xf32>
    %491 = arith.addf %490, %489 : vector<4x32xf32>
    %492 = arith.divf %490, %491 : vector<4x32xf32>
    %493 = vector.extract_strided_slice %480 {offsets = [0, 64], sizes = [4, 32], strides = [1, 1]} : vector<4x128xf32> to vector<4x32xf32>
    %494 = math.tanh %493 : vector<4x32xf32>
    %495 = vector.extract_strided_slice %480 {offsets = [0, 96], sizes = [4, 32], strides = [1, 1]} : vector<4x128xf32> to vector<4x32xf32>
    %496 = arith.negf %495 : vector<4x32xf32>
    %497 = math.exp %496 : vector<4x32xf32>
    %cst_115 = arith.constant 1.000000e+00 : f32
    %498 = vector.broadcast %cst_115 : f32 to vector<4x32xf32>
    %499 = arith.addf %498, %497 : vector<4x32xf32>
    %500 = arith.divf %498, %499 : vector<4x32xf32>
    %501 = arith.mulf %492, %467 : vector<4x32xf32>
    %502 = arith.mulf %486, %494 : vector<4x32xf32>
    %503 = arith.addf %501, %502 : vector<4x32xf32>
    %504 = math.tanh %503 : vector<4x32xf32>
    %505 = arith.mulf %500, %504 : vector<4x32xf32>
    %506 = arith.index_cast %c13_i32 : i32 to index
    %c0_116 = arith.constant 0 : index
    %c0_117 = arith.constant 0 : index
    %507 = vector.load %arg3[%506, %c0_116, %c0_117] : memref<16x4x32xf32, #tpu.memory_space<vmem>>, vector<1x4x32xf32>
    %508 = vector.shape_cast %507 : vector<1x4x32xf32> to vector<4x32xf32>
    %509 = vector.shape_cast %505 : vector<4x32xf32> to vector<1x4x32xf32>
    tpu.vector_store %arg3[%506, %c0_116, %c0_117], %509 {strides = array<i32>} : memref<16x4x32xf32, #tpu.memory_space<vmem>>, vector<1x4x32xf32>,
    %c14_i32 = arith.constant 14 : i32
    %510 = arith.index_cast %c14_i32 : i32 to index
    %c0_118 = arith.constant 0 : index
    %c0_119 = arith.constant 0 : index
    %511 = vector.load %arg1[%510, %c0_118, %c0_119] : memref<16x4x128xbf16, #tpu.memory_space<vmem>>, vector<1x4x128xbf16>
    %512 = vector.shape_cast %511 : vector<1x4x128xbf16> to vector<4x128xbf16>
    %513 = arith.truncf %505 : vector<4x32xf32> to vector<4x32xbf16>
    %cst_120 = arith.constant dense<0.000000e+00> : vector<4x128xf32>
    %514 = tpu.matmul %513, %3, %cst_120 {dimension_numbers = #tpu.dot_dimension_numbers<[1], [0], [0], [1], [0, 0, 1, 1], [], []>} : vector<4x32xbf16>, vector<32x128xbf16>, vector<4x128xf32> -> vector<4x128xf32>
    %515 = arith.extf %512 : vector<4x128xbf16> to vector<4x128xf32>
    %516 = arith.addf %515, %514 : vector<4x128xf32>
    %517 = vector.extract_strided_slice %516 {offsets = [0, 0], sizes = [4, 32], strides = [1, 1]} : vector<4x128xf32> to vector<4x32xf32>
    %518 = arith.negf %517 : vector<4x32xf32>
    %519 = math.exp %518 : vector<4x32xf32>
    %cst_121 = arith.constant 1.000000e+00 : f32
    %520 = vector.broadcast %cst_121 : f32 to vector<4x32xf32>
    %521 = arith.addf %520, %519 : vector<4x32xf32>
    %522 = arith.divf %520, %521 : vector<4x32xf32>
    %523 = vector.extract_strided_slice %516 {offsets = [0, 32], sizes = [4, 32], strides = [1, 1]} : vector<4x128xf32> to vector<4x32xf32>
    %524 = arith.negf %523 : vector<4x32xf32>
    %525 = math.exp %524 : vector<4x32xf32>
    %cst_122 = arith.constant 1.000000e+00 : f32
    %526 = vector.broadcast %cst_122 : f32 to vector<4x32xf32>
    %527 = arith.addf %526, %525 : vector<4x32xf32>
    %528 = arith.divf %526, %527 : vector<4x32xf32>
    %529 = vector.extract_strided_slice %516 {offsets = [0, 64], sizes = [4, 32], strides = [1, 1]} : vector<4x128xf32> to vector<4x32xf32>
    %530 = math.tanh %529 : vector<4x32xf32>
    %531 = vector.extract_strided_slice %516 {offsets = [0, 96], sizes = [4, 32], strides = [1, 1]} : vector<4x128xf32> to vector<4x32xf32>
    %532 = arith.negf %531 : vector<4x32xf32>
    %533 = math.exp %532 : vector<4x32xf32>
    %cst_123 = arith.constant 1.000000e+00 : f32
    %534 = vector.broadcast %cst_123 : f32 to vector<4x32xf32>
    %535 = arith.addf %534, %533 : vector<4x32xf32>
    %536 = arith.divf %534, %535 : vector<4x32xf32>
    %537 = arith.mulf %528, %503 : vector<4x32xf32>
    %538 = arith.mulf %522, %530 : vector<4x32xf32>
    %539 = arith.addf %537, %538 : vector<4x32xf32>
    %540 = math.tanh %539 : vector<4x32xf32>
    %541 = arith.mulf %536, %540 : vector<4x32xf32>
    %542 = arith.index_cast %c14_i32 : i32 to index
    %c0_124 = arith.constant 0 : index
    %c0_125 = arith.constant 0 : index
    %543 = vector.load %arg3[%542, %c0_124, %c0_125] : memref<16x4x32xf32, #tpu.memory_space<vmem>>, vector<1x4x32xf32>
    %544 = vector.shape_cast %543 : vector<1x4x32xf32> to vector<4x32xf32>
    %545 = vector.shape_cast %541 : vector<4x32xf32> to vector<1x4x32xf32>
    tpu.vector_store %arg3[%542, %c0_124, %c0_125], %545 {strides = array<i32>} : memref<16x4x32xf32, #tpu.memory_space<vmem>>, vector<1x4x32xf32>,
    %c15_i32 = arith.constant 15 : i32
    %546 = arith.index_cast %c15_i32 : i32 to index
    %c0_126 = arith.constant 0 : index
    %c0_127 = arith.constant 0 : index
    %547 = vector.load %arg1[%546, %c0_126, %c0_127] : memref<16x4x128xbf16, #tpu.memory_space<vmem>>, vector<1x4x128xbf16>
    %548 = vector.shape_cast %547 : vector<1x4x128xbf16> to vector<4x128xbf16>
    %549 = arith.truncf %541 : vector<4x32xf32> to vector<4x32xbf16>
    %cst_128 = arith.constant dense<0.000000e+00> : vector<4x128xf32>
    %550 = tpu.matmul %549, %3, %cst_128 {dimension_numbers = #tpu.dot_dimension_numbers<[1], [0], [0], [1], [0, 0, 1, 1], [], []>} : vector<4x32xbf16>, vector<32x128xbf16>, vector<4x128xf32> -> vector<4x128xf32>
    %551 = arith.extf %548 : vector<4x128xbf16> to vector<4x128xf32>
    %552 = arith.addf %551, %550 : vector<4x128xf32>
    %553 = vector.extract_strided_slice %552 {offsets = [0, 0], sizes = [4, 32], strides = [1, 1]} : vector<4x128xf32> to vector<4x32xf32>
    %554 = arith.negf %553 : vector<4x32xf32>
    %555 = math.exp %554 : vector<4x32xf32>
    %cst_129 = arith.constant 1.000000e+00 : f32
    %556 = vector.broadcast %cst_129 : f32 to vector<4x32xf32>
    %557 = arith.addf %556, %555 : vector<4x32xf32>
    %558 = arith.divf %556, %557 : vector<4x32xf32>
    %559 = vector.extract_strided_slice %552 {offsets = [0, 32], sizes = [4, 32], strides = [1, 1]} : vector<4x128xf32> to vector<4x32xf32>
    %560 = arith.negf %559 : vector<4x32xf32>
    %561 = math.exp %560 : vector<4x32xf32>
    %cst_130 = arith.constant 1.000000e+00 : f32
    %562 = vector.broadcast %cst_130 : f32 to vector<4x32xf32>
    %563 = arith.addf %562, %561 : vector<4x32xf32>
    %564 = arith.divf %562, %563 : vector<4x32xf32>
    %565 = vector.extract_strided_slice %552 {offsets = [0, 64], sizes = [4, 32], strides = [1, 1]} : vector<4x128xf32> to vector<4x32xf32>
    %566 = math.tanh %565 : vector<4x32xf32>
    %567 = vector.extract_strided_slice %552 {offsets = [0, 96], sizes = [4, 32], strides = [1, 1]} : vector<4x128xf32> to vector<4x32xf32>
    %568 = arith.negf %567 : vector<4x32xf32>
    %569 = math.exp %568 : vector<4x32xf32>
    %cst_131 = arith.constant 1.000000e+00 : f32
    %570 = vector.broadcast %cst_131 : f32 to vector<4x32xf32>
    %571 = arith.addf %570, %569 : vector<4x32xf32>
    %572 = arith.divf %570, %571 : vector<4x32xf32>
    %573 = arith.mulf %564, %539 : vector<4x32xf32>
    %574 = arith.mulf %558, %566 : vector<4x32xf32>
    %575 = arith.addf %573, %574 : vector<4x32xf32>
    %576 = math.tanh %575 : vector<4x32xf32>
    %577 = arith.mulf %572, %576 : vector<4x32xf32>
    %578 = arith.index_cast %c15_i32 : i32 to index
    %c0_132 = arith.constant 0 : index
    %c0_133 = arith.constant 0 : index
    %579 = vector.load %arg3[%578, %c0_132, %c0_133] : memref<16x4x32xf32, #tpu.memory_space<vmem>>, vector<1x4x32xf32>
    %580 = vector.shape_cast %579 : vector<1x4x32xf32> to vector<4x32xf32>
    %581 = vector.shape_cast %577 : vector<4x32xf32> to vector<1x4x32xf32>
    tpu.vector_store %arg3[%578, %c0_132, %c0_133], %581 {strides = array<i32>} : memref<16x4x32xf32, #tpu.memory_space<vmem>>, vector<1x4x32xf32>,
    %c16_i32 = arith.constant 16 : i32
    %c0_134 = arith.constant 0 : index
    %c0_135 = arith.constant 0 : index
    %582 = vector.load %arg6[%c0_134, %c0_135] : memref<4x32xf32, #tpu.memory_space<vmem>>, vector<4x32xf32>
    tpu.vector_store %arg6[%c0_134, %c0_135], %577 {strides = array<i32>} : memref<4x32xf32, #tpu.memory_space<vmem>>, vector<4x32xf32>,
    %c0_136 = arith.constant 0 : index
    %c0_137 = arith.constant 0 : index
    %583 = vector.load %arg7[%c0_136, %c0_137] : memref<4x32xf32, #tpu.memory_space<vmem>>, vector<4x32xf32>
    tpu.vector_store %arg7[%c0_136, %c0_137], %575 {strides = array<i32>} : memref<4x32xf32, #tpu.memory_space<vmem>>, vector<4x32xf32>,
    %c0_i32_138 = arith.constant 0 : i32
    %584 = arith.cmpi eq, %arg0, %c0_i32_138 : i32
    %585 = arith.extui %584 : i1 to i32
    %c0_i32_139 = arith.constant 0 : i32
    %586 = arith.cmpi ne, %585, %c0_i32_139 : i32
    scf.if %586 {
      %c0_140 = arith.constant 0 : index
      %c0_141 = arith.constant 0 : index
      %587 = vector.load %arg4[%c0_140, %c0_141] : memref<4x32xf32, #tpu.memory_space<vmem>>, vector<4x32xf32>
      tpu.vector_store %arg4[%c0_140, %c0_141], %577 {strides = array<i32>} : memref<4x32xf32, #tpu.memory_space<vmem>>, vector<4x32xf32>,
      %c0_142 = arith.constant 0 : index
      %c0_143 = arith.constant 0 : index
      %588 = vector.load %arg5[%c0_142, %c0_143] : memref<4x32xf32, #tpu.memory_space<vmem>>, vector<4x32xf32>
      tpu.vector_store %arg5[%c0_142, %c0_143], %575 {strides = array<i32>} : memref<4x32xf32, #tpu.memory_space<vmem>>, vector<4x32xf32>,
    } else {
    }
    return
  }
  func.func @transform_0(%arg0: i32) -> (i32, i32, i32) {
    %c0_i32 = arith.constant 0 : i32
    %c0_i32_0 = arith.constant 0 : i32
    %c0_i32_1 = arith.constant 0 : i32
    return %arg0, %c0_i32, %c0_i32_0 : i32, i32, i32
  }
  func.func @transform_1(%arg0: i32) -> (i32, i32) {
    %c0_i32 = arith.constant 0 : i32
    %c0_i32_0 = arith.constant 0 : i32
    %c0_i32_1 = arith.constant 0 : i32
    return %c0_i32, %c0_i32_0 : i32, i32
  }
  func.func @transform_2(%arg0: i32) -> (i32, i32, i32) {
    %c0_i32 = arith.constant 0 : i32
    %c0_i32_0 = arith.constant 0 : i32
    %c0_i32_1 = arith.constant 0 : i32
    return %arg0, %c0_i32, %c0_i32_0 : i32, i32, i32
  }
  func.func @transform_3(%arg0: i32) -> (i32, i32) {
    %c0_i32 = arith.constant 0 : i32
    %c0_i32_0 = arith.constant 0 : i32
    %c0_i32_1 = arith.constant 0 : i32
    return %c0_i32, %c0_i32_0 : i32, i32
  }
  func.func @transform_4(%arg0: i32) -> (i32, i32) {
    %c0_i32 = arith.constant 0 : i32
    %c0_i32_0 = arith.constant 0 : i32
    %c0_i32_1 = arith.constant 0 : i32
    return %c0_i32, %c0_i32_0 : i32, i32
  }
}

module attributes {stable_mosaic.version = 11 : i64} {
  func.func @_lstm_chunk_kernel(%arg0: i32, %arg1: memref<16x4x128xbf16, #tpu.memory_space<vmem>>, %arg2: memref<32x128xbf16, #tpu.memory_space<vmem>>, %arg3: memref<16x4x32xf32, #tpu.memory_space<vmem>>, %arg4: memref<4x32xf32, #tpu.memory_space<vmem>>, %arg5: memref<4x32xf32, #tpu.memory_space<vmem>>, %arg6: memref<4x32xf32, #tpu.memory_space<vmem>>, %arg7: memref<4x32xf32, #tpu.memory_space<vmem>>) attributes {dimension_semantics = [#tpu.dimension_semantics<arbitrary>], iteration_bounds = array<i64: 1>, scalar_prefetch = 0 : i64, scratch_operands = 2 : i64, tpu.core_type = #tpu.core_type<tc>, window_params = [{transform_indices = @transform_0, window_bounds = array<i64: 16, 4, 128>}, {pipeline_mode = #tpu.pipeline_mode<synchronous>, transform_indices = @transform_1, window_bounds = array<i64: 32, 128>}, {transform_indices = @transform_2, window_bounds = array<i64: 16, 4, 32>}, {pipeline_mode = #tpu.pipeline_mode<synchronous>, transform_indices = @transform_3, window_bounds = array<i64: 4, 32>}, {pipeline_mode = #tpu.pipeline_mode<synchronous>, transform_indices = @transform_4, window_bounds = array<i64: 4, 32>}]} {
    %c0_i32 = arith.constant 0 : i32
    %0 = arith.cmpi eq, %arg0, %c0_i32 : i32
    %1 = arith.extui %0 : i1 to i32
    %c0_i32_0 = arith.constant 0 : i32
    %2 = arith.cmpi ne, %1, %c0_i32_0 : i32
    scf.if %2 {
      %cst_140 = arith.constant 0.000000e+00 : f32
      %587 = vector.broadcast %cst_140 : f32 to vector<4x32xf32>
      %c0_141 = arith.constant 0 : index
      %c0_142 = arith.constant 0 : index
      %588 = vector.load %arg6[%c0_141, %c0_142] : memref<4x32xf32, #tpu.memory_space<vmem>>, vector<4x32xf32>
      tpu.vector_store %arg6[%c0_141, %c0_142], %587 {strides = array<i32>} : memref<4x32xf32, #tpu.memory_space<vmem>>, vector<4x32xf32>,
      %cst_143 = arith.constant 0.000000e+00 : f32
      %589 = vector.broadcast %cst_143 : f32 to vector<4x32xf32>
      %c0_144 = arith.constant 0 : index
      %c0_145 = arith.constant 0 : index
      %590 = vector.load %arg7[%c0_144, %c0_145] : memref<4x32xf32, #tpu.memory_space<vmem>>, vector<4x32xf32>
      tpu.vector_store %arg7[%c0_144, %c0_145], %589 {strides = array<i32>} : memref<4x32xf32, #tpu.memory_space<vmem>>, vector<4x32xf32>,
    } else {
    }
    %c0 = arith.constant 0 : index
    %c0_1 = arith.constant 0 : index
    %3 = vector.load %arg2[%c0, %c0_1] : memref<32x128xbf16, #tpu.memory_space<vmem>>, vector<32x128xbf16>
    %c0_2 = arith.constant 0 : index
    %c0_3 = arith.constant 0 : index
    %4 = vector.load %arg6[%c0_2, %c0_3] : memref<4x32xf32, #tpu.memory_space<vmem>>, vector<4x32xf32>
    %c0_4 = arith.constant 0 : index
    %c0_5 = arith.constant 0 : index
    %5 = vector.load %arg7[%c0_4, %c0_5] : memref<4x32xf32, #tpu.memory_space<vmem>>, vector<4x32xf32>
    %c0_i32_6 = arith.constant 0 : i32
    %6 = arith.index_cast %c0_i32_6 : i32 to index
    %c0_7 = arith.constant 0 : index
    %c0_8 = arith.constant 0 : index
    %7 = vector.load %arg1[%6, %c0_7, %c0_8] : memref<16x4x128xbf16, #tpu.memory_space<vmem>>, vector<1x4x128xbf16>
    %8 = vector.shape_cast %7 : vector<1x4x128xbf16> to vector<4x128xbf16>
    %9 = arith.truncf %4 : vector<4x32xf32> to vector<4x32xbf16>
    %cst = arith.constant dense<0.000000e+00> : vector<4x128xf32>
    %10 = tpu.matmul %9, %3, %cst {dimension_numbers = #tpu.dot_dimension_numbers<[1], [0], [0], [1], [0, 0, 1, 1], [], []>} : vector<4x32xbf16>, vector<32x128xbf16>, vector<4x128xf32> -> vector<4x128xf32>
    %11 = arith.extf %8 : vector<4x128xbf16> to vector<4x128xf32>
    %12 = arith.addf %11, %10 : vector<4x128xf32>
    %13 = vector.extract_strided_slice %12 {offsets = [0, 0], sizes = [4, 32], strides = [1, 1]} : vector<4x128xf32> to vector<4x32xf32>
    %14 = arith.negf %13 : vector<4x32xf32>
    %15 = math.exp %14 : vector<4x32xf32>
    %cst_9 = arith.constant 1.000000e+00 : f32
    %16 = vector.broadcast %cst_9 : f32 to vector<4x32xf32>
    %17 = arith.addf %16, %15 : vector<4x32xf32>
    %18 = arith.divf %16, %17 : vector<4x32xf32>
    %19 = vector.extract_strided_slice %12 {offsets = [0, 32], sizes = [4, 32], strides = [1, 1]} : vector<4x128xf32> to vector<4x32xf32>
    %20 = arith.negf %19 : vector<4x32xf32>
    %21 = math.exp %20 : vector<4x32xf32>
    %cst_10 = arith.constant 1.000000e+00 : f32
    %22 = vector.broadcast %cst_10 : f32 to vector<4x32xf32>
    %23 = arith.addf %22, %21 : vector<4x32xf32>
    %24 = arith.divf %22, %23 : vector<4x32xf32>
    %25 = vector.extract_strided_slice %12 {offsets = [0, 64], sizes = [4, 32], strides = [1, 1]} : vector<4x128xf32> to vector<4x32xf32>
    %26 = math.tanh %25 : vector<4x32xf32>
    %27 = vector.extract_strided_slice %12 {offsets = [0, 96], sizes = [4, 32], strides = [1, 1]} : vector<4x128xf32> to vector<4x32xf32>
    %28 = arith.negf %27 : vector<4x32xf32>
    %29 = math.exp %28 : vector<4x32xf32>
    %cst_11 = arith.constant 1.000000e+00 : f32
    %30 = vector.broadcast %cst_11 : f32 to vector<4x32xf32>
    %31 = arith.addf %30, %29 : vector<4x32xf32>
    %32 = arith.divf %30, %31 : vector<4x32xf32>
    %33 = arith.mulf %24, %5 : vector<4x32xf32>
    %34 = arith.mulf %18, %26 : vector<4x32xf32>
    %35 = arith.addf %33, %34 : vector<4x32xf32>
    %36 = math.tanh %35 : vector<4x32xf32>
    %37 = arith.mulf %32, %36 : vector<4x32xf32>
    %38 = arith.index_cast %c0_i32_6 : i32 to index
    %c0_12 = arith.constant 0 : index
    %c0_13 = arith.constant 0 : index
    %39 = vector.load %arg3[%38, %c0_12, %c0_13] : memref<16x4x32xf32, #tpu.memory_space<vmem>>, vector<1x4x32xf32>
    %40 = vector.shape_cast %39 : vector<1x4x32xf32> to vector<4x32xf32>
    %41 = vector.shape_cast %37 : vector<4x32xf32> to vector<1x4x32xf32>
    tpu.vector_store %arg3[%38, %c0_12, %c0_13], %41 {strides = array<i32>} : memref<16x4x32xf32, #tpu.memory_space<vmem>>, vector<1x4x32xf32>,
    %c1_i32 = arith.constant 1 : i32
    %42 = arith.index_cast %c1_i32 : i32 to index
    %c0_14 = arith.constant 0 : index
    %c0_15 = arith.constant 0 : index
    %43 = vector.load %arg1[%42, %c0_14, %c0_15] : memref<16x4x128xbf16, #tpu.memory_space<vmem>>, vector<1x4x128xbf16>
    %44 = vector.shape_cast %43 : vector<1x4x128xbf16> to vector<4x128xbf16>
    %45 = arith.truncf %37 : vector<4x32xf32> to vector<4x32xbf16>
    %cst_16 = arith.constant dense<0.000000e+00> : vector<4x128xf32>
    %46 = tpu.matmul %45, %3, %cst_16 {dimension_numbers = #tpu.dot_dimension_numbers<[1], [0], [0], [1], [0, 0, 1, 1], [], []>} : vector<4x32xbf16>, vector<32x128xbf16>, vector<4x128xf32> -> vector<4x128xf32>
    %47 = arith.extf %44 : vector<4x128xbf16> to vector<4x128xf32>
    %48 = arith.addf %47, %46 : vector<4x128xf32>
    %49 = vector.extract_strided_slice %48 {offsets = [0, 0], sizes = [4, 32], strides = [1, 1]} : vector<4x128xf32> to vector<4x32xf32>
    %50 = arith.negf %49 : vector<4x32xf32>
    %51 = math.exp %50 : vector<4x32xf32>
    %cst_17 = arith.constant 1.000000e+00 : f32
    %52 = vector.broadcast %cst_17 : f32 to vector<4x32xf32>
    %53 = arith.addf %52, %51 : vector<4x32xf32>
    %54 = arith.divf %52, %53 : vector<4x32xf32>
    %55 = vector.extract_strided_slice %48 {offsets = [0, 32], sizes = [4, 32], strides = [1, 1]} : vector<4x128xf32> to vector<4x32xf32>
    %56 = arith.negf %55 : vector<4x32xf32>
    %57 = math.exp %56 : vector<4x32xf32>
    %cst_18 = arith.constant 1.000000e+00 : f32
    %58 = vector.broadcast %cst_18 : f32 to vector<4x32xf32>
    %59 = arith.addf %58, %57 : vector<4x32xf32>
    %60 = arith.divf %58, %59 : vector<4x32xf32>
    %61 = vector.extract_strided_slice %48 {offsets = [0, 64], sizes = [4, 32], strides = [1, 1]} : vector<4x128xf32> to vector<4x32xf32>
    %62 = math.tanh %61 : vector<4x32xf32>
    %63 = vector.extract_strided_slice %48 {offsets = [0, 96], sizes = [4, 32], strides = [1, 1]} : vector<4x128xf32> to vector<4x32xf32>
    %64 = arith.negf %63 : vector<4x32xf32>
    %65 = math.exp %64 : vector<4x32xf32>
    %cst_19 = arith.constant 1.000000e+00 : f32
    %66 = vector.broadcast %cst_19 : f32 to vector<4x32xf32>
    %67 = arith.addf %66, %65 : vector<4x32xf32>
    %68 = arith.divf %66, %67 : vector<4x32xf32>
    %69 = arith.mulf %60, %35 : vector<4x32xf32>
    %70 = arith.mulf %54, %62 : vector<4x32xf32>
    %71 = arith.addf %69, %70 : vector<4x32xf32>
    %72 = math.tanh %71 : vector<4x32xf32>
    %73 = arith.mulf %68, %72 : vector<4x32xf32>
    %74 = arith.index_cast %c1_i32 : i32 to index
    %c0_20 = arith.constant 0 : index
    %c0_21 = arith.constant 0 : index
    %75 = vector.load %arg3[%74, %c0_20, %c0_21] : memref<16x4x32xf32, #tpu.memory_space<vmem>>, vector<1x4x32xf32>
    %76 = vector.shape_cast %75 : vector<1x4x32xf32> to vector<4x32xf32>
    %77 = vector.shape_cast %73 : vector<4x32xf32> to vector<1x4x32xf32>
    tpu.vector_store %arg3[%74, %c0_20, %c0_21], %77 {strides = array<i32>} : memref<16x4x32xf32, #tpu.memory_space<vmem>>, vector<1x4x32xf32>,
    %c2_i32 = arith.constant 2 : i32
    %78 = arith.index_cast %c2_i32 : i32 to index
    %c0_22 = arith.constant 0 : index
    %c0_23 = arith.constant 0 : index
    %79 = vector.load %arg1[%78, %c0_22, %c0_23] : memref<16x4x128xbf16, #tpu.memory_space<vmem>>, vector<1x4x128xbf16>
    %80 = vector.shape_cast %79 : vector<1x4x128xbf16> to vector<4x128xbf16>
    %81 = arith.truncf %73 : vector<4x32xf32> to vector<4x32xbf16>
    %cst_24 = arith.constant dense<0.000000e+00> : vector<4x128xf32>
    %82 = tpu.matmul %81, %3, %cst_24 {dimension_numbers = #tpu.dot_dimension_numbers<[1], [0], [0], [1], [0, 0, 1, 1], [], []>} : vector<4x32xbf16>, vector<32x128xbf16>, vector<4x128xf32> -> vector<4x128xf32>
    %83 = arith.extf %80 : vector<4x128xbf16> to vector<4x128xf32>
    %84 = arith.addf %83, %82 : vector<4x128xf32>
    %85 = vector.extract_strided_slice %84 {offsets = [0, 0], sizes = [4, 32], strides = [1, 1]} : vector<4x128xf32> to vector<4x32xf32>
    %86 = arith.negf %85 : vector<4x32xf32>
    %87 = math.exp %86 : vector<4x32xf32>
    %cst_25 = arith.constant 1.000000e+00 : f32
    %88 = vector.broadcast %cst_25 : f32 to vector<4x32xf32>
    %89 = arith.addf %88, %87 : vector<4x32xf32>
    %90 = arith.divf %88, %89 : vector<4x32xf32>
    %91 = vector.extract_strided_slice %84 {offsets = [0, 32], sizes = [4, 32], strides = [1, 1]} : vector<4x128xf32> to vector<4x32xf32>
    %92 = arith.negf %91 : vector<4x32xf32>
    %93 = math.exp %92 : vector<4x32xf32>
    %cst_26 = arith.constant 1.000000e+00 : f32
    %94 = vector.broadcast %cst_26 : f32 to vector<4x32xf32>
    %95 = arith.addf %94, %93 : vector<4x32xf32>
    %96 = arith.divf %94, %95 : vector<4x32xf32>
    %97 = vector.extract_strided_slice %84 {offsets = [0, 64], sizes = [4, 32], strides = [1, 1]} : vector<4x128xf32> to vector<4x32xf32>
    %98 = math.tanh %97 : vector<4x32xf32>
    %99 = vector.extract_strided_slice %84 {offsets = [0, 96], sizes = [4, 32], strides = [1, 1]} : vector<4x128xf32> to vector<4x32xf32>
    %100 = arith.negf %99 : vector<4x32xf32>
    %101 = math.exp %100 : vector<4x32xf32>
    %cst_27 = arith.constant 1.000000e+00 : f32
    %102 = vector.broadcast %cst_27 : f32 to vector<4x32xf32>
    %103 = arith.addf %102, %101 : vector<4x32xf32>
    %104 = arith.divf %102, %103 : vector<4x32xf32>
    %105 = arith.mulf %96, %71 : vector<4x32xf32>
    %106 = arith.mulf %90, %98 : vector<4x32xf32>
    %107 = arith.addf %105, %106 : vector<4x32xf32>
    %108 = math.tanh %107 : vector<4x32xf32>
    %109 = arith.mulf %104, %108 : vector<4x32xf32>
    %110 = arith.index_cast %c2_i32 : i32 to index
    %c0_28 = arith.constant 0 : index
    %c0_29 = arith.constant 0 : index
    %111 = vector.load %arg3[%110, %c0_28, %c0_29] : memref<16x4x32xf32, #tpu.memory_space<vmem>>, vector<1x4x32xf32>
    %112 = vector.shape_cast %111 : vector<1x4x32xf32> to vector<4x32xf32>
    %113 = vector.shape_cast %109 : vector<4x32xf32> to vector<1x4x32xf32>
    tpu.vector_store %arg3[%110, %c0_28, %c0_29], %113 {strides = array<i32>} : memref<16x4x32xf32, #tpu.memory_space<vmem>>, vector<1x4x32xf32>,
    %c3_i32 = arith.constant 3 : i32
    %114 = arith.index_cast %c3_i32 : i32 to index
    %c0_30 = arith.constant 0 : index
    %c0_31 = arith.constant 0 : index
    %115 = vector.load %arg1[%114, %c0_30, %c0_31] : memref<16x4x128xbf16, #tpu.memory_space<vmem>>, vector<1x4x128xbf16>
    %116 = vector.shape_cast %115 : vector<1x4x128xbf16> to vector<4x128xbf16>
    %117 = arith.truncf %109 : vector<4x32xf32> to vector<4x32xbf16>
    %cst_32 = arith.constant dense<0.000000e+00> : vector<4x128xf32>
    %118 = tpu.matmul %117, %3, %cst_32 {dimension_numbers = #tpu.dot_dimension_numbers<[1], [0], [0], [1], [0, 0, 1, 1], [], []>} : vector<4x32xbf16>, vector<32x128xbf16>, vector<4x128xf32> -> vector<4x128xf32>
    %119 = arith.extf %116 : vector<4x128xbf16> to vector<4x128xf32>
    %120 = arith.addf %119, %118 : vector<4x128xf32>
    %121 = vector.extract_strided_slice %120 {offsets = [0, 0], sizes = [4, 32], strides = [1, 1]} : vector<4x128xf32> to vector<4x32xf32>
    %122 = arith.negf %121 : vector<4x32xf32>
    %123 = math.exp %122 : vector<4x32xf32>
    %cst_33 = arith.constant 1.000000e+00 : f32
    %124 = vector.broadcast %cst_33 : f32 to vector<4x32xf32>
    %125 = arith.addf %124, %123 : vector<4x32xf32>
    %126 = arith.divf %124, %125 : vector<4x32xf32>
    %127 = vector.extract_strided_slice %120 {offsets = [0, 32], sizes = [4, 32], strides = [1, 1]} : vector<4x128xf32> to vector<4x32xf32>
    %128 = arith.negf %127 : vector<4x32xf32>
    %129 = math.exp %128 : vector<4x32xf32>
    %cst_34 = arith.constant 1.000000e+00 : f32
    %130 = vector.broadcast %cst_34 : f32 to vector<4x32xf32>
    %131 = arith.addf %130, %129 : vector<4x32xf32>
    %132 = arith.divf %130, %131 : vector<4x32xf32>
    %133 = vector.extract_strided_slice %120 {offsets = [0, 64], sizes = [4, 32], strides = [1, 1]} : vector<4x128xf32> to vector<4x32xf32>
    %134 = math.tanh %133 : vector<4x32xf32>
    %135 = vector.extract_strided_slice %120 {offsets = [0, 96], sizes = [4, 32], strides = [1, 1]} : vector<4x128xf32> to vector<4x32xf32>
    %136 = arith.negf %135 : vector<4x32xf32>
    %137 = math.exp %136 : vector<4x32xf32>
    %cst_35 = arith.constant 1.000000e+00 : f32
    %138 = vector.broadcast %cst_35 : f32 to vector<4x32xf32>
    %139 = arith.addf %138, %137 : vector<4x32xf32>
    %140 = arith.divf %138, %139 : vector<4x32xf32>
    %141 = arith.mulf %132, %107 : vector<4x32xf32>
    %142 = arith.mulf %126, %134 : vector<4x32xf32>
    %143 = arith.addf %141, %142 : vector<4x32xf32>
    %144 = math.tanh %143 : vector<4x32xf32>
    %145 = arith.mulf %140, %144 : vector<4x32xf32>
    %146 = arith.index_cast %c3_i32 : i32 to index
    %c0_36 = arith.constant 0 : index
    %c0_37 = arith.constant 0 : index
    %147 = vector.load %arg3[%146, %c0_36, %c0_37] : memref<16x4x32xf32, #tpu.memory_space<vmem>>, vector<1x4x32xf32>
    %148 = vector.shape_cast %147 : vector<1x4x32xf32> to vector<4x32xf32>
    %149 = vector.shape_cast %145 : vector<4x32xf32> to vector<1x4x32xf32>
    tpu.vector_store %arg3[%146, %c0_36, %c0_37], %149 {strides = array<i32>} : memref<16x4x32xf32, #tpu.memory_space<vmem>>, vector<1x4x32xf32>,
    %c4_i32 = arith.constant 4 : i32
    %150 = arith.index_cast %c4_i32 : i32 to index
    %c0_38 = arith.constant 0 : index
    %c0_39 = arith.constant 0 : index
    %151 = vector.load %arg1[%150, %c0_38, %c0_39] : memref<16x4x128xbf16, #tpu.memory_space<vmem>>, vector<1x4x128xbf16>
    %152 = vector.shape_cast %151 : vector<1x4x128xbf16> to vector<4x128xbf16>
    %153 = arith.truncf %145 : vector<4x32xf32> to vector<4x32xbf16>
    %cst_40 = arith.constant dense<0.000000e+00> : vector<4x128xf32>
    %154 = tpu.matmul %153, %3, %cst_40 {dimension_numbers = #tpu.dot_dimension_numbers<[1], [0], [0], [1], [0, 0, 1, 1], [], []>} : vector<4x32xbf16>, vector<32x128xbf16>, vector<4x128xf32> -> vector<4x128xf32>
    %155 = arith.extf %152 : vector<4x128xbf16> to vector<4x128xf32>
    %156 = arith.addf %155, %154 : vector<4x128xf32>
    %157 = vector.extract_strided_slice %156 {offsets = [0, 0], sizes = [4, 32], strides = [1, 1]} : vector<4x128xf32> to vector<4x32xf32>
    %158 = arith.negf %157 : vector<4x32xf32>
    %159 = math.exp %158 : vector<4x32xf32>
    %cst_41 = arith.constant 1.000000e+00 : f32
    %160 = vector.broadcast %cst_41 : f32 to vector<4x32xf32>
    %161 = arith.addf %160, %159 : vector<4x32xf32>
    %162 = arith.divf %160, %161 : vector<4x32xf32>
    %163 = vector.extract_strided_slice %156 {offsets = [0, 32], sizes = [4, 32], strides = [1, 1]} : vector<4x128xf32> to vector<4x32xf32>
    %164 = arith.negf %163 : vector<4x32xf32>
    %165 = math.exp %164 : vector<4x32xf32>
    %cst_42 = arith.constant 1.000000e+00 : f32
    %166 = vector.broadcast %cst_42 : f32 to vector<4x32xf32>
    %167 = arith.addf %166, %165 : vector<4x32xf32>
    %168 = arith.divf %166, %167 : vector<4x32xf32>
    %169 = vector.extract_strided_slice %156 {offsets = [0, 64], sizes = [4, 32], strides = [1, 1]} : vector<4x128xf32> to vector<4x32xf32>
    %170 = math.tanh %169 : vector<4x32xf32>
    %171 = vector.extract_strided_slice %156 {offsets = [0, 96], sizes = [4, 32], strides = [1, 1]} : vector<4x128xf32> to vector<4x32xf32>
    %172 = arith.negf %171 : vector<4x32xf32>
    %173 = math.exp %172 : vector<4x32xf32>
    %cst_43 = arith.constant 1.000000e+00 : f32
    %174 = vector.broadcast %cst_43 : f32 to vector<4x32xf32>
    %175 = arith.addf %174, %173 : vector<4x32xf32>
    %176 = arith.divf %174, %175 : vector<4x32xf32>
    %177 = arith.mulf %168, %143 : vector<4x32xf32>
    %178 = arith.mulf %162, %170 : vector<4x32xf32>
    %179 = arith.addf %177, %178 : vector<4x32xf32>
    %180 = math.tanh %179 : vector<4x32xf32>
    %181 = arith.mulf %176, %180 : vector<4x32xf32>
    %182 = arith.index_cast %c4_i32 : i32 to index
    %c0_44 = arith.constant 0 : index
    %c0_45 = arith.constant 0 : index
    %183 = vector.load %arg3[%182, %c0_44, %c0_45] : memref<16x4x32xf32, #tpu.memory_space<vmem>>, vector<1x4x32xf32>
    %184 = vector.shape_cast %183 : vector<1x4x32xf32> to vector<4x32xf32>
    %185 = vector.shape_cast %181 : vector<4x32xf32> to vector<1x4x32xf32>
    tpu.vector_store %arg3[%182, %c0_44, %c0_45], %185 {strides = array<i32>} : memref<16x4x32xf32, #tpu.memory_space<vmem>>, vector<1x4x32xf32>,
    %c5_i32 = arith.constant 5 : i32
    %186 = arith.index_cast %c5_i32 : i32 to index
    %c0_46 = arith.constant 0 : index
    %c0_47 = arith.constant 0 : index
    %187 = vector.load %arg1[%186, %c0_46, %c0_47] : memref<16x4x128xbf16, #tpu.memory_space<vmem>>, vector<1x4x128xbf16>
    %188 = vector.shape_cast %187 : vector<1x4x128xbf16> to vector<4x128xbf16>
    %189 = arith.truncf %181 : vector<4x32xf32> to vector<4x32xbf16>
    %cst_48 = arith.constant dense<0.000000e+00> : vector<4x128xf32>
    %190 = tpu.matmul %189, %3, %cst_48 {dimension_numbers = #tpu.dot_dimension_numbers<[1], [0], [0], [1], [0, 0, 1, 1], [], []>} : vector<4x32xbf16>, vector<32x128xbf16>, vector<4x128xf32> -> vector<4x128xf32>
    %191 = arith.extf %188 : vector<4x128xbf16> to vector<4x128xf32>
    %192 = arith.addf %191, %190 : vector<4x128xf32>
    %193 = vector.extract_strided_slice %192 {offsets = [0, 0], sizes = [4, 32], strides = [1, 1]} : vector<4x128xf32> to vector<4x32xf32>
    %194 = arith.negf %193 : vector<4x32xf32>
    %195 = math.exp %194 : vector<4x32xf32>
    %cst_49 = arith.constant 1.000000e+00 : f32
    %196 = vector.broadcast %cst_49 : f32 to vector<4x32xf32>
    %197 = arith.addf %196, %195 : vector<4x32xf32>
    %198 = arith.divf %196, %197 : vector<4x32xf32>
    %199 = vector.extract_strided_slice %192 {offsets = [0, 32], sizes = [4, 32], strides = [1, 1]} : vector<4x128xf32> to vector<4x32xf32>
    %200 = arith.negf %199 : vector<4x32xf32>
    %201 = math.exp %200 : vector<4x32xf32>
    %cst_50 = arith.constant 1.000000e+00 : f32
    %202 = vector.broadcast %cst_50 : f32 to vector<4x32xf32>
    %203 = arith.addf %202, %201 : vector<4x32xf32>
    %204 = arith.divf %202, %203 : vector<4x32xf32>
    %205 = vector.extract_strided_slice %192 {offsets = [0, 64], sizes = [4, 32], strides = [1, 1]} : vector<4x128xf32> to vector<4x32xf32>
    %206 = math.tanh %205 : vector<4x32xf32>
    %207 = vector.extract_strided_slice %192 {offsets = [0, 96], sizes = [4, 32], strides = [1, 1]} : vector<4x128xf32> to vector<4x32xf32>
    %208 = arith.negf %207 : vector<4x32xf32>
    %209 = math.exp %208 : vector<4x32xf32>
    %cst_51 = arith.constant 1.000000e+00 : f32
    %210 = vector.broadcast %cst_51 : f32 to vector<4x32xf32>
    %211 = arith.addf %210, %209 : vector<4x32xf32>
    %212 = arith.divf %210, %211 : vector<4x32xf32>
    %213 = arith.mulf %204, %179 : vector<4x32xf32>
    %214 = arith.mulf %198, %206 : vector<4x32xf32>
    %215 = arith.addf %213, %214 : vector<4x32xf32>
    %216 = math.tanh %215 : vector<4x32xf32>
    %217 = arith.mulf %212, %216 : vector<4x32xf32>
    %218 = arith.index_cast %c5_i32 : i32 to index
    %c0_52 = arith.constant 0 : index
    %c0_53 = arith.constant 0 : index
    %219 = vector.load %arg3[%218, %c0_52, %c0_53] : memref<16x4x32xf32, #tpu.memory_space<vmem>>, vector<1x4x32xf32>
    %220 = vector.shape_cast %219 : vector<1x4x32xf32> to vector<4x32xf32>
    %221 = vector.shape_cast %217 : vector<4x32xf32> to vector<1x4x32xf32>
    tpu.vector_store %arg3[%218, %c0_52, %c0_53], %221 {strides = array<i32>} : memref<16x4x32xf32, #tpu.memory_space<vmem>>, vector<1x4x32xf32>,
    %c6_i32 = arith.constant 6 : i32
    %222 = arith.index_cast %c6_i32 : i32 to index
    %c0_54 = arith.constant 0 : index
    %c0_55 = arith.constant 0 : index
    %223 = vector.load %arg1[%222, %c0_54, %c0_55] : memref<16x4x128xbf16, #tpu.memory_space<vmem>>, vector<1x4x128xbf16>
    %224 = vector.shape_cast %223 : vector<1x4x128xbf16> to vector<4x128xbf16>
    %225 = arith.truncf %217 : vector<4x32xf32> to vector<4x32xbf16>
    %cst_56 = arith.constant dense<0.000000e+00> : vector<4x128xf32>
    %226 = tpu.matmul %225, %3, %cst_56 {dimension_numbers = #tpu.dot_dimension_numbers<[1], [0], [0], [1], [0, 0, 1, 1], [], []>} : vector<4x32xbf16>, vector<32x128xbf16>, vector<4x128xf32> -> vector<4x128xf32>
    %227 = arith.extf %224 : vector<4x128xbf16> to vector<4x128xf32>
    %228 = arith.addf %227, %226 : vector<4x128xf32>
    %229 = vector.extract_strided_slice %228 {offsets = [0, 0], sizes = [4, 32], strides = [1, 1]} : vector<4x128xf32> to vector<4x32xf32>
    %230 = arith.negf %229 : vector<4x32xf32>
    %231 = math.exp %230 : vector<4x32xf32>
    %cst_57 = arith.constant 1.000000e+00 : f32
    %232 = vector.broadcast %cst_57 : f32 to vector<4x32xf32>
    %233 = arith.addf %232, %231 : vector<4x32xf32>
    %234 = arith.divf %232, %233 : vector<4x32xf32>
    %235 = vector.extract_strided_slice %228 {offsets = [0, 32], sizes = [4, 32], strides = [1, 1]} : vector<4x128xf32> to vector<4x32xf32>
    %236 = arith.negf %235 : vector<4x32xf32>
    %237 = math.exp %236 : vector<4x32xf32>
    %cst_58 = arith.constant 1.000000e+00 : f32
    %238 = vector.broadcast %cst_58 : f32 to vector<4x32xf32>
    %239 = arith.addf %238, %237 : vector<4x32xf32>
    %240 = arith.divf %238, %239 : vector<4x32xf32>
    %241 = vector.extract_strided_slice %228 {offsets = [0, 64], sizes = [4, 32], strides = [1, 1]} : vector<4x128xf32> to vector<4x32xf32>
    %242 = math.tanh %241 : vector<4x32xf32>
    %243 = vector.extract_strided_slice %228 {offsets = [0, 96], sizes = [4, 32], strides = [1, 1]} : vector<4x128xf32> to vector<4x32xf32>
    %244 = arith.negf %243 : vector<4x32xf32>
    %245 = math.exp %244 : vector<4x32xf32>
    %cst_59 = arith.constant 1.000000e+00 : f32
    %246 = vector.broadcast %cst_59 : f32 to vector<4x32xf32>
    %247 = arith.addf %246, %245 : vector<4x32xf32>
    %248 = arith.divf %246, %247 : vector<4x32xf32>
    %249 = arith.mulf %240, %215 : vector<4x32xf32>
    %250 = arith.mulf %234, %242 : vector<4x32xf32>
    %251 = arith.addf %249, %250 : vector<4x32xf32>
    %252 = math.tanh %251 : vector<4x32xf32>
    %253 = arith.mulf %248, %252 : vector<4x32xf32>
    %254 = arith.index_cast %c6_i32 : i32 to index
    %c0_60 = arith.constant 0 : index
    %c0_61 = arith.constant 0 : index
    %255 = vector.load %arg3[%254, %c0_60, %c0_61] : memref<16x4x32xf32, #tpu.memory_space<vmem>>, vector<1x4x32xf32>
    %256 = vector.shape_cast %255 : vector<1x4x32xf32> to vector<4x32xf32>
    %257 = vector.shape_cast %253 : vector<4x32xf32> to vector<1x4x32xf32>
    tpu.vector_store %arg3[%254, %c0_60, %c0_61], %257 {strides = array<i32>} : memref<16x4x32xf32, #tpu.memory_space<vmem>>, vector<1x4x32xf32>,
    %c7_i32 = arith.constant 7 : i32
    %258 = arith.index_cast %c7_i32 : i32 to index
    %c0_62 = arith.constant 0 : index
    %c0_63 = arith.constant 0 : index
    %259 = vector.load %arg1[%258, %c0_62, %c0_63] : memref<16x4x128xbf16, #tpu.memory_space<vmem>>, vector<1x4x128xbf16>
    %260 = vector.shape_cast %259 : vector<1x4x128xbf16> to vector<4x128xbf16>
    %261 = arith.truncf %253 : vector<4x32xf32> to vector<4x32xbf16>
    %cst_64 = arith.constant dense<0.000000e+00> : vector<4x128xf32>
    %262 = tpu.matmul %261, %3, %cst_64 {dimension_numbers = #tpu.dot_dimension_numbers<[1], [0], [0], [1], [0, 0, 1, 1], [], []>} : vector<4x32xbf16>, vector<32x128xbf16>, vector<4x128xf32> -> vector<4x128xf32>
    %263 = arith.extf %260 : vector<4x128xbf16> to vector<4x128xf32>
    %264 = arith.addf %263, %262 : vector<4x128xf32>
    %265 = vector.extract_strided_slice %264 {offsets = [0, 0], sizes = [4, 32], strides = [1, 1]} : vector<4x128xf32> to vector<4x32xf32>
    %266 = arith.negf %265 : vector<4x32xf32>
    %267 = math.exp %266 : vector<4x32xf32>
    %cst_65 = arith.constant 1.000000e+00 : f32
    %268 = vector.broadcast %cst_65 : f32 to vector<4x32xf32>
    %269 = arith.addf %268, %267 : vector<4x32xf32>
    %270 = arith.divf %268, %269 : vector<4x32xf32>
    %271 = vector.extract_strided_slice %264 {offsets = [0, 32], sizes = [4, 32], strides = [1, 1]} : vector<4x128xf32> to vector<4x32xf32>
    %272 = arith.negf %271 : vector<4x32xf32>
    %273 = math.exp %272 : vector<4x32xf32>
    %cst_66 = arith.constant 1.000000e+00 : f32
    %274 = vector.broadcast %cst_66 : f32 to vector<4x32xf32>
    %275 = arith.addf %274, %273 : vector<4x32xf32>
    %276 = arith.divf %274, %275 : vector<4x32xf32>
    %277 = vector.extract_strided_slice %264 {offsets = [0, 64], sizes = [4, 32], strides = [1, 1]} : vector<4x128xf32> to vector<4x32xf32>
    %278 = math.tanh %277 : vector<4x32xf32>
    %279 = vector.extract_strided_slice %264 {offsets = [0, 96], sizes = [4, 32], strides = [1, 1]} : vector<4x128xf32> to vector<4x32xf32>
    %280 = arith.negf %279 : vector<4x32xf32>
    %281 = math.exp %280 : vector<4x32xf32>
    %cst_67 = arith.constant 1.000000e+00 : f32
    %282 = vector.broadcast %cst_67 : f32 to vector<4x32xf32>
    %283 = arith.addf %282, %281 : vector<4x32xf32>
    %284 = arith.divf %282, %283 : vector<4x32xf32>
    %285 = arith.mulf %276, %251 : vector<4x32xf32>
    %286 = arith.mulf %270, %278 : vector<4x32xf32>
    %287 = arith.addf %285, %286 : vector<4x32xf32>
    %288 = math.tanh %287 : vector<4x32xf32>
    %289 = arith.mulf %284, %288 : vector<4x32xf32>
    %290 = arith.index_cast %c7_i32 : i32 to index
    %c0_68 = arith.constant 0 : index
    %c0_69 = arith.constant 0 : index
    %291 = vector.load %arg3[%290, %c0_68, %c0_69] : memref<16x4x32xf32, #tpu.memory_space<vmem>>, vector<1x4x32xf32>
    %292 = vector.shape_cast %291 : vector<1x4x32xf32> to vector<4x32xf32>
    %293 = vector.shape_cast %289 : vector<4x32xf32> to vector<1x4x32xf32>
    tpu.vector_store %arg3[%290, %c0_68, %c0_69], %293 {strides = array<i32>} : memref<16x4x32xf32, #tpu.memory_space<vmem>>, vector<1x4x32xf32>,
    %c8_i32 = arith.constant 8 : i32
    %294 = arith.index_cast %c8_i32 : i32 to index
    %c0_70 = arith.constant 0 : index
    %c0_71 = arith.constant 0 : index
    %295 = vector.load %arg1[%294, %c0_70, %c0_71] : memref<16x4x128xbf16, #tpu.memory_space<vmem>>, vector<1x4x128xbf16>
    %296 = vector.shape_cast %295 : vector<1x4x128xbf16> to vector<4x128xbf16>
    %297 = arith.truncf %289 : vector<4x32xf32> to vector<4x32xbf16>
    %cst_72 = arith.constant dense<0.000000e+00> : vector<4x128xf32>
    %298 = tpu.matmul %297, %3, %cst_72 {dimension_numbers = #tpu.dot_dimension_numbers<[1], [0], [0], [1], [0, 0, 1, 1], [], []>} : vector<4x32xbf16>, vector<32x128xbf16>, vector<4x128xf32> -> vector<4x128xf32>
    %299 = arith.extf %296 : vector<4x128xbf16> to vector<4x128xf32>
    %300 = arith.addf %299, %298 : vector<4x128xf32>
    %301 = vector.extract_strided_slice %300 {offsets = [0, 0], sizes = [4, 32], strides = [1, 1]} : vector<4x128xf32> to vector<4x32xf32>
    %302 = arith.negf %301 : vector<4x32xf32>
    %303 = math.exp %302 : vector<4x32xf32>
    %cst_73 = arith.constant 1.000000e+00 : f32
    %304 = vector.broadcast %cst_73 : f32 to vector<4x32xf32>
    %305 = arith.addf %304, %303 : vector<4x32xf32>
    %306 = arith.divf %304, %305 : vector<4x32xf32>
    %307 = vector.extract_strided_slice %300 {offsets = [0, 32], sizes = [4, 32], strides = [1, 1]} : vector<4x128xf32> to vector<4x32xf32>
    %308 = arith.negf %307 : vector<4x32xf32>
    %309 = math.exp %308 : vector<4x32xf32>
    %cst_74 = arith.constant 1.000000e+00 : f32
    %310 = vector.broadcast %cst_74 : f32 to vector<4x32xf32>
    %311 = arith.addf %310, %309 : vector<4x32xf32>
    %312 = arith.divf %310, %311 : vector<4x32xf32>
    %313 = vector.extract_strided_slice %300 {offsets = [0, 64], sizes = [4, 32], strides = [1, 1]} : vector<4x128xf32> to vector<4x32xf32>
    %314 = math.tanh %313 : vector<4x32xf32>
    %315 = vector.extract_strided_slice %300 {offsets = [0, 96], sizes = [4, 32], strides = [1, 1]} : vector<4x128xf32> to vector<4x32xf32>
    %316 = arith.negf %315 : vector<4x32xf32>
    %317 = math.exp %316 : vector<4x32xf32>
    %cst_75 = arith.constant 1.000000e+00 : f32
    %318 = vector.broadcast %cst_75 : f32 to vector<4x32xf32>
    %319 = arith.addf %318, %317 : vector<4x32xf32>
    %320 = arith.divf %318, %319 : vector<4x32xf32>
    %321 = arith.mulf %312, %287 : vector<4x32xf32>
    %322 = arith.mulf %306, %314 : vector<4x32xf32>
    %323 = arith.addf %321, %322 : vector<4x32xf32>
    %324 = math.tanh %323 : vector<4x32xf32>
    %325 = arith.mulf %320, %324 : vector<4x32xf32>
    %326 = arith.index_cast %c8_i32 : i32 to index
    %c0_76 = arith.constant 0 : index
    %c0_77 = arith.constant 0 : index
    %327 = vector.load %arg3[%326, %c0_76, %c0_77] : memref<16x4x32xf32, #tpu.memory_space<vmem>>, vector<1x4x32xf32>
    %328 = vector.shape_cast %327 : vector<1x4x32xf32> to vector<4x32xf32>
    %329 = vector.shape_cast %325 : vector<4x32xf32> to vector<1x4x32xf32>
    tpu.vector_store %arg3[%326, %c0_76, %c0_77], %329 {strides = array<i32>} : memref<16x4x32xf32, #tpu.memory_space<vmem>>, vector<1x4x32xf32>,
    %c9_i32 = arith.constant 9 : i32
    %330 = arith.index_cast %c9_i32 : i32 to index
    %c0_78 = arith.constant 0 : index
    %c0_79 = arith.constant 0 : index
    %331 = vector.load %arg1[%330, %c0_78, %c0_79] : memref<16x4x128xbf16, #tpu.memory_space<vmem>>, vector<1x4x128xbf16>
    %332 = vector.shape_cast %331 : vector<1x4x128xbf16> to vector<4x128xbf16>
    %333 = arith.truncf %325 : vector<4x32xf32> to vector<4x32xbf16>
    %cst_80 = arith.constant dense<0.000000e+00> : vector<4x128xf32>
    %334 = tpu.matmul %333, %3, %cst_80 {dimension_numbers = #tpu.dot_dimension_numbers<[1], [0], [0], [1], [0, 0, 1, 1], [], []>} : vector<4x32xbf16>, vector<32x128xbf16>, vector<4x128xf32> -> vector<4x128xf32>
    %335 = arith.extf %332 : vector<4x128xbf16> to vector<4x128xf32>
    %336 = arith.addf %335, %334 : vector<4x128xf32>
    %337 = vector.extract_strided_slice %336 {offsets = [0, 0], sizes = [4, 32], strides = [1, 1]} : vector<4x128xf32> to vector<4x32xf32>
    %338 = arith.negf %337 : vector<4x32xf32>
    %339 = math.exp %338 : vector<4x32xf32>
    %cst_81 = arith.constant 1.000000e+00 : f32
    %340 = vector.broadcast %cst_81 : f32 to vector<4x32xf32>
    %341 = arith.addf %340, %339 : vector<4x32xf32>
    %342 = arith.divf %340, %341 : vector<4x32xf32>
    %343 = vector.extract_strided_slice %336 {offsets = [0, 32], sizes = [4, 32], strides = [1, 1]} : vector<4x128xf32> to vector<4x32xf32>
    %344 = arith.negf %343 : vector<4x32xf32>
    %345 = math.exp %344 : vector<4x32xf32>
    %cst_82 = arith.constant 1.000000e+00 : f32
    %346 = vector.broadcast %cst_82 : f32 to vector<4x32xf32>
    %347 = arith.addf %346, %345 : vector<4x32xf32>
    %348 = arith.divf %346, %347 : vector<4x32xf32>
    %349 = vector.extract_strided_slice %336 {offsets = [0, 64], sizes = [4, 32], strides = [1, 1]} : vector<4x128xf32> to vector<4x32xf32>
    %350 = math.tanh %349 : vector<4x32xf32>
    %351 = vector.extract_strided_slice %336 {offsets = [0, 96], sizes = [4, 32], strides = [1, 1]} : vector<4x128xf32> to vector<4x32xf32>
    %352 = arith.negf %351 : vector<4x32xf32>
    %353 = math.exp %352 : vector<4x32xf32>
    %cst_83 = arith.constant 1.000000e+00 : f32
    %354 = vector.broadcast %cst_83 : f32 to vector<4x32xf32>
    %355 = arith.addf %354, %353 : vector<4x32xf32>
    %356 = arith.divf %354, %355 : vector<4x32xf32>
    %357 = arith.mulf %348, %323 : vector<4x32xf32>
    %358 = arith.mulf %342, %350 : vector<4x32xf32>
    %359 = arith.addf %357, %358 : vector<4x32xf32>
    %360 = math.tanh %359 : vector<4x32xf32>
    %361 = arith.mulf %356, %360 : vector<4x32xf32>
    %362 = arith.index_cast %c9_i32 : i32 to index
    %c0_84 = arith.constant 0 : index
    %c0_85 = arith.constant 0 : index
    %363 = vector.load %arg3[%362, %c0_84, %c0_85] : memref<16x4x32xf32, #tpu.memory_space<vmem>>, vector<1x4x32xf32>
    %364 = vector.shape_cast %363 : vector<1x4x32xf32> to vector<4x32xf32>
    %365 = vector.shape_cast %361 : vector<4x32xf32> to vector<1x4x32xf32>
    tpu.vector_store %arg3[%362, %c0_84, %c0_85], %365 {strides = array<i32>} : memref<16x4x32xf32, #tpu.memory_space<vmem>>, vector<1x4x32xf32>,
    %c10_i32 = arith.constant 10 : i32
    %366 = arith.index_cast %c10_i32 : i32 to index
    %c0_86 = arith.constant 0 : index
    %c0_87 = arith.constant 0 : index
    %367 = vector.load %arg1[%366, %c0_86, %c0_87] : memref<16x4x128xbf16, #tpu.memory_space<vmem>>, vector<1x4x128xbf16>
    %368 = vector.shape_cast %367 : vector<1x4x128xbf16> to vector<4x128xbf16>
    %369 = arith.truncf %361 : vector<4x32xf32> to vector<4x32xbf16>
    %cst_88 = arith.constant dense<0.000000e+00> : vector<4x128xf32>
    %370 = tpu.matmul %369, %3, %cst_88 {dimension_numbers = #tpu.dot_dimension_numbers<[1], [0], [0], [1], [0, 0, 1, 1], [], []>} : vector<4x32xbf16>, vector<32x128xbf16>, vector<4x128xf32> -> vector<4x128xf32>
    %371 = arith.extf %368 : vector<4x128xbf16> to vector<4x128xf32>
    %372 = arith.addf %371, %370 : vector<4x128xf32>
    %373 = vector.extract_strided_slice %372 {offsets = [0, 0], sizes = [4, 32], strides = [1, 1]} : vector<4x128xf32> to vector<4x32xf32>
    %374 = arith.negf %373 : vector<4x32xf32>
    %375 = math.exp %374 : vector<4x32xf32>
    %cst_89 = arith.constant 1.000000e+00 : f32
    %376 = vector.broadcast %cst_89 : f32 to vector<4x32xf32>
    %377 = arith.addf %376, %375 : vector<4x32xf32>
    %378 = arith.divf %376, %377 : vector<4x32xf32>
    %379 = vector.extract_strided_slice %372 {offsets = [0, 32], sizes = [4, 32], strides = [1, 1]} : vector<4x128xf32> to vector<4x32xf32>
    %380 = arith.negf %379 : vector<4x32xf32>
    %381 = math.exp %380 : vector<4x32xf32>
    %cst_90 = arith.constant 1.000000e+00 : f32
    %382 = vector.broadcast %cst_90 : f32 to vector<4x32xf32>
    %383 = arith.addf %382, %381 : vector<4x32xf32>
    %384 = arith.divf %382, %383 : vector<4x32xf32>
    %385 = vector.extract_strided_slice %372 {offsets = [0, 64], sizes = [4, 32], strides = [1, 1]} : vector<4x128xf32> to vector<4x32xf32>
    %386 = math.tanh %385 : vector<4x32xf32>
    %387 = vector.extract_strided_slice %372 {offsets = [0, 96], sizes = [4, 32], strides = [1, 1]} : vector<4x128xf32> to vector<4x32xf32>
    %388 = arith.negf %387 : vector<4x32xf32>
    %389 = math.exp %388 : vector<4x32xf32>
    %cst_91 = arith.constant 1.000000e+00 : f32
    %390 = vector.broadcast %cst_91 : f32 to vector<4x32xf32>
    %391 = arith.addf %390, %389 : vector<4x32xf32>
    %392 = arith.divf %390, %391 : vector<4x32xf32>
    %393 = arith.mulf %384, %359 : vector<4x32xf32>
    %394 = arith.mulf %378, %386 : vector<4x32xf32>
    %395 = arith.addf %393, %394 : vector<4x32xf32>
    %396 = math.tanh %395 : vector<4x32xf32>
    %397 = arith.mulf %392, %396 : vector<4x32xf32>
    %398 = arith.index_cast %c10_i32 : i32 to index
    %c0_92 = arith.constant 0 : index
    %c0_93 = arith.constant 0 : index
    %399 = vector.load %arg3[%398, %c0_92, %c0_93] : memref<16x4x32xf32, #tpu.memory_space<vmem>>, vector<1x4x32xf32>
    %400 = vector.shape_cast %399 : vector<1x4x32xf32> to vector<4x32xf32>
    %401 = vector.shape_cast %397 : vector<4x32xf32> to vector<1x4x32xf32>
    tpu.vector_store %arg3[%398, %c0_92, %c0_93], %401 {strides = array<i32>} : memref<16x4x32xf32, #tpu.memory_space<vmem>>, vector<1x4x32xf32>,
    %c11_i32 = arith.constant 11 : i32
    %402 = arith.index_cast %c11_i32 : i32 to index
    %c0_94 = arith.constant 0 : index
    %c0_95 = arith.constant 0 : index
    %403 = vector.load %arg1[%402, %c0_94, %c0_95] : memref<16x4x128xbf16, #tpu.memory_space<vmem>>, vector<1x4x128xbf16>
    %404 = vector.shape_cast %403 : vector<1x4x128xbf16> to vector<4x128xbf16>
    %405 = arith.truncf %397 : vector<4x32xf32> to vector<4x32xbf16>
    %cst_96 = arith.constant dense<0.000000e+00> : vector<4x128xf32>
    %406 = tpu.matmul %405, %3, %cst_96 {dimension_numbers = #tpu.dot_dimension_numbers<[1], [0], [0], [1], [0, 0, 1, 1], [], []>} : vector<4x32xbf16>, vector<32x128xbf16>, vector<4x128xf32> -> vector<4x128xf32>
    %407 = arith.extf %404 : vector<4x128xbf16> to vector<4x128xf32>
    %408 = arith.addf %407, %406 : vector<4x128xf32>
    %409 = vector.extract_strided_slice %408 {offsets = [0, 0], sizes = [4, 32], strides = [1, 1]} : vector<4x128xf32> to vector<4x32xf32>
    %410 = arith.negf %409 : vector<4x32xf32>
    %411 = math.exp %410 : vector<4x32xf32>
    %cst_97 = arith.constant 1.000000e+00 : f32
    %412 = vector.broadcast %cst_97 : f32 to vector<4x32xf32>
    %413 = arith.addf %412, %411 : vector<4x32xf32>
    %414 = arith.divf %412, %413 : vector<4x32xf32>
    %415 = vector.extract_strided_slice %408 {offsets = [0, 32], sizes = [4, 32], strides = [1, 1]} : vector<4x128xf32> to vector<4x32xf32>
    %416 = arith.negf %415 : vector<4x32xf32>
    %417 = math.exp %416 : vector<4x32xf32>
    %cst_98 = arith.constant 1.000000e+00 : f32
    %418 = vector.broadcast %cst_98 : f32 to vector<4x32xf32>
    %419 = arith.addf %418, %417 : vector<4x32xf32>
    %420 = arith.divf %418, %419 : vector<4x32xf32>
    %421 = vector.extract_strided_slice %408 {offsets = [0, 64], sizes = [4, 32], strides = [1, 1]} : vector<4x128xf32> to vector<4x32xf32>
    %422 = math.tanh %421 : vector<4x32xf32>
    %423 = vector.extract_strided_slice %408 {offsets = [0, 96], sizes = [4, 32], strides = [1, 1]} : vector<4x128xf32> to vector<4x32xf32>
    %424 = arith.negf %423 : vector<4x32xf32>
    %425 = math.exp %424 : vector<4x32xf32>
    %cst_99 = arith.constant 1.000000e+00 : f32
    %426 = vector.broadcast %cst_99 : f32 to vector<4x32xf32>
    %427 = arith.addf %426, %425 : vector<4x32xf32>
    %428 = arith.divf %426, %427 : vector<4x32xf32>
    %429 = arith.mulf %420, %395 : vector<4x32xf32>
    %430 = arith.mulf %414, %422 : vector<4x32xf32>
    %431 = arith.addf %429, %430 : vector<4x32xf32>
    %432 = math.tanh %431 : vector<4x32xf32>
    %433 = arith.mulf %428, %432 : vector<4x32xf32>
    %434 = arith.index_cast %c11_i32 : i32 to index
    %c0_100 = arith.constant 0 : index
    %c0_101 = arith.constant 0 : index
    %435 = vector.load %arg3[%434, %c0_100, %c0_101] : memref<16x4x32xf32, #tpu.memory_space<vmem>>, vector<1x4x32xf32>
    %436 = vector.shape_cast %435 : vector<1x4x32xf32> to vector<4x32xf32>
    %437 = vector.shape_cast %433 : vector<4x32xf32> to vector<1x4x32xf32>
    tpu.vector_store %arg3[%434, %c0_100, %c0_101], %437 {strides = array<i32>} : memref<16x4x32xf32, #tpu.memory_space<vmem>>, vector<1x4x32xf32>,
    %c12_i32 = arith.constant 12 : i32
    %438 = arith.index_cast %c12_i32 : i32 to index
    %c0_102 = arith.constant 0 : index
    %c0_103 = arith.constant 0 : index
    %439 = vector.load %arg1[%438, %c0_102, %c0_103] : memref<16x4x128xbf16, #tpu.memory_space<vmem>>, vector<1x4x128xbf16>
    %440 = vector.shape_cast %439 : vector<1x4x128xbf16> to vector<4x128xbf16>
    %441 = arith.truncf %433 : vector<4x32xf32> to vector<4x32xbf16>
    %cst_104 = arith.constant dense<0.000000e+00> : vector<4x128xf32>
    %442 = tpu.matmul %441, %3, %cst_104 {dimension_numbers = #tpu.dot_dimension_numbers<[1], [0], [0], [1], [0, 0, 1, 1], [], []>} : vector<4x32xbf16>, vector<32x128xbf16>, vector<4x128xf32> -> vector<4x128xf32>
    %443 = arith.extf %440 : vector<4x128xbf16> to vector<4x128xf32>
    %444 = arith.addf %443, %442 : vector<4x128xf32>
    %445 = vector.extract_strided_slice %444 {offsets = [0, 0], sizes = [4, 32], strides = [1, 1]} : vector<4x128xf32> to vector<4x32xf32>
    %446 = arith.negf %445 : vector<4x32xf32>
    %447 = math.exp %446 : vector<4x32xf32>
    %cst_105 = arith.constant 1.000000e+00 : f32
    %448 = vector.broadcast %cst_105 : f32 to vector<4x32xf32>
    %449 = arith.addf %448, %447 : vector<4x32xf32>
    %450 = arith.divf %448, %449 : vector<4x32xf32>
    %451 = vector.extract_strided_slice %444 {offsets = [0, 32], sizes = [4, 32], strides = [1, 1]} : vector<4x128xf32> to vector<4x32xf32>
    %452 = arith.negf %451 : vector<4x32xf32>
    %453 = math.exp %452 : vector<4x32xf32>
    %cst_106 = arith.constant 1.000000e+00 : f32
    %454 = vector.broadcast %cst_106 : f32 to vector<4x32xf32>
    %455 = arith.addf %454, %453 : vector<4x32xf32>
    %456 = arith.divf %454, %455 : vector<4x32xf32>
    %457 = vector.extract_strided_slice %444 {offsets = [0, 64], sizes = [4, 32], strides = [1, 1]} : vector<4x128xf32> to vector<4x32xf32>
    %458 = math.tanh %457 : vector<4x32xf32>
    %459 = vector.extract_strided_slice %444 {offsets = [0, 96], sizes = [4, 32], strides = [1, 1]} : vector<4x128xf32> to vector<4x32xf32>
    %460 = arith.negf %459 : vector<4x32xf32>
    %461 = math.exp %460 : vector<4x32xf32>
    %cst_107 = arith.constant 1.000000e+00 : f32
    %462 = vector.broadcast %cst_107 : f32 to vector<4x32xf32>
    %463 = arith.addf %462, %461 : vector<4x32xf32>
    %464 = arith.divf %462, %463 : vector<4x32xf32>
    %465 = arith.mulf %456, %431 : vector<4x32xf32>
    %466 = arith.mulf %450, %458 : vector<4x32xf32>
    %467 = arith.addf %465, %466 : vector<4x32xf32>
    %468 = math.tanh %467 : vector<4x32xf32>
    %469 = arith.mulf %464, %468 : vector<4x32xf32>
    %470 = arith.index_cast %c12_i32 : i32 to index
    %c0_108 = arith.constant 0 : index
    %c0_109 = arith.constant 0 : index
    %471 = vector.load %arg3[%470, %c0_108, %c0_109] : memref<16x4x32xf32, #tpu.memory_space<vmem>>, vector<1x4x32xf32>
    %472 = vector.shape_cast %471 : vector<1x4x32xf32> to vector<4x32xf32>
    %473 = vector.shape_cast %469 : vector<4x32xf32> to vector<1x4x32xf32>
    tpu.vector_store %arg3[%470, %c0_108, %c0_109], %473 {strides = array<i32>} : memref<16x4x32xf32, #tpu.memory_space<vmem>>, vector<1x4x32xf32>,
    %c13_i32 = arith.constant 13 : i32
    %474 = arith.index_cast %c13_i32 : i32 to index
    %c0_110 = arith.constant 0 : index
    %c0_111 = arith.constant 0 : index
    %475 = vector.load %arg1[%474, %c0_110, %c0_111] : memref<16x4x128xbf16, #tpu.memory_space<vmem>>, vector<1x4x128xbf16>
    %476 = vector.shape_cast %475 : vector<1x4x128xbf16> to vector<4x128xbf16>
    %477 = arith.truncf %469 : vector<4x32xf32> to vector<4x32xbf16>
    %cst_112 = arith.constant dense<0.000000e+00> : vector<4x128xf32>
    %478 = tpu.matmul %477, %3, %cst_112 {dimension_numbers = #tpu.dot_dimension_numbers<[1], [0], [0], [1], [0, 0, 1, 1], [], []>} : vector<4x32xbf16>, vector<32x128xbf16>, vector<4x128xf32> -> vector<4x128xf32>
    %479 = arith.extf %476 : vector<4x128xbf16> to vector<4x128xf32>
    %480 = arith.addf %479, %478 : vector<4x128xf32>
    %481 = vector.extract_strided_slice %480 {offsets = [0, 0], sizes = [4, 32], strides = [1, 1]} : vector<4x128xf32> to vector<4x32xf32>
    %482 = arith.negf %481 : vector<4x32xf32>
    %483 = math.exp %482 : vector<4x32xf32>
    %cst_113 = arith.constant 1.000000e+00 : f32
    %484 = vector.broadcast %cst_113 : f32 to vector<4x32xf32>
    %485 = arith.addf %484, %483 : vector<4x32xf32>
    %486 = arith.divf %484, %485 : vector<4x32xf32>
    %487 = vector.extract_strided_slice %480 {offsets = [0, 32], sizes = [4, 32], strides = [1, 1]} : vector<4x128xf32> to vector<4x32xf32>
    %488 = arith.negf %487 : vector<4x32xf32>
    %489 = math.exp %488 : vector<4x32xf32>
    %cst_114 = arith.constant 1.000000e+00 : f32
    %490 = vector.broadcast %cst_114 : f32 to vector<4x32xf32>
    %491 = arith.addf %490, %489 : vector<4x32xf32>
    %492 = arith.divf %490, %491 : vector<4x32xf32>
    %493 = vector.extract_strided_slice %480 {offsets = [0, 64], sizes = [4, 32], strides = [1, 1]} : vector<4x128xf32> to vector<4x32xf32>
    %494 = math.tanh %493 : vector<4x32xf32>
    %495 = vector.extract_strided_slice %480 {offsets = [0, 96], sizes = [4, 32], strides = [1, 1]} : vector<4x128xf32> to vector<4x32xf32>
    %496 = arith.negf %495 : vector<4x32xf32>
    %497 = math.exp %496 : vector<4x32xf32>
    %cst_115 = arith.constant 1.000000e+00 : f32
    %498 = vector.broadcast %cst_115 : f32 to vector<4x32xf32>
    %499 = arith.addf %498, %497 : vector<4x32xf32>
    %500 = arith.divf %498, %499 : vector<4x32xf32>
    %501 = arith.mulf %492, %467 : vector<4x32xf32>
    %502 = arith.mulf %486, %494 : vector<4x32xf32>
    %503 = arith.addf %501, %502 : vector<4x32xf32>
    %504 = math.tanh %503 : vector<4x32xf32>
    %505 = arith.mulf %500, %504 : vector<4x32xf32>
    %506 = arith.index_cast %c13_i32 : i32 to index
    %c0_116 = arith.constant 0 : index
    %c0_117 = arith.constant 0 : index
    %507 = vector.load %arg3[%506, %c0_116, %c0_117] : memref<16x4x32xf32, #tpu.memory_space<vmem>>, vector<1x4x32xf32>
    %508 = vector.shape_cast %507 : vector<1x4x32xf32> to vector<4x32xf32>
    %509 = vector.shape_cast %505 : vector<4x32xf32> to vector<1x4x32xf32>
    tpu.vector_store %arg3[%506, %c0_116, %c0_117], %509 {strides = array<i32>} : memref<16x4x32xf32, #tpu.memory_space<vmem>>, vector<1x4x32xf32>,
    %c14_i32 = arith.constant 14 : i32
    %510 = arith.index_cast %c14_i32 : i32 to index
    %c0_118 = arith.constant 0 : index
    %c0_119 = arith.constant 0 : index
    %511 = vector.load %arg1[%510, %c0_118, %c0_119] : memref<16x4x128xbf16, #tpu.memory_space<vmem>>, vector<1x4x128xbf16>
    %512 = vector.shape_cast %511 : vector<1x4x128xbf16> to vector<4x128xbf16>
    %513 = arith.truncf %505 : vector<4x32xf32> to vector<4x32xbf16>
    %cst_120 = arith.constant dense<0.000000e+00> : vector<4x128xf32>
    %514 = tpu.matmul %513, %3, %cst_120 {dimension_numbers = #tpu.dot_dimension_numbers<[1], [0], [0], [1], [0, 0, 1, 1], [], []>} : vector<4x32xbf16>, vector<32x128xbf16>, vector<4x128xf32> -> vector<4x128xf32>
    %515 = arith.extf %512 : vector<4x128xbf16> to vector<4x128xf32>
    %516 = arith.addf %515, %514 : vector<4x128xf32>
    %517 = vector.extract_strided_slice %516 {offsets = [0, 0], sizes = [4, 32], strides = [1, 1]} : vector<4x128xf32> to vector<4x32xf32>
    %518 = arith.negf %517 : vector<4x32xf32>
    %519 = math.exp %518 : vector<4x32xf32>
    %cst_121 = arith.constant 1.000000e+00 : f32
    %520 = vector.broadcast %cst_121 : f32 to vector<4x32xf32>
    %521 = arith.addf %520, %519 : vector<4x32xf32>
    %522 = arith.divf %520, %521 : vector<4x32xf32>
    %523 = vector.extract_strided_slice %516 {offsets = [0, 32], sizes = [4, 32], strides = [1, 1]} : vector<4x128xf32> to vector<4x32xf32>
    %524 = arith.negf %523 : vector<4x32xf32>
    %525 = math.exp %524 : vector<4x32xf32>
    %cst_122 = arith.constant 1.000000e+00 : f32
    %526 = vector.broadcast %cst_122 : f32 to vector<4x32xf32>
    %527 = arith.addf %526, %525 : vector<4x32xf32>
    %528 = arith.divf %526, %527 : vector<4x32xf32>
    %529 = vector.extract_strided_slice %516 {offsets = [0, 64], sizes = [4, 32], strides = [1, 1]} : vector<4x128xf32> to vector<4x32xf32>
    %530 = math.tanh %529 : vector<4x32xf32>
    %531 = vector.extract_strided_slice %516 {offsets = [0, 96], sizes = [4, 32], strides = [1, 1]} : vector<4x128xf32> to vector<4x32xf32>
    %532 = arith.negf %531 : vector<4x32xf32>
    %533 = math.exp %532 : vector<4x32xf32>
    %cst_123 = arith.constant 1.000000e+00 : f32
    %534 = vector.broadcast %cst_123 : f32 to vector<4x32xf32>
    %535 = arith.addf %534, %533 : vector<4x32xf32>
    %536 = arith.divf %534, %535 : vector<4x32xf32>
    %537 = arith.mulf %528, %503 : vector<4x32xf32>
    %538 = arith.mulf %522, %530 : vector<4x32xf32>
    %539 = arith.addf %537, %538 : vector<4x32xf32>
    %540 = math.tanh %539 : vector<4x32xf32>
    %541 = arith.mulf %536, %540 : vector<4x32xf32>
    %542 = arith.index_cast %c14_i32 : i32 to index
    %c0_124 = arith.constant 0 : index
    %c0_125 = arith.constant 0 : index
    %543 = vector.load %arg3[%542, %c0_124, %c0_125] : memref<16x4x32xf32, #tpu.memory_space<vmem>>, vector<1x4x32xf32>
    %544 = vector.shape_cast %543 : vector<1x4x32xf32> to vector<4x32xf32>
    %545 = vector.shape_cast %541 : vector<4x32xf32> to vector<1x4x32xf32>
    tpu.vector_store %arg3[%542, %c0_124, %c0_125], %545 {strides = array<i32>} : memref<16x4x32xf32, #tpu.memory_space<vmem>>, vector<1x4x32xf32>,
    %c15_i32 = arith.constant 15 : i32
    %546 = arith.index_cast %c15_i32 : i32 to index
    %c0_126 = arith.constant 0 : index
    %c0_127 = arith.constant 0 : index
    %547 = vector.load %arg1[%546, %c0_126, %c0_127] : memref<16x4x128xbf16, #tpu.memory_space<vmem>>, vector<1x4x128xbf16>
    %548 = vector.shape_cast %547 : vector<1x4x128xbf16> to vector<4x128xbf16>
    %549 = arith.truncf %541 : vector<4x32xf32> to vector<4x32xbf16>
    %cst_128 = arith.constant dense<0.000000e+00> : vector<4x128xf32>
    %550 = tpu.matmul %549, %3, %cst_128 {dimension_numbers = #tpu.dot_dimension_numbers<[1], [0], [0], [1], [0, 0, 1, 1], [], []>} : vector<4x32xbf16>, vector<32x128xbf16>, vector<4x128xf32> -> vector<4x128xf32>
    %551 = arith.extf %548 : vector<4x128xbf16> to vector<4x128xf32>
    %552 = arith.addf %551, %550 : vector<4x128xf32>
    %553 = vector.extract_strided_slice %552 {offsets = [0, 0], sizes = [4, 32], strides = [1, 1]} : vector<4x128xf32> to vector<4x32xf32>
    %554 = arith.negf %553 : vector<4x32xf32>
    %555 = math.exp %554 : vector<4x32xf32>
    %cst_129 = arith.constant 1.000000e+00 : f32
    %556 = vector.broadcast %cst_129 : f32 to vector<4x32xf32>
    %557 = arith.addf %556, %555 : vector<4x32xf32>
    %558 = arith.divf %556, %557 : vector<4x32xf32>
    %559 = vector.extract_strided_slice %552 {offsets = [0, 32], sizes = [4, 32], strides = [1, 1]} : vector<4x128xf32> to vector<4x32xf32>
    %560 = arith.negf %559 : vector<4x32xf32>
    %561 = math.exp %560 : vector<4x32xf32>
    %cst_130 = arith.constant 1.000000e+00 : f32
    %562 = vector.broadcast %cst_130 : f32 to vector<4x32xf32>
    %563 = arith.addf %562, %561 : vector<4x32xf32>
    %564 = arith.divf %562, %563 : vector<4x32xf32>
    %565 = vector.extract_strided_slice %552 {offsets = [0, 64], sizes = [4, 32], strides = [1, 1]} : vector<4x128xf32> to vector<4x32xf32>
    %566 = math.tanh %565 : vector<4x32xf32>
    %567 = vector.extract_strided_slice %552 {offsets = [0, 96], sizes = [4, 32], strides = [1, 1]} : vector<4x128xf32> to vector<4x32xf32>
    %568 = arith.negf %567 : vector<4x32xf32>
    %569 = math.exp %568 : vector<4x32xf32>
    %cst_131 = arith.constant 1.000000e+00 : f32
    %570 = vector.broadcast %cst_131 : f32 to vector<4x32xf32>
    %571 = arith.addf %570, %569 : vector<4x32xf32>
    %572 = arith.divf %570, %571 : vector<4x32xf32>
    %573 = arith.mulf %564, %539 : vector<4x32xf32>
    %574 = arith.mulf %558, %566 : vector<4x32xf32>
    %575 = arith.addf %573, %574 : vector<4x32xf32>
    %576 = math.tanh %575 : vector<4x32xf32>
    %577 = arith.mulf %572, %576 : vector<4x32xf32>
    %578 = arith.index_cast %c15_i32 : i32 to index
    %c0_132 = arith.constant 0 : index
    %c0_133 = arith.constant 0 : index
    %579 = vector.load %arg3[%578, %c0_132, %c0_133] : memref<16x4x32xf32, #tpu.memory_space<vmem>>, vector<1x4x32xf32>
    %580 = vector.shape_cast %579 : vector<1x4x32xf32> to vector<4x32xf32>
    %581 = vector.shape_cast %577 : vector<4x32xf32> to vector<1x4x32xf32>
    tpu.vector_store %arg3[%578, %c0_132, %c0_133], %581 {strides = array<i32>} : memref<16x4x32xf32, #tpu.memory_space<vmem>>, vector<1x4x32xf32>,
    %c16_i32 = arith.constant 16 : i32
    %c0_134 = arith.constant 0 : index
    %c0_135 = arith.constant 0 : index
    %582 = vector.load %arg6[%c0_134, %c0_135] : memref<4x32xf32, #tpu.memory_space<vmem>>, vector<4x32xf32>
    tpu.vector_store %arg6[%c0_134, %c0_135], %577 {strides = array<i32>} : memref<4x32xf32, #tpu.memory_space<vmem>>, vector<4x32xf32>,
    %c0_136 = arith.constant 0 : index
    %c0_137 = arith.constant 0 : index
    %583 = vector.load %arg7[%c0_136, %c0_137] : memref<4x32xf32, #tpu.memory_space<vmem>>, vector<4x32xf32>
    tpu.vector_store %arg7[%c0_136, %c0_137], %575 {strides = array<i32>} : memref<4x32xf32, #tpu.memory_space<vmem>>, vector<4x32xf32>,
    %c0_i32_138 = arith.constant 0 : i32
    %584 = arith.cmpi eq, %arg0, %c0_i32_138 : i32
    %585 = arith.extui %584 : i1 to i32
    %c0_i32_139 = arith.constant 0 : i32
    %586 = arith.cmpi ne, %585, %c0_i32_139 : i32
    scf.if %586 {
      %c0_140 = arith.constant 0 : index
      %c0_141 = arith.constant 0 : index
      %587 = vector.load %arg4[%c0_140, %c0_141] : memref<4x32xf32, #tpu.memory_space<vmem>>, vector<4x32xf32>
      tpu.vector_store %arg4[%c0_140, %c0_141], %577 {strides = array<i32>} : memref<4x32xf32, #tpu.memory_space<vmem>>, vector<4x32xf32>,
      %c0_142 = arith.constant 0 : index
      %c0_143 = arith.constant 0 : index
      %588 = vector.load %arg5[%c0_142, %c0_143] : memref<4x32xf32, #tpu.memory_space<vmem>>, vector<4x32xf32>
      tpu.vector_store %arg5[%c0_142, %c0_143], %575 {strides = array<i32>} : memref<4x32xf32, #tpu.memory_space<vmem>>, vector<4x32xf32>,
    } else {
    }
    return
  }
  func.func @transform_0(%arg0: i32) -> (i32, i32, i32) {
    %c0_i32 = arith.constant 0 : i32
    %c0_i32_0 = arith.constant 0 : i32
    %c0_i32_1 = arith.constant 0 : i32
    return %arg0, %c0_i32, %c0_i32_0 : i32, i32, i32
  }
  func.func @transform_1(%arg0: i32) -> (i32, i32) {
    %c0_i32 = arith.constant 0 : i32
    %c0_i32_0 = arith.constant 0 : i32
    %c0_i32_1 = arith.constant 0 : i32
    return %c0_i32, %c0_i32_0 : i32, i32
  }
  func.func @transform_2(%arg0: i32) -> (i32, i32, i32) {
    %c0_i32 = arith.constant 0 : i32
    %c0_i32_0 = arith.constant 0 : i32
    %c0_i32_1 = arith.constant 0 : i32
    return %arg0, %c0_i32, %c0_i32_0 : i32, i32, i32
  }
  func.func @transform_3(%arg0: i32) -> (i32, i32) {
    %c0_i32 = arith.constant 0 : i32
    %c0_i32_0 = arith.constant 0 : i32
    %c0_i32_1 = arith.constant 0 : i32
    return %c0_i32, %c0_i32_0 : i32, i32
  }
  func.func @transform_4(%arg0: i32) -> (i32, i32) {
    %c0_i32 = arith.constant 0 : i32
    %c0_i32_0 = arith.constant 0 : i32
    %c0_i32_1 = arith.constant 0 : i32
    return %c0_i32, %c0_i32_0 : i32, i32
  }
}

</mosaic_0001>

<bundles_post_ra>
// kernel: encoder_forward.3
= control target key start
LH: loop header
LB: loop body
LE: loop exit
PB: predicated region body
PF: predicated region fallthrough
CT: control target
= control target key end

     0   :  { %v1757_v1 = vmov 0.0   ;;  %vm1758_vm0 = vmmov 0   ;;  %vm20_vm1 = vcmask 257024   ;;  %s2144_s0 = inlined_call_operand.vmem [shape: bf16[16,4,128], index: 0, kind: input, shape index: {}]   ;;  %s2145_s1 = inlined_call_operand.vmem [shape: bf16[32,128], index: 1, kind: input, shape index: {}]   ;;  %s2146_s2 = inlined_call_operand.hbm [shape: f32[16,4,32], index: 2, kind: output, shape index: {0}]   ;;  %s2147_s3 = inlined_call_operand.vmem [shape: f32[4,32], index: 3, kind: output, shape index: {1}]   ;;  %s2148_s4 = inlined_call_operand.vmem [shape: f32[4,32], index: 4, kind: output, shape index: {2}]  }
   0x1   :  { %v1792_v0 = vld [vmem:[%s2145_s1 + $0x8] sm:$0xff]   ;;  %1470 = vmatprep.subr.bf16.mxu0 %v1757_v1  ;;  %1478 = vmatprep.subr.bf16.mxu1 %v1757_v1  ;;  %v1800_v2 = vld [vmem:[%s2145_s1] sm:$0xff]  }
   0x2   :  { %1471 = vmatpush3.bf16.msra.mxu0 %v1792_v0  ;;  %1474 = vmatprep.mubr.msk.bf16.mxu0 %vm1758_vm0, %v1757_v1 }
   0x3   :  { %10 = vsyncpa [#allocation5], 0  ;;  %1472 = vmatprep.subr.bf16.mxu0 %v1757_v1  ;;  %21 = vst.msk [vmem:[#allocation2] sm:$0xf] %vm20_vm1, %v1757_v1  ;;  %1479 = vmatpush3.bf16.msra.mxu1 %v1792_v0  ;;  %vm43_vm2 = vcmask 261120   ;;  %s1759_s20 = smov 64  }
   0x4   :  { %22 = vst.msk [vmem:[#allocation3] sm:$0xf] %vm20_vm1, %v1757_v1  ;;  %1480 = vmatprep.subr.bf16.mxu1 %v1757_v1  ;;  %1482 = vmatprep.mubr.msk.bf16.mxu1 %vm1758_vm0, %v1757_v1  ;;  %v29_v5 = vld [vmem:[%s2144_s0] sm:$0x3]  ;;  %s1760_s21 = smov 32  }
   0x5   :  { %v87_v6 = vunpack.c.l.bf16 %v29_v5  ;;  %v1377_v29 = vld [vmem:[%s2144_s0 + $0x2] sm:$0x3]  ;;  %v1380_v51 = vld [vmem:[%s2144_s0 + $0x4] sm:$0x3] }
   0x6   :  { %1473 = vmatpush3.bf16.msra.mxu0 %v1800_v2  ;;  %v172_v30 = vunpack.c.l.bf16 %v1377_v29  ;;  %v253_v52 = vunpack.c.l.bf16 %v1380_v51 }
   0x7   :  { %1481 = vmatpush3.bf16.msra.mxu1 %v1800_v2  ;;  %1486 = vmatprep.subr.bf16.mxu0 %v1757_v1 }
   0x8   :  { %1494 = vmatprep.subr.bf16.mxu1 %v1757_v1 }
   0xa   :  { %v27_v3 = vld [vmem:[#allocation2] sm:$0xf] }
   0xb   :  { %v30_v4 = vpack.c.bf16 %v27_v3, %v27_v3  ;;  %v28_v13 = vld [vmem:[#allocation3] sm:$0xf] }
   0xd   :  { %1475 = vmatmul.mubr.msk.bf16.vlgmr.msra.gmra.mxu0 %vm43_vm2, %v30_v4 }
   0xe   :  { %1487 = vmatpush3.bf16.msra.mxu0 %v1792_v0  ;;  %1490 = vmatprep.mubr.msk.bf16.mxu0 %vm1758_vm0, %v1757_v1 }
   0xf   :  { %1488 = vmatprep.subr.bf16.mxu0 %v1757_v1 }
  0x12   :  { %1489 = vmatpush3.bf16.msra.mxu0 %v1800_v2 }
  0x13   :  { %1502 = vmatprep.subr.bf16.mxu0 %v1757_v1 }
  0xcd   :  { %v81_v7 = vpop.f32.mrf.mxu0 }
  0xce   :  { %v88_v8 = vadd.f32 %v87_v6, %v81_v7 }
  0xcf   :  { %v1476_v9 = vpop.f32.mrf.mxu0 }
  0xd0   :  { %1607 = vtanh.f32 %v88_v8  ;;  %v1376_v14 = vmul.f32 -1.442695, %v88_v8 }
  0xd1   :  { %v84_v10 = vpop.f32.mrf.mxu0 }
  0xd2   :  { %1609 = vpow2.f32 %v1376_v14 }
  0xd3   :  { %v1477_v11 = vpop.f32.mrf.mxu0 }
  0xdd   :  { %v1608_v12 = vpop.eup %1607 }
  0xde   :  { %102 = vrot.lane.b32.xlu0 %v1608_v12, %s1759_s20  ;;  %v1383_v12 = vld [vmem:[%s2144_s0 + $0x6] sm:$0x3] }
  0xdf   :  { %v1610_v15 = vpop.eup %1609 }
  0xe0   :  { %v92_v16 = vadd.f32 1.0, %v1610_v15 }
  0xe2   :  { %97 = vrot.lane.b32.xlu0 %v28_v13, %s1760_s21  ;;  %1611 = vrcp.f32 %v92_v16  ;;  %v334_v13 = vunpack.c.l.bf16 %v1383_v12 }
  0xef   :  { %v1612_v17 = vpop.eup %1611 }
 0x150   :  { %v103_v18 = vpop.permute.xlu0 %102 }
 0x151   :  { %v105_v19 = vmul.f32 %v1612_v17, %v103_v18 }
 0x153   :  { %107 = vrot.lane.b32.xlu1 %v105_v19, %s1760_s21 }
 0x154   :  { %v98_v20 = vpop.permute.xlu0 %97 }
 0x155   :  { %v100_v21 = vmul.f32 %v1612_v17, %v98_v20 }
 0x1c5   :  { %v108_v22 = vpop.permute.xlu1 %107 }
 0x1c6   :  { %v110_v23 = vadd.f32 %v108_v22, %v100_v21 }
 0x1c8   :  { %1613 = vtanh.f32 %v110_v23 }
 0x1d5   :  { %v1614_v24 = vpop.eup %1613 }
 0x1d6   :  { %113 = vrot.lane.b32.xlu1 %v1614_v24, %s1759_s20 }
 0x248   :  { %v114_v25 = vpop.permute.xlu1 %113 }
 0x249   :  { %v1831_v26 = vmul.f32 %v1612_v17, %v114_v25 }
 0x24b   :  { %v125_v27 = vpack.c.bf16 %v1831_v26, %v1831_v26 }
 0x24d   :  { %127 = vrot.lane.b32.xlu0 %v125_v27, %s1760_s21 }
 0x2bf   :  { %v128_v28 = vpop.permute.xlu0 %127 }
 0x2c0   :  { %1483 = vmatmul.mubr.msk.bf16.vlgmr.msra.gmra.mxu1 %vm43_vm2, %v128_v28 }
 0x2c1   :  { %1495 = vmatpush3.bf16.msra.mxu1 %v1792_v0  ;;  %1498 = vmatprep.mubr.msk.bf16.mxu1 %vm1758_vm0, %v1757_v1 }
 0x2c2   :  { %1496 = vmatprep.subr.bf16.mxu1 %v1757_v1 }
 0x2c5   :  { %1497 = vmatpush3.bf16.msra.mxu1 %v1800_v2 }
 0x2c6   :  { %1510 = vmatprep.subr.bf16.mxu1 %v1757_v1 }
 0x380   :  { %v166_v31 = vpop.f32.mrf.mxu1 }
 0x381   :  { %v173_v32 = vadd.f32 %v172_v30, %v166_v31 }
 0x382   :  { %v1484_v33 = vpop.f32.mrf.mxu1 }
 0x383   :  { %1615 = vtanh.f32 %v173_v32  ;;  %v1379_v37 = vmul.f32 -1.442695, %v173_v32 }
 0x384   :  { %v169_v34 = vpop.f32.mrf.mxu1 }
 0x385   :  { %1617 = vpow2.f32 %v1379_v37 }
 0x386   :  { %v1485_v35 = vpop.f32.mrf.mxu1 }
 0x387   :  { %v1386_v35 = vld [vmem:[%s2144_s0 + $0x8] sm:$0x3] }
 0x390   :  { %v1616_v36 = vpop.eup %1615 }
 0x391   :  { %183 = vrot.lane.b32.xlu1 %v1616_v36, %s1759_s20  ;;  %v415_v36 = vunpack.c.l.bf16 %v1386_v35 }
 0x392   :  { %v1618_v38 = vpop.eup %1617 }
 0x393   :  { %v177_v39 = vadd.f32 1.0, %v1618_v38 }
 0x395   :  { %1619 = vrcp.f32 %v177_v39 }
 0x3a2   :  { %v1620_v40 = vpop.eup %1619 }
 0x3a3   :  { %v181_v43 = vmul.f32 %v1620_v40, %v110_v23 }
 0x403   :  { %v184_v41 = vpop.permute.xlu1 %183 }
 0x404   :  { %v186_v42 = vmul.f32 %v1620_v40, %v184_v41 }
 0x406   :  { %188 = vrot.lane.b32.xlu0 %v186_v42, %s1760_s21 }
 0x478   :  { %v189_v44 = vpop.permute.xlu0 %188 }
 0x479   :  { %v191_v45 = vadd.f32 %v189_v44, %v181_v43 }
 0x47b   :  { %1621 = vtanh.f32 %v191_v45 }
 0x488   :  { %v1622_v46 = vpop.eup %1621 }
 0x489   :  { %194 = vrot.lane.b32.xlu1 %v1622_v46, %s1759_s20 }
 0x4fb   :  { %v195_v47 = vpop.permute.xlu1 %194 }
 0x4fc   :  { %v1849_v48 = vmul.f32 %v1620_v40, %v195_v47 }
 0x4fe   :  { %v206_v49 = vpack.c.bf16 %v1849_v48, %v1849_v48 }
 0x500   :  { %208 = vrot.lane.b32.xlu0 %v206_v49, %s1760_s21 }
 0x572   :  { %v209_v50 = vpop.permute.xlu0 %208 }
 0x573   :  { %1491 = vmatmul.mubr.msk.bf16.vlgmr.msra.gmra.mxu0 %vm43_vm2, %v209_v50 }
 0x574   :  { %1503 = vmatpush3.bf16.msra.mxu0 %v1792_v0  ;;  %1506 = vmatprep.mubr.msk.bf16.mxu0 %vm1758_vm0, %v1757_v1 }
 0x575   :  { %1504 = vmatprep.subr.bf16.mxu0 %v1757_v1 }
 0x578   :  { %1505 = vmatpush3.bf16.msra.mxu0 %v1800_v2 }
 0x579   :  { %1518 = vmatprep.subr.bf16.mxu0 %v1757_v1 }
 0x633   :  { %v247_v53 = vpop.f32.mrf.mxu0 }
 0x634   :  { %v254_v54 = vadd.f32 %v253_v52, %v247_v53 }
 0x635   :  { %v1492_v55 = vpop.f32.mrf.mxu0 }
 0x636   :  { %1623 = vtanh.f32 %v254_v54  ;;  %v1382_v59 = vmul.f32 -1.442695, %v254_v54 }
 0x637   :  { %v250_v56 = vpop.f32.mrf.mxu0 }
 0x638   :  { %1625 = vpow2.f32 %v1382_v59 }
 0x639   :  { %v1493_v57 = vpop.f32.mrf.mxu0 }
 0x643   :  { %v1624_v58 = vpop.eup %1623 }
 0x644   :  { %264 = vrot.lane.b32.xlu1 %v1624_v58, %s1759_s20  ;;  %v1389_v58 = vld [vmem:[%s2144_s0 + $0xa] sm:$0x3] }
 0x645   :  { %v1626_v60 = vpop.eup %1625  ;;  %v496_v59 = vunpack.c.l.bf16 %v1389_v58 }
 0x646   :  { %v258_v61 = vadd.f32 1.0, %v1626_v60 }
 0x648   :  { %1627 = vrcp.f32 %v258_v61 }
 0x655   :  { %v1628_v62 = vpop.eup %1627 }
 0x656   :  { %v262_v4 = vmul.f32 %v1628_v62, %v191_v45 }
 0x6b6   :  { %v265_v63 = vpop.permute.xlu1 %264 }
 0x6b7   :  { %v267_v3 = vmul.f32 %v1628_v62, %v265_v63 }
 0x6b9   :  { %269 = vrot.lane.b32.xlu0 %v267_v3, %s1760_s21 }
 0x72b   :  { %v270_v5 = vpop.permute.xlu0 %269 }
 0x72c   :  { %v272_v6 = vadd.f32 %v270_v5, %v262_v4 }
 0x72e   :  { %1629 = vtanh.f32 %v272_v6 }
 0x73b   :  { %v1630_v7 = vpop.eup %1629 }
 0x73c   :  { %275 = vrot.lane.b32.xlu1 %v1630_v7, %s1759_s20 }
 0x7ae   :  { %v276_v8 = vpop.permute.xlu1 %275 }
 0x7af   :  { %v1867_v9 = vmul.f32 %v1628_v62, %v276_v8 }
 0x7b1   :  { %v287_v10 = vpack.c.bf16 %v1867_v9, %v1867_v9 }
 0x7b3   :  { %289 = vrot.lane.b32.xlu0 %v287_v10, %s1760_s21 }
 0x825   :  { %v290_v11 = vpop.permute.xlu0 %289 }
 0x826   :  { %1499 = vmatmul.mubr.msk.bf16.vlgmr.msra.gmra.mxu1 %vm43_vm2, %v290_v11 }
 0x827   :  { %1511 = vmatpush3.bf16.msra.mxu1 %v1792_v0  ;;  %1514 = vmatprep.mubr.msk.bf16.mxu1 %vm1758_vm0, %v1757_v1 }
 0x828   :  { %1512 = vmatprep.subr.bf16.mxu1 %v1757_v1 }
 0x82b   :  { %1513 = vmatpush3.bf16.msra.mxu1 %v1800_v2 }
 0x82c   :  { %1526 = vmatprep.subr.bf16.mxu1 %v1757_v1 }
 0x8e6   :  { %v328_v14 = vpop.f32.mrf.mxu1 }
 0x8e7   :  { %v335_v15 = vadd.f32 %v334_v13, %v328_v14 }
 0x8e8   :  { %v1500_v16 = vpop.f32.mrf.mxu1 }
 0x8e9   :  { %1631 = vtanh.f32 %v335_v15  ;;  %v1385_v20 = vmul.f32 -1.442695, %v335_v15 }
 0x8ea   :  { %v331_v17 = vpop.f32.mrf.mxu1 }
 0x8eb   :  { %1633 = vpow2.f32 %v1385_v20  ;;  %v1392_v20 = vld [vmem:[%s2144_s0 + $0xc] sm:$0x3] }
 0x8ec   :  { %v1501_v18 = vpop.f32.mrf.mxu1 }
 0x8f6   :  { %v1632_v19 = vpop.eup %1631 }
 0x8f7   :  { %345 = vrot.lane.b32.xlu1 %v1632_v19, %s1759_s20 }
 0x8f8   :  { %v1634_v21 = vpop.eup %1633 }
 0x8f9   :  { %v339_v22 = vadd.f32 1.0, %v1634_v21  ;;  %v577_v21 = vunpack.c.l.bf16 %v1392_v20 }
 0x8fb   :  { %1635 = vrcp.f32 %v339_v22 }
 0x908   :  { %v1636_v23 = vpop.eup %1635 }
 0x909   :  { %v343_v27 = vmul.f32 %v1636_v23, %v272_v6 }
 0x969   :  { %v346_v24 = vpop.permute.xlu1 %345 }
 0x96a   :  { %v348_v25 = vmul.f32 %v1636_v23, %v346_v24 }
 0x96c   :  { %350 = vrot.lane.b32.xlu0 %v348_v25, %s1760_s21 }
 0x9de   :  { %v351_v28 = vpop.permute.xlu0 %350 }
 0x9df   :  { %v353_v29 = vadd.f32 %v351_v28, %v343_v27 }
 0x9e1   :  { %1637 = vtanh.f32 %v353_v29 }
 0x9ee   :  { %v1638_v30 = vpop.eup %1637 }
 0x9ef   :  { %356 = vrot.lane.b32.xlu1 %v1638_v30, %s1759_s20 }
 0xa61   :  { %v357_v31 = vpop.permute.xlu1 %356 }
 0xa62   :  { %v1885_v32 = vmul.f32 %v1636_v23, %v357_v31 }
 0xa64   :  { %v368_v33 = vpack.c.bf16 %v1885_v32, %v1885_v32 }
 0xa66   :  { %370 = vrot.lane.b32.xlu0 %v368_v33, %s1760_s21 }
 0xad8   :  { %v371_v34 = vpop.permute.xlu0 %370 }
 0xad9   :  { %1507 = vmatmul.mubr.msk.bf16.vlgmr.msra.gmra.mxu0 %vm43_vm2, %v371_v34 }
 0xada   :  { %1519 = vmatpush3.bf16.msra.mxu0 %v1792_v0  ;;  %1522 = vmatprep.mubr.msk.bf16.mxu0 %vm1758_vm0, %v1757_v1 }
 0xadb   :  { %1520 = vmatprep.subr.bf16.mxu0 %v1757_v1 }
 0xade   :  { %1521 = vmatpush3.bf16.msra.mxu0 %v1800_v2 }
 0xadf   :  { %1534 = vmatprep.subr.bf16.mxu0 %v1757_v1 }
 0xb99   :  { %v409_v37 = vpop.f32.mrf.mxu0 }
 0xb9a   :  { %v416_v38 = vadd.f32 %v415_v36, %v409_v37 }
 0xb9b   :  { %v1508_v39 = vpop.f32.mrf.mxu0 }
 0xb9c   :  { %1639 = vtanh.f32 %v416_v38  ;;  %v1388_v43 = vmul.f32 -1.442695, %v416_v38 }
 0xb9d   :  { %v412_v40 = vpop.f32.mrf.mxu0 }
 0xb9e   :  { %1641 = vpow2.f32 %v1388_v43 }
 0xb9f   :  { %v1509_v41 = vpop.f32.mrf.mxu0 }
 0xba9   :  { %v1640_v42 = vpop.eup %1639 }
 0xbaa   :  { %426 = vrot.lane.b32.xlu1 %v1640_v42, %s1759_s20 }
 0xbab   :  { %v1642_v44 = vpop.eup %1641 }
 0xbac   :  { %v420_v45 = vadd.f32 1.0, %v1642_v44  ;;  %v1395_v44 = vld [vmem:[%s2144_s0 + $0xe] sm:$0x3] }
 0xbae   :  { %1643 = vrcp.f32 %v420_v45  ;;  %v658_v45 = vunpack.c.l.bf16 %v1395_v44 }
 0xbbb   :  { %v1644_v46 = vpop.eup %1643 }
 0xbbc   :  { %v424_v50 = vmul.f32 %v1644_v46, %v353_v29 }
 0xc1c   :  { %v427_v47 = vpop.permute.xlu1 %426 }
 0xc1d   :  { %v429_v49 = vmul.f32 %v1644_v46, %v427_v47 }
 0xc1f   :  { %431 = vrot.lane.b32.xlu0 %v429_v49, %s1760_s21 }
 0xc91   :  { %v432_v51 = vpop.permute.xlu0 %431 }
 0xc92   :  { %v434_v52 = vadd.f32 %v432_v51, %v424_v50 }
 0xc94   :  { %1645 = vtanh.f32 %v434_v52 }
 0xca1   :  { %v1646_v53 = vpop.eup %1645 }
 0xca2   :  { %437 = vrot.lane.b32.xlu1 %v1646_v53, %s1759_s20 }
 0xd14   :  { %v438_v54 = vpop.permute.xlu1 %437 }
 0xd15   :  { %v1903_v55 = vmul.f32 %v1644_v46, %v438_v54 }
 0xd17   :  { %v449_v56 = vpack.c.bf16 %v1903_v55, %v1903_v55 }
 0xd19   :  { %451 = vrot.lane.b32.xlu0 %v449_v56, %s1760_s21 }
 0xd8b   :  { %v452_v57 = vpop.permute.xlu0 %451 }
 0xd8c   :  { %1515 = vmatmul.mubr.msk.bf16.vlgmr.msra.gmra.mxu1 %vm43_vm2, %v452_v57 }
 0xd8d   :  { %1527 = vmatpush3.bf16.msra.mxu1 %v1792_v0  ;;  %1530 = vmatprep.mubr.msk.bf16.mxu1 %vm1758_vm0, %v1757_v1 }
 0xd8e   :  { %1528 = vmatprep.subr.bf16.mxu1 %v1757_v1 }
 0xd91   :  { %1529 = vmatpush3.bf16.msra.mxu1 %v1800_v2 }
 0xd92   :  { %1542 = vmatprep.subr.bf16.mxu1 %v1757_v1 }
 0xe4c   :  { %v490_v60 = vpop.f32.mrf.mxu1 }
 0xe4d   :  { %v497_v61 = vadd.f32 %v496_v59, %v490_v60 }
 0xe4e   :  { %v1516_v62 = vpop.f32.mrf.mxu1 }
 0xe4f   :  { %1647 = vtanh.f32 %v497_v61  ;;  %v1391_v5 = vmul.f32 -1.442695, %v497_v61 }
 0xe50   :  { %v493_v63 = vpop.f32.mrf.mxu1 }
 0xe51   :  { %1649 = vpow2.f32 %v1391_v5 }
 0xe52   :  { %v1517_v3 = vpop.f32.mrf.mxu1 }
 0xe5c   :  { %v1648_v4 = vpop.eup %1647 }
 0xe5d   :  { %507 = vrot.lane.b32.xlu1 %v1648_v4, %s1759_s20 }
 0xe5e   :  { %v1650_v6 = vpop.eup %1649 }
 0xe5f   :  { %v501_v7 = vadd.f32 1.0, %v1650_v6 }
 0xe61   :  { %1651 = vrcp.f32 %v501_v7  ;;  %v1398_v7 = vld [vmem:[%s2144_s0 + $0x10] sm:$0x3] }
 0xe6e   :  { %v1652_v8 = vpop.eup %1651 }
 0xe6f   :  { %v505_v12 = vmul.f32 %v1652_v8, %v434_v52 }
 0xecf   :  { %v508_v10 = vpop.permute.xlu1 %507 }
 0xed0   :  { %v510_v11 = vmul.f32 %v1652_v8, %v508_v10 }
 0xed2   :  { %512 = vrot.lane.b32.xlu0 %v510_v11, %s1760_s21 }
 0xf44   :  { %v513_v13 = vpop.permute.xlu0 %512 }
 0xf45   :  { %v515_v14 = vadd.f32 %v513_v13, %v505_v12 }
 0xf47   :  { %1653 = vtanh.f32 %v515_v14 }
 0xf54   :  { %v1654_v15 = vpop.eup %1653 }
 0xf55   :  { %518 = vrot.lane.b32.xlu1 %v1654_v15, %s1759_s20 }
 0xfc7   :  { %v519_v16 = vpop.permute.xlu1 %518 }
 0xfc8   :  { %v1921_v17 = vmul.f32 %v1652_v8, %v519_v16  ;;  %v739_v8 = vunpack.c.l.bf16 %v1398_v7 }
 0xfca   :  { %v530_v18 = vpack.c.bf16 %v1921_v17, %v1921_v17 }
 0xfcc   :  { %532 = vrot.lane.b32.xlu0 %v530_v18, %s1760_s21 }
0x103e   :  { %v533_v19 = vpop.permute.xlu0 %532 }
0x103f   :  { %1523 = vmatmul.mubr.msk.bf16.vlgmr.msra.gmra.mxu0 %vm43_vm2, %v533_v19 }
0x1040   :  { %1535 = vmatpush3.bf16.msra.mxu0 %v1792_v0  ;;  %1538 = vmatprep.mubr.msk.bf16.mxu0 %vm1758_vm0, %v1757_v1 }
0x1041   :  { %1536 = vmatprep.subr.bf16.mxu0 %v1757_v1 }
0x1044   :  { %1537 = vmatpush3.bf16.msra.mxu0 %v1800_v2 }
0x1045   :  { %1550 = vmatprep.subr.bf16.mxu0 %v1757_v1 }
0x10ff   :  { %v571_v22 = vpop.f32.mrf.mxu0 }
0x1100   :  { %v578_v23 = vadd.f32 %v577_v21, %v571_v22 }
0x1101   :  { %v1524_v24 = vpop.f32.mrf.mxu0 }
0x1102   :  { %1655 = vtanh.f32 %v578_v23  ;;  %v1394_v29 = vmul.f32 -1.442695, %v578_v23 }
0x1103   :  { %v574_v25 = vpop.f32.mrf.mxu0 }
0x1104   :  { %1657 = vpow2.f32 %v1394_v29 }
0x1105   :  { %v1525_v27 = vpop.f32.mrf.mxu0 }
0x110f   :  { %v1656_v28 = vpop.eup %1655 }
0x1110   :  { %588 = vrot.lane.b32.xlu1 %v1656_v28, %s1759_s20 }
0x1111   :  { %v1658_v30 = vpop.eup %1657 }
0x1112   :  { %v582_v31 = vadd.f32 1.0, %v1658_v30 }
0x1114   :  { %1659 = vrcp.f32 %v582_v31 }
0x1121   :  { %v1660_v33 = vpop.eup %1659 }
0x1122   :  { %v586_v36 = vmul.f32 %v1660_v33, %v515_v14 }
0x1182   :  { %v589_v34 = vpop.permute.xlu1 %588 }
0x1183   :  { %v591_v35 = vmul.f32 %v1660_v33, %v589_v34 }
0x1185   :  { %593 = vrot.lane.b32.xlu0 %v591_v35, %s1760_s21 }
0x11f7   :  { %v594_v37 = vpop.permute.xlu0 %593 }
0x11f8   :  { %v596_v38 = vadd.f32 %v594_v37, %v586_v36 }
0x11fa   :  { %1661 = vtanh.f32 %v596_v38 }
0x1207   :  { %v1662_v39 = vpop.eup %1661 }
0x1208   :  { %599 = vrot.lane.b32.xlu1 %v1662_v39, %s1759_s20 }
0x127a   :  { %v600_v40 = vpop.permute.xlu1 %599 }
0x127b   :  { %v1939_v41 = vmul.f32 %v1660_v33, %v600_v40  ;;  %v1401_v33 = vld [vmem:[%s2144_s0 + $0x12] sm:$0x3] }
0x127c   :  { %v820_v34 = vunpack.c.l.bf16 %v1401_v33 }
0x127d   :  { %v611_v42 = vpack.c.bf16 %v1939_v41, %v1939_v41 }
0x127f   :  { %613 = vrot.lane.b32.xlu0 %v611_v42, %s1760_s21 }
0x12f1   :  { %v614_v43 = vpop.permute.xlu0 %613 }
0x12f2   :  { %1531 = vmatmul.mubr.msk.bf16.vlgmr.msra.gmra.mxu1 %vm43_vm2, %v614_v43 }
0x12f3   :  { %1543 = vmatpush3.bf16.msra.mxu1 %v1792_v0  ;;  %1546 = vmatprep.mubr.msk.bf16.mxu1 %vm1758_vm0, %v1757_v1 }
0x12f4   :  { %1544 = vmatprep.subr.bf16.mxu1 %v1757_v1 }
0x12f7   :  { %1545 = vmatpush3.bf16.msra.mxu1 %v1800_v2 }
0x12f8   :  { %1558 = vmatprep.subr.bf16.mxu1 %v1757_v1 }
0x13b2   :  { %v652_v46 = vpop.f32.mrf.mxu1 }
0x13b3   :  { %v659_v47 = vadd.f32 %v658_v45, %v652_v46 }
0x13b4   :  { %v1532_v49 = vpop.f32.mrf.mxu1 }
0x13b5   :  { %1663 = vtanh.f32 %v659_v47  ;;  %v1397_v53 = vmul.f32 -1.442695, %v659_v47 }
0x13b6   :  { %v655_v50 = vpop.f32.mrf.mxu1 }
0x13b7   :  { %1665 = vpow2.f32 %v1397_v53 }
0x13b8   :  { %v1533_v51 = vpop.f32.mrf.mxu1 }
0x13c2   :  { %v1664_v52 = vpop.eup %1663 }
0x13c3   :  { %669 = vrot.lane.b32.xlu1 %v1664_v52, %s1759_s20 }
0x13c4   :  { %v1666_v54 = vpop.eup %1665 }
0x13c5   :  { %v663_v56 = vadd.f32 1.0, %v1666_v54 }
0x13c7   :  { %1667 = vrcp.f32 %v663_v56 }
0x13d4   :  { %v1668_v57 = vpop.eup %1667 }
0x13d5   :  { %v667_v60 = vmul.f32 %v1668_v57, %v596_v38 }
0x1435   :  { %v670_v58 = vpop.permute.xlu1 %669 }
0x1436   :  { %v672_v59 = vmul.f32 %v1668_v57, %v670_v58  ;;  %v1404_v58 = vld [vmem:[%s2144_s0 + $0x14] sm:$0x3] }
0x1438   :  { %674 = vrot.lane.b32.xlu0 %v672_v59, %s1760_s21  ;;  %v901_v59 = vunpack.c.l.bf16 %v1404_v58 }
0x14aa   :  { %v675_v61 = vpop.permute.xlu0 %674 }
0x14ab   :  { %v677_v62 = vadd.f32 %v675_v61, %v667_v60 }
0x14ad   :  { %1669 = vtanh.f32 %v677_v62 }
0x14ba   :  { %v1670_v63 = vpop.eup %1669 }
0x14bb   :  { %680 = vrot.lane.b32.xlu1 %v1670_v63, %s1759_s20 }
0x152d   :  { %v681_v3 = vpop.permute.xlu1 %680 }
0x152e   :  { %v1957_v4 = vmul.f32 %v1668_v57, %v681_v3 }
0x1530   :  { %v692_v5 = vpack.c.bf16 %v1957_v4, %v1957_v4 }
0x1532   :  { %694 = vrot.lane.b32.xlu0 %v692_v5, %s1760_s21 }
0x15a4   :  { %v695_v6 = vpop.permute.xlu0 %694 }
0x15a5   :  { %1539 = vmatmul.mubr.msk.bf16.vlgmr.msra.gmra.mxu0 %vm43_vm2, %v695_v6 }
0x15a6   :  { %1551 = vmatpush3.bf16.msra.mxu0 %v1792_v0  ;;  %1554 = vmatprep.mubr.msk.bf16.mxu0 %vm1758_vm0, %v1757_v1 }
0x15a7   :  { %1552 = vmatprep.subr.bf16.mxu0 %v1757_v1 }
0x15aa   :  { %1553 = vmatpush3.bf16.msra.mxu0 %v1800_v2 }
0x15ab   :  { %1566 = vmatprep.subr.bf16.mxu0 %v1757_v1 }
0x1665   :  { %v733_v10 = vpop.f32.mrf.mxu0 }
0x1666   :  { %v740_v11 = vadd.f32 %v739_v8, %v733_v10 }
0x1667   :  { %v1540_v12 = vpop.f32.mrf.mxu0 }
0x1668   :  { %1671 = vtanh.f32 %v740_v11  ;;  %v1400_v16 = vmul.f32 -1.442695, %v740_v11 }
0x1669   :  { %v736_v13 = vpop.f32.mrf.mxu0 }
0x166a   :  { %1673 = vpow2.f32 %v1400_v16 }
0x166b   :  { %v1541_v14 = vpop.f32.mrf.mxu0 }
0x1675   :  { %v1672_v15 = vpop.eup %1671 }
0x1676   :  { %750 = vrot.lane.b32.xlu1 %v1672_v15, %s1759_s20 }
0x1677   :  { %v1674_v18 = vpop.eup %1673 }
0x1678   :  { %v744_v19 = vadd.f32 1.0, %v1674_v18 }
0x167a   :  { %1675 = vrcp.f32 %v744_v19 }
0x1687   :  { %v1676_v20 = vpop.eup %1675 }
0x1688   :  { %v748_v23 = vmul.f32 %v1676_v20, %v677_v62 }
0x16e8   :  { %v751_v21 = vpop.permute.xlu1 %750 }
0x16e9   :  { %v753_v22 = vmul.f32 %v1676_v20, %v751_v21 }
0x16eb   :  { %755 = vrot.lane.b32.xlu0 %v753_v22, %s1760_s21  ;;  %v1407_v22 = vld [vmem:[%s2144_s0 + $0x16] sm:$0x3] }
0x175d   :  { %v756_v24 = vpop.permute.xlu0 %755 }
0x175e   :  { %v758_v25 = vadd.f32 %v756_v24, %v748_v23  ;;  %v982_v23 = vunpack.c.l.bf16 %v1407_v22 }
0x1760   :  { %1677 = vtanh.f32 %v758_v25 }
0x176d   :  { %v1678_v27 = vpop.eup %1677 }
0x176e   :  { %761 = vrot.lane.b32.xlu1 %v1678_v27, %s1759_s20 }
0x17e0   :  { %v762_v28 = vpop.permute.xlu1 %761 }
0x17e1   :  { %v1975_v29 = vmul.f32 %v1676_v20, %v762_v28 }
0x17e3   :  { %v773_v30 = vpack.c.bf16 %v1975_v29, %v1975_v29 }
0x17e5   :  { %775 = vrot.lane.b32.xlu0 %v773_v30, %s1760_s21 }
0x1857   :  { %v776_v31 = vpop.permute.xlu0 %775 }
0x1858   :  { %1547 = vmatmul.mubr.msk.bf16.vlgmr.msra.gmra.mxu1 %vm43_vm2, %v776_v31 }
0x1859   :  { %1559 = vmatpush3.bf16.msra.mxu1 %v1792_v0  ;;  %1562 = vmatprep.mubr.msk.bf16.mxu1 %vm1758_vm0, %v1757_v1 }
0x185a   :  { %1560 = vmatprep.subr.bf16.mxu1 %v1757_v1 }
0x185d   :  { %1561 = vmatpush3.bf16.msra.mxu1 %v1800_v2 }
0x185e   :  { %1574 = vmatprep.subr.bf16.mxu1 %v1757_v1 }
0x1918   :  { %v814_v35 = vpop.f32.mrf.mxu1 }
0x1919   :  { %v821_v36 = vadd.f32 %v820_v34, %v814_v35 }
0x191a   :  { %v1548_v37 = vpop.f32.mrf.mxu1 }
0x191b   :  { %1679 = vtanh.f32 %v821_v36  ;;  %v1403_v42 = vmul.f32 -1.442695, %v821_v36 }
0x191c   :  { %v817_v38 = vpop.f32.mrf.mxu1 }
0x191d   :  { %1681 = vpow2.f32 %v1403_v42 }
0x191e   :  { %v1549_v39 = vpop.f32.mrf.mxu1 }
0x1928   :  { %v1680_v40 = vpop.eup %1679 }
0x1929   :  { %831 = vrot.lane.b32.xlu1 %v1680_v40, %s1759_s20 }
0x192a   :  { %v1682_v43 = vpop.eup %1681 }
0x192b   :  { %v825_v44 = vadd.f32 1.0, %v1682_v43 }
0x192d   :  { %1683 = vrcp.f32 %v825_v44 }
0x193a   :  { %v1684_v45 = vpop.eup %1683 }
0x193b   :  { %v829_v49 = vmul.f32 %v1684_v45, %v758_v25 }
0x199b   :  { %v832_v46 = vpop.permute.xlu1 %831 }
0x199c   :  { %v834_v47 = vmul.f32 %v1684_v45, %v832_v46 }
0x199e   :  { %836 = vrot.lane.b32.xlu0 %v834_v47, %s1760_s21 }
0x1a10   :  { %v837_v50 = vpop.permute.xlu0 %836 }
0x1a11   :  { %v839_v51 = vadd.f32 %v837_v50, %v829_v49  ;;  %v1410_v49 = vld [vmem:[%s2144_s0 + $0x18] sm:$0x3] }
0x1a12   :  { %v1063_v50 = vunpack.c.l.bf16 %v1410_v49 }
0x1a13   :  { %1685 = vtanh.f32 %v839_v51 }
0x1a20   :  { %v1686_v52 = vpop.eup %1685 }
0x1a21   :  { %842 = vrot.lane.b32.xlu1 %v1686_v52, %s1759_s20 }
0x1a93   :  { %v843_v53 = vpop.permute.xlu1 %842 }
0x1a94   :  { %v1993_v54 = vmul.f32 %v1684_v45, %v843_v53 }
0x1a96   :  { %v854_v56 = vpack.c.bf16 %v1993_v54, %v1993_v54 }
0x1a98   :  { %856 = vrot.lane.b32.xlu0 %v854_v56, %s1760_s21 }
0x1b0a   :  { %v857_v57 = vpop.permute.xlu0 %856 }
0x1b0b   :  { %1555 = vmatmul.mubr.msk.bf16.vlgmr.msra.gmra.mxu0 %vm43_vm2, %v857_v57 }
0x1b0c   :  { %1567 = vmatpush3.bf16.msra.mxu0 %v1792_v0  ;;  %1570 = vmatprep.mubr.msk.bf16.mxu0 %vm1758_vm0, %v1757_v1 }
0x1b0d   :  { %1568 = vmatprep.subr.bf16.mxu0 %v1757_v1 }
0x1b10   :  { %1569 = vmatpush3.bf16.msra.mxu0 %v1800_v2 }
0x1b11   :  { %1582 = vmatprep.subr.bf16.mxu0 %v1757_v1 }
0x1bcb   :  { %v895_v60 = vpop.f32.mrf.mxu0 }
0x1bcc   :  { %v902_v61 = vadd.f32 %v901_v59, %v895_v60 }
0x1bcd   :  { %v1556_v62 = vpop.f32.mrf.mxu0 }
0x1bce   :  { %1687 = vtanh.f32 %v902_v61  ;;  %v1406_v6 = vmul.f32 -1.442695, %v902_v61 }
0x1bcf   :  { %v898_v63 = vpop.f32.mrf.mxu0 }
0x1bd0   :  { %1689 = vpow2.f32 %v1406_v6 }
0x1bd1   :  { %v1557_v3 = vpop.f32.mrf.mxu0 }
0x1bdb   :  { %v1688_v5 = vpop.eup %1687 }
0x1bdc   :  { %912 = vrot.lane.b32.xlu1 %v1688_v5, %s1759_s20 }
0x1bdd   :  { %v1690_v7 = vpop.eup %1689 }
0x1bde   :  { %v906_v8 = vadd.f32 1.0, %v1690_v7 }
0x1be0   :  { %1691 = vrcp.f32 %v906_v8 }
0x1bed   :  { %v1692_v10 = vpop.eup %1691 }
0x1bee   :  { %v910_v13 = vmul.f32 %v1692_v10, %v839_v51 }
0x1c4e   :  { %v913_v11 = vpop.permute.xlu1 %912 }
0x1c4f   :  { %v915_v12 = vmul.f32 %v1692_v10, %v913_v11 }
0x1c51   :  { %917 = vrot.lane.b32.xlu0 %v915_v12, %s1760_s21 }
0x1cc3   :  { %v918_v14 = vpop.permute.xlu0 %917 }
0x1cc4   :  { %v920_v15 = vadd.f32 %v918_v14, %v910_v13  ;;  %v1413_v14 = vld [vmem:[%s2144_s0 + $0x1a] sm:$0x3] }
0x1cc6   :  { %1693 = vtanh.f32 %v920_v15 }
0x1cd3   :  { %v1694_v16 = vpop.eup %1693 }
0x1cd4   :  { %923 = vrot.lane.b32.xlu1 %v1694_v16, %s1759_s20 }
0x1d46   :  { %v924_v18 = vpop.permute.xlu1 %923 }
0x1d47   :  { %v2011_v19 = vmul.f32 %v1692_v10, %v924_v18 }
0x1d49   :  { %v935_v20 = vpack.c.bf16 %v2011_v19, %v2011_v19 }
0x1d4b   :  { %937 = vrot.lane.b32.xlu0 %v935_v20, %s1760_s21 }
0x1dbd   :  { %v938_v21 = vpop.permute.xlu0 %937 }
0x1dbe   :  { %1563 = vmatmul.mubr.msk.bf16.vlgmr.msra.gmra.mxu1 %vm43_vm2, %v938_v21 }
0x1dbf   :  { %1575 = vmatpush3.bf16.msra.mxu1 %v1792_v0  ;;  %1578 = vmatprep.mubr.msk.bf16.mxu1 %vm1758_vm0, %v1757_v1 }
0x1dc0   :  { %1576 = vmatprep.subr.bf16.mxu1 %v1757_v1 }
0x1dc3   :  { %1577 = vmatpush3.bf16.msra.mxu1 %v1800_v2 }
0x1dc4   :  { %1590 = vmatprep.subr.bf16.mxu1 %v1757_v1 }
0x1e7e   :  { %v976_v24 = vpop.f32.mrf.mxu1 }
0x1e7f   :  { %v983_v25 = vadd.f32 %v982_v23, %v976_v24 }
0x1e80   :  { %v1564_v27 = vpop.f32.mrf.mxu1 }
0x1e81   :  { %1695 = vtanh.f32 %v983_v25  ;;  %v1409_v33 = vmul.f32 -1.442695, %v983_v25 }
0x1e82   :  { %v979_v28 = vpop.f32.mrf.mxu1 }
0x1e83   :  { %1697 = vpow2.f32 %v1409_v33 }
0x1e84   :  { %v1565_v30 = vpop.f32.mrf.mxu1 }
0x1e8e   :  { %v1696_v31 = vpop.eup %1695 }
0x1e8f   :  { %993 = vrot.lane.b32.xlu1 %v1696_v31, %s1759_s20 }
0x1e90   :  { %v1698_v34 = vpop.eup %1697 }
0x1e91   :  { %v987_v35 = vadd.f32 1.0, %v1698_v34 }
0x1e93   :  { %1699 = vrcp.f32 %v987_v35 }
0x1ea0   :  { %v1700_v36 = vpop.eup %1699 }
0x1ea1   :  { %v991_v39 = vmul.f32 %v1700_v36, %v920_v15  ;;  %v1144_v15 = vunpack.c.l.bf16 %v1413_v14 }
0x1f01   :  { %v994_v37 = vpop.permute.xlu1 %993 }
0x1f02   :  { %v996_v38 = vmul.f32 %v1700_v36, %v994_v37 }
0x1f04   :  { %998 = vrot.lane.b32.xlu0 %v996_v38, %s1760_s21  ;;  %v1416_v38 = vld [vmem:[%s2144_s0 + $0x1c] sm:$0x3] }
0x1f76   :  { %v999_v40 = vpop.permute.xlu0 %998 }
0x1f77   :  { %v1001_v42 = vadd.f32 %v999_v40, %v991_v39  ;;  %v1225_v39 = vunpack.c.l.bf16 %v1416_v38 }
0x1f79   :  { %1701 = vtanh.f32 %v1001_v42 }
0x1f86   :  { %v1702_v43 = vpop.eup %1701 }
0x1f87   :  { %1004 = vrot.lane.b32.xlu1 %v1702_v43, %s1759_s20 }
0x1ff9   :  { %v1005_v44 = vpop.permute.xlu1 %1004 }
0x1ffa   :  { %v2029_v45 = vmul.f32 %v1700_v36, %v1005_v44 }
0x1ffc   :  { %v1016_v46 = vpack.c.bf16 %v2029_v45, %v2029_v45 }
0x1ffe   :  { %1018 = vrot.lane.b32.xlu0 %v1016_v46, %s1760_s21 }
0x2070   :  { %v1019_v47 = vpop.permute.xlu0 %1018 }
0x2071   :  { %1571 = vmatmul.mubr.msk.bf16.vlgmr.msra.gmra.mxu0 %vm43_vm2, %v1019_v47 }
0x2072   :  { %1583 = vmatpush3.bf16.msra.mxu0 %v1792_v0  ;;  %1586 = vmatprep.mubr.msk.bf16.mxu0 %vm1758_vm0, %v1757_v1 }
0x2073   :  { %1584 = vmatprep.subr.bf16.mxu0 %v1757_v1 }
0x2076   :  { %1585 = vmatpush3.bf16.msra.mxu0 %v1800_v2 }
0x2131   :  { %v1057_v51 = vpop.f32.mrf.mxu0 }
0x2132   :  { %v1064_v52 = vadd.f32 %v1063_v50, %v1057_v51 }
0x2133   :  { %v1572_v53 = vpop.f32.mrf.mxu0 }
0x2134   :  { %1703 = vtanh.f32 %v1064_v52  ;;  %v1412_v59 = vmul.f32 -1.442695, %v1064_v52 }
0x2135   :  { %v1060_v56 = vpop.f32.mrf.mxu0 }
0x2136   :  { %1705 = vpow2.f32 %v1412_v59 }
0x2137   :  { %v1573_v57 = vpop.f32.mrf.mxu0 }
0x2141   :  { %v1704_v58 = vpop.eup %1703 }
0x2142   :  { %1074 = vrot.lane.b32.xlu1 %v1704_v58, %s1759_s20 }
0x2143   :  { %v1706_v60 = vpop.eup %1705 }
0x2144   :  { %v1068_v61 = vadd.f32 1.0, %v1706_v60 }
0x2146   :  { %1707 = vrcp.f32 %v1068_v61 }
0x2153   :  { %v1708_v62 = vpop.eup %1707 }
0x2154   :  { %v1072_v5 = vmul.f32 %v1708_v62, %v1001_v42 }
0x21b4   :  { %v1075_v63 = vpop.permute.xlu1 %1074 }
0x21b5   :  { %v1077_v3 = vmul.f32 %v1708_v62, %v1075_v63 }
0x21b7   :  { %1079 = vrot.lane.b32.xlu0 %v1077_v3, %s1760_s21 }
0x2229   :  { %v1080_v6 = vpop.permute.xlu0 %1079 }
0x222a   :  { %v1082_v7 = vadd.f32 %v1080_v6, %v1072_v5  ;;  %v1419_v5 = vld [vmem:[%s2144_s0 + $0x1e] sm:$0x3]  ;;  %s1761_s0 = smov 96  }
0x222b   :  { %v1306_v6 = vunpack.c.l.bf16 %v1419_v5 }
0x222c   :  { %1709 = vtanh.f32 %v1082_v7 }
0x2239   :  { %v1710_v8 = vpop.eup %1709 }
0x223a   :  { %1085 = vrot.lane.b32.xlu1 %v1710_v8, %s1759_s20 }
0x22ac   :  { %v1086_v10 = vpop.permute.xlu1 %1085 }
0x22ad   :  { %v2046_v11 = vmul.f32 %v1708_v62, %v1086_v10 }
0x22af   :  { %v1097_v12 = vpack.c.bf16 %v2046_v11, %v2046_v11 }
0x22b1   :  { %1099 = vrot.lane.b32.xlu0 %v1097_v12, %s1760_s21 }
0x2323   :  { %v1100_v13 = vpop.permute.xlu0 %1099 }
0x2324   :  { %1579 = vmatmul.mubr.msk.bf16.vlgmr.msra.gmra.mxu1 %vm43_vm2, %v1100_v13 }
0x2325   :  { %1591 = vmatpush3.bf16.msra.mxu1 %v1792_v0  ;;  %1594 = vmatprep.mubr.msk.bf16.mxu1 %vm1758_vm0, %v1757_v1 }
0x2326   :  { %1592 = vmatprep.subr.bf16.mxu1 %v1757_v1 }
0x2329   :  { %1593 = vmatpush3.bf16.msra.mxu1 %v1800_v2 }
0x23e4   :  { %v1138_v16 = vpop.f32.mrf.mxu1 }
0x23e5   :  { %v1145_v18 = vadd.f32 %v1144_v15, %v1138_v16 }
0x23e6   :  { %v1580_v20 = vpop.f32.mrf.mxu1 }
0x23e7   :  { %1711 = vtanh.f32 %v1145_v18  ;;  %v1415_v0 = vmul.f32 -1.442695, %v1145_v18 }
0x23e8   :  { %v1141_v21 = vpop.f32.mrf.mxu1 }
0x23e9   :  { %1713 = vpow2.f32 %v1415_v0 }
0x23ea   :  { %v1581_v22 = vpop.f32.mrf.mxu1 }
0x23f4   :  { %v1712_v23 = vpop.eup %1711 }
0x23f5   :  { %1155 = vrot.lane.b32.xlu1 %v1712_v23, %s1759_s20 }
0x23f6   :  { %v1714_v24 = vpop.eup %1713 }
0x23f7   :  { %v1149_v1 = vadd.f32 1.0, %v1714_v24 }
0x23f9   :  { %1715 = vrcp.f32 %v1149_v1 }
0x2406   :  { %v1716_v2 = vpop.eup %1715 }
0x2407   :  { %v1153_v28 = vmul.f32 %v1716_v2, %v1082_v7 }
0x2467   :  { %v1156_v25 = vpop.permute.xlu1 %1155 }
0x2468   :  { %v1158_v27 = vmul.f32 %v1716_v2, %v1156_v25 }
0x246a   :  { %1160 = vrot.lane.b32.xlu0 %v1158_v27, %s1760_s21 }
0x24dc   :  { %v1161_v30 = vpop.permute.xlu0 %1160 }
0x24dd   :  { %v1163_v31 = vadd.f32 %v1161_v30, %v1153_v28 }
0x24df   :  { %1717 = vtanh.f32 %v1163_v31 }
0x24ec   :  { %v1718_v33 = vpop.eup %1717 }
0x24ed   :  { %1166 = vrot.lane.b32.xlu1 %v1718_v33, %s1759_s20 }
0x255f   :  { %v1167_v34 = vpop.permute.xlu1 %1166 }
0x2560   :  { %v2063_v35 = vmul.f32 %v1716_v2, %v1167_v34 }
0x2562   :  { %v1178_v36 = vpack.c.bf16 %v2063_v35, %v2063_v35 }
0x2564   :  { %1180 = vrot.lane.b32.xlu0 %v1178_v36, %s1760_s21 }
0x25d6   :  { %v1181_v37 = vpop.permute.xlu0 %1180 }
0x25d7   :  { %1587 = vmatmul.mubr.msk.bf16.vlgmr.msra.gmra.mxu0 %vm43_vm2, %v1181_v37 }
0x2697   :  { %v1219_v40 = vpop.f32.mrf.mxu0 }
0x2698   :  { %v1226_v42 = vadd.f32 %v1225_v39, %v1219_v40 }
0x2699   :  { %v1588_v43 = vpop.f32.mrf.mxu0 }
0x269a   :  { %1719 = vtanh.f32 %v1226_v42  ;;  %v1418_v49 = vmul.f32 -1.442695, %v1226_v42 }
0x269b   :  { %v1222_v44 = vpop.f32.mrf.mxu0 }
0x269c   :  { %1721 = vpow2.f32 %v1418_v49 }
0x269d   :  { %v1589_v46 = vpop.f32.mrf.mxu0 }
0x26a7   :  { %v1720_v47 = vpop.eup %1719 }
0x26a8   :  { %1236 = vrot.lane.b32.xlu1 %v1720_v47, %s1759_s20 }
0x26a9   :  { %v1722_v50 = vpop.eup %1721 }
0x26aa   :  { %v1230_v51 = vadd.f32 1.0, %v1722_v50 }
0x26ac   :  { %1723 = vrcp.f32 %v1230_v51 }
0x26b9   :  { %v1724_v52 = vpop.eup %1723 }
0x26ba   :  { %v1234_v57 = vmul.f32 %v1724_v52, %v1163_v31 }
0x271a   :  { %v1237_v53 = vpop.permute.xlu1 %1236 }
0x271b   :  { %v1239_v56 = vmul.f32 %v1724_v52, %v1237_v53 }
0x271d   :  { %1241 = vrot.lane.b32.xlu0 %v1239_v56, %s1760_s21 }
0x278f   :  { %v1242_v58 = vpop.permute.xlu0 %1241 }
0x2790   :  { %v1244_v59 = vadd.f32 %v1242_v58, %v1234_v57 }
0x2792   :  { %1725 = vtanh.f32 %v1244_v59 }
0x279f   :  { %v1726_v60 = vpop.eup %1725 }
0x27a0   :  { %1247 = vrot.lane.b32.xlu1 %v1726_v60, %s1759_s20 }
0x2812   :  { %v1248_v61 = vpop.permute.xlu1 %1247 }
0x2813   :  { %v1250_v62 = vmul.f32 %v1724_v52, %v1248_v61 }
0x2815   :  { %v1259_v63 = vpack.c.bf16 %v1250_v62, %v1250_v62 }
0x2817   :  { %1261 = vrot.lane.b32.xlu0 %v1259_v63, %s1760_s21 }
0x2889   :  { %v1262_v3 = vpop.permute.xlu0 %1261 }
0x288a   :  { %1595 = vmatmul.mubr.msk.bf16.vlgmr.msra.gmra.mxu1 %vm43_vm2, %v1262_v3 }
0x294a   :  { %v1300_v7 = vpop.f32.mrf.mxu1 }
0x294b   :  { %v1307_v8 = vadd.f32 %v1306_v6, %v1300_v7 }
0x294c   :  { %v1596_v10 = vpop.f32.mrf.mxu1 }
0x294d   :  { %1727 = vtanh.f32 %v1307_v8  ;;  %v1421_v15 = vmul.f32 -1.442695, %v1307_v8 }
0x294e   :  { %v1303_v12 = vpop.f32.mrf.mxu1 }
0x294f   :  { %1729 = vpow2.f32 %v1421_v15 }
0x2950   :  { %v1597_v13 = vpop.f32.mrf.mxu1 }
0x295a   :  { %v1728_v14 = vpop.eup %1727 }
0x295b   :  { %1317 = vrot.lane.b32.xlu1 %v1728_v14, %s1759_s20 }
0x295c   :  { %v1730_v16 = vpop.eup %1729 }
0x295d   :  { %v1311_v18 = vadd.f32 1.0, %v1730_v16 }
0x295f   :  { %1731 = vrcp.f32 %v1311_v18 }
0x296c   :  { %v1732_v20 = vpop.eup %1731 }
0x29cd   :  { %v1318_v21 = vpop.permute.xlu1 %1317 }
0x29ce   :  { %v1320_v22 = vmul.f32 %v1732_v20, %v1318_v21 }
0x29d0   :  { %1322 = vrot.lane.b32.xlu0 %v1320_v22, %s1760_s21 }
0x29d4   :  { %118 = vrot.lane.b32.xlu0 %v1831_v26, %s1760_s21  ;;  %v1315_v26 = vmul.f32 %v1732_v20, %v1244_v59 }
0x29d8   :  { %280 = vrot.lane.b32.xlu0 %v1867_v9, %s1760_s21 }
0x29dc   :  { %442 = vrot.lane.b32.xlu0 %v1903_v55, %s1760_s21 }
0x29e0   :  { %604 = vrot.lane.b32.xlu0 %v1939_v41, %s1760_s21 }
0x29e4   :  { %766 = vrot.lane.b32.xlu0 %v1975_v29, %s1760_s21 }
0x29e8   :  { %928 = vrot.lane.b32.xlu0 %v2011_v19, %s1760_s21 }
0x29ec   :  { %1090 = vrot.lane.b32.xlu0 %v2046_v11, %s1760_s21 }
0x29f0   :  { %1252 = vrot.lane.b32.xlu0 %v1250_v62, %s1760_s21 }
0x2a42   :  { %v1323_v23 = vpop.permute.xlu0 %1322 }
0x2a43   :  { %v1325_v9 = vadd.f32 %v1323_v23, %v1315_v26 }
0x2a45   :  { %1733 = vtanh.f32 %v1325_v9  ;;  %1340 = vrot.lane.b32.xlu0 %v1325_v9, %s1761_s0 }
0x2a46   :  { %v119_v55 = vpop.permute.xlu0 %118 }
0x2a47   :  { %122 = vst.msk [vmem:[#allocation4] sm:$0xf] %vm20_vm1, %v119_v55 }
0x2a4a   :  { %v281_v41 = vpop.permute.xlu0 %280 }
0x2a4b   :  { %284 = vst.msk [vmem:[#allocation4 + $0x8] sm:$0xf] %vm20_vm1, %v281_v41 }
0x2a4e   :  { %v443_v29 = vpop.permute.xlu0 %442 }
0x2a4f   :  { %446 = vst.msk [vmem:[#allocation4 + $0x10] sm:$0xf] %vm20_vm1, %v443_v29 }
0x2a52   :  { %v1734_v19 = vpop.eup %1733  ;;  %v605_v0 = vpop.permute.xlu0 %604 }
0x2a53   :  { %608 = vst.msk [vmem:[#allocation4 + $0x18] sm:$0xf] %vm20_vm1, %v605_v0  ;;  %1328 = vrot.lane.b32.xlu1 %v1734_v19, %s1759_s20 }
0x2a56   :  { %v767_v11 = vpop.permute.xlu0 %766 }
0x2a57   :  { %770 = vst.msk [vmem:[#allocation4 + $0x20] sm:$0xf] %vm20_vm1, %v767_v11  ;;  %199 = vrot.lane.b32.xlu1 %v1849_v48, %s1760_s21 }
0x2a5a   :  { %v929_v24 = vpop.permute.xlu0 %928 }
0x2a5b   :  { %932 = vst.msk [vmem:[#allocation4 + $0x28] sm:$0xf] %vm20_vm1, %v929_v24  ;;  %361 = vrot.lane.b32.xlu1 %v1885_v32, %s1760_s21 }
0x2a5e   :  { %v1091_v1 = vpop.permute.xlu0 %1090 }
0x2a5f   :  { %1094 = vst.msk [vmem:[#allocation4 + $0x30] sm:$0xf] %vm20_vm1, %v1091_v1  ;;  %523 = vrot.lane.b32.xlu1 %v1921_v17, %s1760_s21 }
0x2a62   :  { %v1253_v2 = vpop.permute.xlu0 %1252 }
0x2a63   :  { %1256 = vst.msk [vmem:[#allocation4 + $0x38] sm:$0xf] %vm20_vm1, %v1253_v2  ;;  %685 = vrot.lane.b32.xlu1 %v1957_v4, %s1760_s21 }
0x2a67   :  { %847 = vrot.lane.b32.xlu1 %v1993_v54, %s1760_s21 }
0x2a6b   :  { %1009 = vrot.lane.b32.xlu1 %v2029_v45, %s1760_s21 }
0x2a6f   :  { %1171 = vrot.lane.b32.xlu1 %v2063_v35, %s1760_s21 }
0x2ab7   :  { %v1341_v48 = vpop.permute.xlu0 %1340 }
0x2ab8   :  { %1343 = vst.msk [vmem:[#allocation3] sm:$0xf] %vm20_vm1, %v1341_v48  ;;  %1348 = vst.msk [vmem:[%s2148_s4] sm:$0xf] %vm20_vm1, %v1341_v48  ;;  %s1762_s4 = smov [#allocation4]  }
0x2ac5   :  { %v1329_v32 = vpop.permute.xlu1 %1328 }
0x2ac6   :  { %v1331_v17 = vmul.f32 %v1732_v20, %v1329_v32 }
0x2ac8   :  { %1333 = vrot.lane.b32.xlu1 %v1331_v17, %s1760_s21  ;;  %s1354_s21 = sshll.u32 %s1762_s4, 4  ;;  %s1355_s21 = int_to_ptr.vmem [resolvable:$true] %s1354_s21 }
0x2ac9   :  { %v200_v4 = vpop.permute.xlu1 %199  ;;  %s1735_s5 = scalar_lea.vmem %s1355_s21, 1024  ;;  %p1740_p1 = scmp.lt.s32.totalorder %s1355_s21, %s1355_s21 }
0x2aca   :  { %203 = vst.msk [vmem:[#allocation4 + $0x4] sm:$0xf] %vm20_vm1, %v200_v4  ;;  %p1736_p0 = scmp.ne.s32.totalorder %s1355_s21, %s1735_s5  ;;  %p1741_p2 = scmp.lt.s32.totalorder %s1735_s5, %s1735_s5 }
0x2acc   :  { %p1742_p3 = por %p1741_p2, %p1740_p1 }
0x2acd   :  { %v362_v54 = vpop.permute.xlu1 %361 }
0x2ace   :  { %365 = vst.msk [vmem:[#allocation4 + $0xc] sm:$0xf] %vm20_vm1, %v362_v54  ;;  %p1743_p4 = pnand %p1742_p3, %p1736_p0 }
0x2ad1   :  { %v524_v45 = vpop.permute.xlu1 %523 }
0x2ad2   :  { %527 = vst.msk [vmem:[#allocation4 + $0x14] sm:$0xf] %vm20_vm1, %v524_v45 }
0x2ad5   :  { %v686_v25 = vpop.permute.xlu1 %685 }
0x2ad6   :  { %689 = vst.msk [vmem:[#allocation4 + $0x1c] sm:$0xf] %vm20_vm1, %v686_v25 }
0x2ad9   :  { %v848_v27 = vpop.permute.xlu1 %847 }
0x2ada   :  { %851 = vst.msk [vmem:[#allocation4 + $0x24] sm:$0xf] %vm20_vm1, %v848_v27 }
0x2add   :  { %v1010_v28 = vpop.permute.xlu1 %1009 }
0x2ade   :  { %1013 = vst.msk [vmem:[#allocation4 + $0x2c] sm:$0xf] %vm20_vm1, %v1010_v28 }
0x2ae1   :  { %v1172_v30 = vpop.permute.xlu1 %1171 }
0x2ae2   :  { %1175 = vst.msk [vmem:[#allocation4 + $0x34] sm:$0xf] %vm20_vm1, %v1172_v30 }
0x2b3a   :  { %v1334_v31 = vpop.permute.xlu1 %1333 }
0x2b3b   :  { %1337 = vst.msk [vmem:[#allocation4 + $0x3c] sm:$0xf] %vm20_vm1, %v1334_v31  ;;  %1338 = vst.msk [vmem:[#allocation2] sm:$0xf] %vm20_vm1, %v1334_v31 }
0x2b3c   :  { %1347 = vst.msk [vmem:[%s2147_s3] sm:$0xf] %vm20_vm1, %v1334_v31 }
0x2b3d   :  { %1746 = shalt.err (!%p1743_p4)
}
0x2b3e   :  { %s1763_s6 = smov 4  }
0x2b3f   :  { %1360 = dma.vmem_to_hbm [thread:$0]  %s1355_s21, 1024, %s2146_s2, [#allocation5], %s1759_s20, %s1759_s20, %s1763_s6  }
0x2b40   :  { %1755 = dma.done.wait [#allocation5], 1024  }
0x2b41   :  { %1756 = vsyncadd [#allocation5], 4294966272 }
0x2b42   :  { %1372 = vsyncpa [#allocation5], 1 }

// kernel: encoder_forward.2
= control target key start
LH: loop header
LB: loop body
LE: loop exit
PB: predicated region body
PF: predicated region fallthrough
CT: control target
= control target key end

     0   :  { %vm19_vm0 = vcmask 257024   ;;  %v1735_v0 = vmov 0.0   ;;  %vm1736_vm1 = vmmov 0   ;;  %vm42_vm2 = vcmask 261120   ;;  %s1737_s20 = smov 64   ;;  %s1738_s21 = smov 32   ;;  %s2163_s1 = inlined_call_operand.vmem [shape: bf16[32,128], index: 1, kind: input, shape index: {}]   ;;  %s2164_s0 = inlined_call_operand.vmem [shape: bf16[16,4,128], index: 0, kind: input, shape index: {}]   ;;  %s2165_s2 = inlined_call_operand.vmem [shape: f32[16,4,32], index: 2, kind: output, shape index: {0}]   ;;  %s2166_s4 = inlined_call_operand.vmem [shape: f32[4,32], index: 4, kind: output, shape index: {2}]   ;;  %s2167_s3 = inlined_call_operand.vmem [shape: f32[4,32], index: 3, kind: output, shape index: {1}]  }
   0x1   :  { %1472 = vmatprep.subr.bf16.mxu0 %v1735_v0  ;;  %v1769_v1 = vld [vmem:[%s2163_s1 + $0x8] sm:$0xff]   ;;  %1476 = vmatprep.mubr.msk.bf16.mxu0 %vm1736_vm1, %v1735_v0  ;;  %20 = vst.msk [vmem:[#allocation2] sm:$0xf] %vm19_vm0, %v1735_v0  ;;  %21 = vst.msk [vmem:[#allocation3] sm:$0xf] %vm19_vm0, %v1735_v0  ;;  %v1784_v2 = vld [vmem:[%s2163_s1] sm:$0xff]  }
   0x2   :  { %1480 = vmatprep.subr.bf16.mxu1 %v1735_v0  ;;  %1484 = vmatprep.mubr.msk.bf16.mxu1 %vm1736_vm1, %v1735_v0  ;;  %v28_v5 = vld [vmem:[%s2164_s0] sm:$0x3]  ;;  %v1364_v29 = vld [vmem:[%s2164_s0 + $0x2] sm:$0x3]  ;;  %v1368_v51 = vld [vmem:[%s2164_s0 + $0x4] sm:$0x3] }
   0x3   :  { %1473 = vmatpush3.bf16.msra.mxu0 %v1769_v1  ;;  %1481 = vmatpush3.bf16.msra.mxu1 %v1769_v1  ;;  %v86_v6 = vunpack.c.l.bf16 %v28_v5  ;;  %v171_v30 = vunpack.c.l.bf16 %v1364_v29  ;;  %v252_v52 = vunpack.c.l.bf16 %v1368_v51 }
   0x4   :  { %1474 = vmatprep.subr.bf16.mxu0 %v1735_v0  ;;  %1482 = vmatprep.subr.bf16.mxu1 %v1735_v0 }
   0x7   :  { %1475 = vmatpush3.bf16.msra.mxu0 %v1784_v2  ;;  %1483 = vmatpush3.bf16.msra.mxu1 %v1784_v2 }
   0x8   :  { %v26_v3 = vld [vmem:[#allocation2] sm:$0xf]  ;;  %1488 = vmatprep.subr.bf16.mxu0 %v1735_v0  ;;  %1496 = vmatprep.subr.bf16.mxu1 %v1735_v0  ;;  %v27_v13 = vld [vmem:[#allocation3] sm:$0xf] }
   0x9   :  { %v29_v4 = vpack.c.bf16 %v26_v3, %v26_v3 }
   0xb   :  { %1477 = vmatmul.mubr.msk.bf16.vlgmr.msra.gmra.mxu0 %vm42_vm2, %v29_v4 }
   0xc   :  { %1489 = vmatpush3.bf16.msra.mxu0 %v1769_v1  ;;  %1492 = vmatprep.mubr.msk.bf16.mxu0 %vm1736_vm1, %v1735_v0 }
   0xd   :  { %1490 = vmatprep.subr.bf16.mxu0 %v1735_v0 }
  0x10   :  { %1491 = vmatpush3.bf16.msra.mxu0 %v1784_v2 }
  0x11   :  { %1504 = vmatprep.subr.bf16.mxu0 %v1735_v0 }
  0xcb   :  { %v80_v7 = vpop.f32.mrf.mxu0 }
  0xcc   :  { %v87_v8 = vadd.f32 %v86_v6, %v80_v7 }
  0xcd   :  { %v1478_v9 = vpop.f32.mrf.mxu0 }
  0xce   :  { %1607 = vtanh.f32 %v87_v8  ;;  %v1363_v14 = vmul.f32 -1.442695, %v87_v8 }
  0xcf   :  { %v83_v10 = vpop.f32.mrf.mxu0 }
  0xd0   :  { %1609 = vpow2.f32 %v1363_v14 }
  0xd1   :  { %v1479_v11 = vpop.f32.mrf.mxu0 }
  0xdb   :  { %v1608_v12 = vpop.eup %1607 }
  0xdc   :  { %101 = vrot.lane.b32.xlu0 %v1608_v12, %s1737_s20  ;;  %v1372_v12 = vld [vmem:[%s2164_s0 + $0x6] sm:$0x3] }
  0xdd   :  { %v1610_v15 = vpop.eup %1609 }
  0xde   :  { %v91_v16 = vadd.f32 1.0, %v1610_v15 }
  0xe0   :  { %96 = vrot.lane.b32.xlu0 %v27_v13, %s1738_s21  ;;  %1611 = vrcp.f32 %v91_v16  ;;  %v333_v13 = vunpack.c.l.bf16 %v1372_v12 }
  0xed   :  { %v1612_v17 = vpop.eup %1611 }
 0x14e   :  { %v102_v18 = vpop.permute.xlu0 %101 }
 0x14f   :  { %v104_v19 = vmul.f32 %v1612_v17, %v102_v18 }
 0x151   :  { %106 = vrot.lane.b32.xlu1 %v104_v19, %s1738_s21 }
 0x152   :  { %v97_v20 = vpop.permute.xlu0 %96 }
 0x153   :  { %v99_v21 = vmul.f32 %v1612_v17, %v97_v20 }
 0x1c3   :  { %v107_v22 = vpop.permute.xlu1 %106 }
 0x1c4   :  { %v109_v23 = vadd.f32 %v107_v22, %v99_v21 }
 0x1c6   :  { %1613 = vtanh.f32 %v109_v23 }
 0x1d3   :  { %v1614_v24 = vpop.eup %1613 }
 0x1d4   :  { %112 = vrot.lane.b32.xlu1 %v1614_v24, %s1737_s20 }
 0x246   :  { %v113_v25 = vpop.permute.xlu1 %112 }
 0x247   :  { %v1807_v26 = vmul.f32 %v1612_v17, %v113_v25 }
 0x249   :  { %v124_v27 = vpack.c.bf16 %v1807_v26, %v1807_v26 }
 0x24b   :  { %126 = vrot.lane.b32.xlu0 %v124_v27, %s1738_s21 }
 0x2bd   :  { %v127_v28 = vpop.permute.xlu0 %126 }
 0x2be   :  { %1485 = vmatmul.mubr.msk.bf16.vlgmr.msra.gmra.mxu1 %vm42_vm2, %v127_v28 }
 0x2bf   :  { %1497 = vmatpush3.bf16.msra.mxu1 %v1769_v1  ;;  %1500 = vmatprep.mubr.msk.bf16.mxu1 %vm1736_vm1, %v1735_v0 }
 0x2c0   :  { %1498 = vmatprep.subr.bf16.mxu1 %v1735_v0 }
 0x2c3   :  { %1499 = vmatpush3.bf16.msra.mxu1 %v1784_v2 }
 0x2c4   :  { %1512 = vmatprep.subr.bf16.mxu1 %v1735_v0 }
 0x37e   :  { %v165_v31 = vpop.f32.mrf.mxu1 }
 0x37f   :  { %v172_v32 = vadd.f32 %v171_v30, %v165_v31 }
 0x380   :  { %v1486_v33 = vpop.f32.mrf.mxu1 }
 0x381   :  { %1615 = vtanh.f32 %v172_v32  ;;  %v1366_v37 = vmul.f32 -1.442695, %v172_v32 }
 0x382   :  { %v168_v34 = vpop.f32.mrf.mxu1 }
 0x383   :  { %1617 = vpow2.f32 %v1366_v37 }
 0x384   :  { %v1487_v35 = vpop.f32.mrf.mxu1 }
 0x385   :  { %v1376_v35 = vld [vmem:[%s2164_s0 + $0x8] sm:$0x3] }
 0x38e   :  { %v1616_v36 = vpop.eup %1615 }
 0x38f   :  { %182 = vrot.lane.b32.xlu1 %v1616_v36, %s1737_s20  ;;  %v414_v36 = vunpack.c.l.bf16 %v1376_v35 }
 0x390   :  { %v1618_v38 = vpop.eup %1617 }
 0x391   :  { %v176_v39 = vadd.f32 1.0, %v1618_v38 }
 0x393   :  { %1619 = vrcp.f32 %v176_v39 }
 0x3a0   :  { %v1620_v40 = vpop.eup %1619 }
 0x3a1   :  { %v180_v43 = vmul.f32 %v1620_v40, %v109_v23 }
 0x401   :  { %v183_v41 = vpop.permute.xlu1 %182 }
 0x402   :  { %v185_v42 = vmul.f32 %v1620_v40, %v183_v41 }
 0x404   :  { %187 = vrot.lane.b32.xlu0 %v185_v42, %s1738_s21 }
 0x476   :  { %v188_v44 = vpop.permute.xlu0 %187 }
 0x477   :  { %v190_v45 = vadd.f32 %v188_v44, %v180_v43 }
 0x479   :  { %1621 = vtanh.f32 %v190_v45 }
 0x486   :  { %v1622_v46 = vpop.eup %1621 }
 0x487   :  { %193 = vrot.lane.b32.xlu1 %v1622_v46, %s1737_s20 }
 0x4f9   :  { %v194_v47 = vpop.permute.xlu1 %193 }
 0x4fa   :  { %v1825_v48 = vmul.f32 %v1620_v40, %v194_v47 }
 0x4fc   :  { %v205_v49 = vpack.c.bf16 %v1825_v48, %v1825_v48 }
 0x4fe   :  { %207 = vrot.lane.b32.xlu0 %v205_v49, %s1738_s21 }
 0x570   :  { %v208_v50 = vpop.permute.xlu0 %207 }
 0x571   :  { %1493 = vmatmul.mubr.msk.bf16.vlgmr.msra.gmra.mxu0 %vm42_vm2, %v208_v50 }
 0x572   :  { %1505 = vmatpush3.bf16.msra.mxu0 %v1769_v1  ;;  %1508 = vmatprep.mubr.msk.bf16.mxu0 %vm1736_vm1, %v1735_v0 }
 0x573   :  { %1506 = vmatprep.subr.bf16.mxu0 %v1735_v0 }
 0x576   :  { %1507 = vmatpush3.bf16.msra.mxu0 %v1784_v2 }
 0x577   :  { %1520 = vmatprep.subr.bf16.mxu0 %v1735_v0 }
 0x631   :  { %v246_v53 = vpop.f32.mrf.mxu0 }
 0x632   :  { %v253_v54 = vadd.f32 %v252_v52, %v246_v53 }
 0x633   :  { %v1494_v55 = vpop.f32.mrf.mxu0 }
 0x634   :  { %1623 = vtanh.f32 %v253_v54  ;;  %v1370_v59 = vmul.f32 -1.442695, %v253_v54 }
 0x635   :  { %v249_v56 = vpop.f32.mrf.mxu0 }
 0x636   :  { %1625 = vpow2.f32 %v1370_v59 }
 0x637   :  { %v1495_v57 = vpop.f32.mrf.mxu0 }
 0x641   :  { %v1624_v58 = vpop.eup %1623 }
 0x642   :  { %263 = vrot.lane.b32.xlu1 %v1624_v58, %s1737_s20  ;;  %v1380_v58 = vld [vmem:[%s2164_s0 + $0xa] sm:$0x3] }
 0x643   :  { %v1626_v60 = vpop.eup %1625  ;;  %v495_v59 = vunpack.c.l.bf16 %v1380_v58 }
 0x644   :  { %v257_v61 = vadd.f32 1.0, %v1626_v60 }
 0x646   :  { %1627 = vrcp.f32 %v257_v61 }
 0x653   :  { %v1628_v62 = vpop.eup %1627 }
 0x654   :  { %v261_v4 = vmul.f32 %v1628_v62, %v190_v45 }
 0x6b4   :  { %v264_v63 = vpop.permute.xlu1 %263 }
 0x6b5   :  { %v266_v3 = vmul.f32 %v1628_v62, %v264_v63 }
 0x6b7   :  { %268 = vrot.lane.b32.xlu0 %v266_v3, %s1738_s21 }
 0x729   :  { %v269_v5 = vpop.permute.xlu0 %268 }
 0x72a   :  { %v271_v6 = vadd.f32 %v269_v5, %v261_v4 }
 0x72c   :  { %1629 = vtanh.f32 %v271_v6 }
 0x739   :  { %v1630_v7 = vpop.eup %1629 }
 0x73a   :  { %274 = vrot.lane.b32.xlu1 %v1630_v7, %s1737_s20 }
 0x7ac   :  { %v275_v8 = vpop.permute.xlu1 %274 }
 0x7ad   :  { %v1843_v9 = vmul.f32 %v1628_v62, %v275_v8 }
 0x7af   :  { %v286_v10 = vpack.c.bf16 %v1843_v9, %v1843_v9 }
 0x7b1   :  { %288 = vrot.lane.b32.xlu0 %v286_v10, %s1738_s21 }
 0x823   :  { %v289_v11 = vpop.permute.xlu0 %288 }
 0x824   :  { %1501 = vmatmul.mubr.msk.bf16.vlgmr.msra.gmra.mxu1 %vm42_vm2, %v289_v11 }
 0x825   :  { %1513 = vmatpush3.bf16.msra.mxu1 %v1769_v1  ;;  %1516 = vmatprep.mubr.msk.bf16.mxu1 %vm1736_vm1, %v1735_v0 }
 0x826   :  { %1514 = vmatprep.subr.bf16.mxu1 %v1735_v0 }
 0x829   :  { %1515 = vmatpush3.bf16.msra.mxu1 %v1784_v2 }
 0x82a   :  { %1528 = vmatprep.subr.bf16.mxu1 %v1735_v0 }
 0x8e4   :  { %v327_v14 = vpop.f32.mrf.mxu1 }
 0x8e5   :  { %v334_v15 = vadd.f32 %v333_v13, %v327_v14 }
 0x8e6   :  { %v1502_v16 = vpop.f32.mrf.mxu1 }
 0x8e7   :  { %1631 = vtanh.f32 %v334_v15  ;;  %v1374_v20 = vmul.f32 -1.442695, %v334_v15 }
 0x8e8   :  { %v330_v17 = vpop.f32.mrf.mxu1 }
 0x8e9   :  { %1633 = vpow2.f32 %v1374_v20  ;;  %v1384_v20 = vld [vmem:[%s2164_s0 + $0xc] sm:$0x3] }
 0x8ea   :  { %v1503_v18 = vpop.f32.mrf.mxu1 }
 0x8f4   :  { %v1632_v19 = vpop.eup %1631 }
 0x8f5   :  { %344 = vrot.lane.b32.xlu1 %v1632_v19, %s1737_s20 }
 0x8f6   :  { %v1634_v21 = vpop.eup %1633 }
 0x8f7   :  { %v338_v22 = vadd.f32 1.0, %v1634_v21  ;;  %v576_v21 = vunpack.c.l.bf16 %v1384_v20 }
 0x8f9   :  { %1635 = vrcp.f32 %v338_v22 }
 0x906   :  { %v1636_v23 = vpop.eup %1635 }
 0x907   :  { %v342_v27 = vmul.f32 %v1636_v23, %v271_v6 }
 0x967   :  { %v345_v24 = vpop.permute.xlu1 %344 }
 0x968   :  { %v347_v25 = vmul.f32 %v1636_v23, %v345_v24 }
 0x96a   :  { %349 = vrot.lane.b32.xlu0 %v347_v25, %s1738_s21 }
 0x9dc   :  { %v350_v28 = vpop.permute.xlu0 %349 }
 0x9dd   :  { %v352_v29 = vadd.f32 %v350_v28, %v342_v27 }
 0x9df   :  { %1637 = vtanh.f32 %v352_v29 }
 0x9ec   :  { %v1638_v30 = vpop.eup %1637 }
 0x9ed   :  { %355 = vrot.lane.b32.xlu1 %v1638_v30, %s1737_s20 }
 0xa5f   :  { %v356_v31 = vpop.permute.xlu1 %355 }
 0xa60   :  { %v1861_v32 = vmul.f32 %v1636_v23, %v356_v31 }
 0xa62   :  { %v367_v33 = vpack.c.bf16 %v1861_v32, %v1861_v32 }
 0xa64   :  { %369 = vrot.lane.b32.xlu0 %v367_v33, %s1738_s21 }
 0xad6   :  { %v370_v34 = vpop.permute.xlu0 %369 }
 0xad7   :  { %1509 = vmatmul.mubr.msk.bf16.vlgmr.msra.gmra.mxu0 %vm42_vm2, %v370_v34 }
 0xad8   :  { %1521 = vmatpush3.bf16.msra.mxu0 %v1769_v1  ;;  %1524 = vmatprep.mubr.msk.bf16.mxu0 %vm1736_vm1, %v1735_v0 }
 0xad9   :  { %1522 = vmatprep.subr.bf16.mxu0 %v1735_v0 }
 0xadc   :  { %1523 = vmatpush3.bf16.msra.mxu0 %v1784_v2 }
 0xadd   :  { %1536 = vmatprep.subr.bf16.mxu0 %v1735_v0 }
 0xb97   :  { %v408_v37 = vpop.f32.mrf.mxu0 }
 0xb98   :  { %v415_v38 = vadd.f32 %v414_v36, %v408_v37 }
 0xb99   :  { %v1510_v39 = vpop.f32.mrf.mxu0 }
 0xb9a   :  { %1639 = vtanh.f32 %v415_v38  ;;  %v1378_v43 = vmul.f32 -1.442695, %v415_v38 }
 0xb9b   :  { %v411_v40 = vpop.f32.mrf.mxu0 }
 0xb9c   :  { %1641 = vpow2.f32 %v1378_v43 }
 0xb9d   :  { %v1511_v41 = vpop.f32.mrf.mxu0 }
 0xba7   :  { %v1640_v42 = vpop.eup %1639 }
 0xba8   :  { %425 = vrot.lane.b32.xlu1 %v1640_v42, %s1737_s20 }
 0xba9   :  { %v1642_v44 = vpop.eup %1641 }
 0xbaa   :  { %v419_v45 = vadd.f32 1.0, %v1642_v44  ;;  %v1388_v44 = vld [vmem:[%s2164_s0 + $0xe] sm:$0x3] }
 0xbac   :  { %1643 = vrcp.f32 %v419_v45  ;;  %v657_v45 = vunpack.c.l.bf16 %v1388_v44 }
 0xbb9   :  { %v1644_v46 = vpop.eup %1643 }
 0xbba   :  { %v423_v50 = vmul.f32 %v1644_v46, %v352_v29 }
 0xc1a   :  { %v426_v47 = vpop.permute.xlu1 %425 }
 0xc1b   :  { %v428_v49 = vmul.f32 %v1644_v46, %v426_v47 }
 0xc1d   :  { %430 = vrot.lane.b32.xlu0 %v428_v49, %s1738_s21 }
 0xc8f   :  { %v431_v51 = vpop.permute.xlu0 %430 }
 0xc90   :  { %v433_v52 = vadd.f32 %v431_v51, %v423_v50 }
 0xc92   :  { %1645 = vtanh.f32 %v433_v52 }
 0xc9f   :  { %v1646_v53 = vpop.eup %1645 }
 0xca0   :  { %436 = vrot.lane.b32.xlu1 %v1646_v53, %s1737_s20 }
 0xd12   :  { %v437_v54 = vpop.permute.xlu1 %436 }
 0xd13   :  { %v1879_v55 = vmul.f32 %v1644_v46, %v437_v54 }
 0xd15   :  { %v448_v56 = vpack.c.bf16 %v1879_v55, %v1879_v55 }
 0xd17   :  { %450 = vrot.lane.b32.xlu0 %v448_v56, %s1738_s21 }
 0xd89   :  { %v451_v57 = vpop.permute.xlu0 %450 }
 0xd8a   :  { %1517 = vmatmul.mubr.msk.bf16.vlgmr.msra.gmra.mxu1 %vm42_vm2, %v451_v57 }
 0xd8b   :  { %1529 = vmatpush3.bf16.msra.mxu1 %v1769_v1  ;;  %1532 = vmatprep.mubr.msk.bf16.mxu1 %vm1736_vm1, %v1735_v0 }
 0xd8c   :  { %1530 = vmatprep.subr.bf16.mxu1 %v1735_v0 }
 0xd8f   :  { %1531 = vmatpush3.bf16.msra.mxu1 %v1784_v2 }
 0xd90   :  { %1544 = vmatprep.subr.bf16.mxu1 %v1735_v0 }
 0xe4a   :  { %v489_v60 = vpop.f32.mrf.mxu1 }
 0xe4b   :  { %v496_v61 = vadd.f32 %v495_v59, %v489_v60 }
 0xe4c   :  { %v1518_v62 = vpop.f32.mrf.mxu1 }
 0xe4d   :  { %1647 = vtanh.f32 %v496_v61  ;;  %v1382_v5 = vmul.f32 -1.442695, %v496_v61 }
 0xe4e   :  { %v492_v63 = vpop.f32.mrf.mxu1 }
 0xe4f   :  { %1649 = vpow2.f32 %v1382_v5 }
 0xe50   :  { %v1519_v3 = vpop.f32.mrf.mxu1 }
 0xe5a   :  { %v1648_v4 = vpop.eup %1647 }
 0xe5b   :  { %506 = vrot.lane.b32.xlu1 %v1648_v4, %s1737_s20 }
 0xe5c   :  { %v1650_v6 = vpop.eup %1649 }
 0xe5d   :  { %v500_v7 = vadd.f32 1.0, %v1650_v6 }
 0xe5f   :  { %1651 = vrcp.f32 %v500_v7  ;;  %v1392_v7 = vld [vmem:[%s2164_s0 + $0x10] sm:$0x3] }
 0xe6c   :  { %v1652_v8 = vpop.eup %1651 }
 0xe6d   :  { %v504_v12 = vmul.f32 %v1652_v8, %v433_v52 }
 0xecd   :  { %v507_v10 = vpop.permute.xlu1 %506 }
 0xece   :  { %v509_v11 = vmul.f32 %v1652_v8, %v507_v10 }
 0xed0   :  { %511 = vrot.lane.b32.xlu0 %v509_v11, %s1738_s21 }
 0xf42   :  { %v512_v13 = vpop.permute.xlu0 %511 }
 0xf43   :  { %v514_v14 = vadd.f32 %v512_v13, %v504_v12 }
 0xf45   :  { %1653 = vtanh.f32 %v514_v14 }
 0xf52   :  { %v1654_v15 = vpop.eup %1653 }
 0xf53   :  { %517 = vrot.lane.b32.xlu1 %v1654_v15, %s1737_s20 }
 0xfc5   :  { %v518_v16 = vpop.permute.xlu1 %517 }
 0xfc6   :  { %v1897_v17 = vmul.f32 %v1652_v8, %v518_v16  ;;  %v738_v8 = vunpack.c.l.bf16 %v1392_v7 }
 0xfc8   :  { %v529_v18 = vpack.c.bf16 %v1897_v17, %v1897_v17 }
 0xfca   :  { %531 = vrot.lane.b32.xlu0 %v529_v18, %s1738_s21 }
0x103c   :  { %v532_v19 = vpop.permute.xlu0 %531 }
0x103d   :  { %1525 = vmatmul.mubr.msk.bf16.vlgmr.msra.gmra.mxu0 %vm42_vm2, %v532_v19 }
0x103e   :  { %1537 = vmatpush3.bf16.msra.mxu0 %v1769_v1  ;;  %1540 = vmatprep.mubr.msk.bf16.mxu0 %vm1736_vm1, %v1735_v0 }
0x103f   :  { %1538 = vmatprep.subr.bf16.mxu0 %v1735_v0 }
0x1042   :  { %1539 = vmatpush3.bf16.msra.mxu0 %v1784_v2 }
0x1043   :  { %1552 = vmatprep.subr.bf16.mxu0 %v1735_v0 }
0x10fd   :  { %v570_v22 = vpop.f32.mrf.mxu0 }
0x10fe   :  { %v577_v23 = vadd.f32 %v576_v21, %v570_v22 }
0x10ff   :  { %v1526_v24 = vpop.f32.mrf.mxu0 }
0x1100   :  { %1655 = vtanh.f32 %v577_v23  ;;  %v1386_v29 = vmul.f32 -1.442695, %v577_v23 }
0x1101   :  { %v573_v25 = vpop.f32.mrf.mxu0 }
0x1102   :  { %1657 = vpow2.f32 %v1386_v29 }
0x1103   :  { %v1527_v27 = vpop.f32.mrf.mxu0 }
0x110d   :  { %v1656_v28 = vpop.eup %1655 }
0x110e   :  { %587 = vrot.lane.b32.xlu1 %v1656_v28, %s1737_s20 }
0x110f   :  { %v1658_v30 = vpop.eup %1657 }
0x1110   :  { %v581_v31 = vadd.f32 1.0, %v1658_v30 }
0x1112   :  { %1659 = vrcp.f32 %v581_v31 }
0x111f   :  { %v1660_v33 = vpop.eup %1659 }
0x1120   :  { %v585_v36 = vmul.f32 %v1660_v33, %v514_v14 }
0x1180   :  { %v588_v34 = vpop.permute.xlu1 %587 }
0x1181   :  { %v590_v35 = vmul.f32 %v1660_v33, %v588_v34 }
0x1183   :  { %592 = vrot.lane.b32.xlu0 %v590_v35, %s1738_s21 }
0x11f5   :  { %v593_v37 = vpop.permute.xlu0 %592 }
0x11f6   :  { %v595_v38 = vadd.f32 %v593_v37, %v585_v36 }
0x11f8   :  { %1661 = vtanh.f32 %v595_v38 }
0x1205   :  { %v1662_v39 = vpop.eup %1661 }
0x1206   :  { %598 = vrot.lane.b32.xlu1 %v1662_v39, %s1737_s20 }
0x1278   :  { %v599_v40 = vpop.permute.xlu1 %598 }
0x1279   :  { %v1915_v41 = vmul.f32 %v1660_v33, %v599_v40  ;;  %v1396_v33 = vld [vmem:[%s2164_s0 + $0x12] sm:$0x3] }
0x127a   :  { %v819_v34 = vunpack.c.l.bf16 %v1396_v33 }
0x127b   :  { %v610_v42 = vpack.c.bf16 %v1915_v41, %v1915_v41 }
0x127d   :  { %612 = vrot.lane.b32.xlu0 %v610_v42, %s1738_s21 }
0x12ef   :  { %v613_v43 = vpop.permute.xlu0 %612 }
0x12f0   :  { %1533 = vmatmul.mubr.msk.bf16.vlgmr.msra.gmra.mxu1 %vm42_vm2, %v613_v43 }
0x12f1   :  { %1545 = vmatpush3.bf16.msra.mxu1 %v1769_v1  ;;  %1548 = vmatprep.mubr.msk.bf16.mxu1 %vm1736_vm1, %v1735_v0 }
0x12f2   :  { %1546 = vmatprep.subr.bf16.mxu1 %v1735_v0 }
0x12f5   :  { %1547 = vmatpush3.bf16.msra.mxu1 %v1784_v2 }
0x12f6   :  { %1560 = vmatprep.subr.bf16.mxu1 %v1735_v0 }
0x13b0   :  { %v651_v46 = vpop.f32.mrf.mxu1 }
0x13b1   :  { %v658_v47 = vadd.f32 %v657_v45, %v651_v46 }
0x13b2   :  { %v1534_v49 = vpop.f32.mrf.mxu1 }
0x13b3   :  { %1663 = vtanh.f32 %v658_v47  ;;  %v1390_v53 = vmul.f32 -1.442695, %v658_v47 }
0x13b4   :  { %v654_v50 = vpop.f32.mrf.mxu1 }
0x13b5   :  { %1665 = vpow2.f32 %v1390_v53 }
0x13b6   :  { %v1535_v51 = vpop.f32.mrf.mxu1 }
0x13c0   :  { %v1664_v52 = vpop.eup %1663 }
0x13c1   :  { %668 = vrot.lane.b32.xlu1 %v1664_v52, %s1737_s20 }
0x13c2   :  { %v1666_v54 = vpop.eup %1665 }
0x13c3   :  { %v662_v56 = vadd.f32 1.0, %v1666_v54 }
0x13c5   :  { %1667 = vrcp.f32 %v662_v56 }
0x13d2   :  { %v1668_v57 = vpop.eup %1667 }
0x13d3   :  { %v666_v60 = vmul.f32 %v1668_v57, %v595_v38 }
0x1433   :  { %v669_v58 = vpop.permute.xlu1 %668 }
0x1434   :  { %v671_v59 = vmul.f32 %v1668_v57, %v669_v58  ;;  %v1400_v58 = vld [vmem:[%s2164_s0 + $0x14] sm:$0x3] }
0x1436   :  { %673 = vrot.lane.b32.xlu0 %v671_v59, %s1738_s21  ;;  %v900_v59 = vunpack.c.l.bf16 %v1400_v58 }
0x14a8   :  { %v674_v61 = vpop.permute.xlu0 %673 }
0x14a9   :  { %v676_v62 = vadd.f32 %v674_v61, %v666_v60 }
0x14ab   :  { %1669 = vtanh.f32 %v676_v62 }
0x14b8   :  { %v1670_v63 = vpop.eup %1669 }
0x14b9   :  { %679 = vrot.lane.b32.xlu1 %v1670_v63, %s1737_s20 }
0x152b   :  { %v680_v3 = vpop.permute.xlu1 %679 }
0x152c   :  { %v1933_v4 = vmul.f32 %v1668_v57, %v680_v3 }
0x152e   :  { %v691_v5 = vpack.c.bf16 %v1933_v4, %v1933_v4 }
0x1530   :  { %693 = vrot.lane.b32.xlu0 %v691_v5, %s1738_s21 }
0x15a2   :  { %v694_v6 = vpop.permute.xlu0 %693 }
0x15a3   :  { %1541 = vmatmul.mubr.msk.bf16.vlgmr.msra.gmra.mxu0 %vm42_vm2, %v694_v6 }
0x15a4   :  { %1553 = vmatpush3.bf16.msra.mxu0 %v1769_v1  ;;  %1556 = vmatprep.mubr.msk.bf16.mxu0 %vm1736_vm1, %v1735_v0 }
0x15a5   :  { %1554 = vmatprep.subr.bf16.mxu0 %v1735_v0 }
0x15a8   :  { %1555 = vmatpush3.bf16.msra.mxu0 %v1784_v2 }
0x15a9   :  { %1568 = vmatprep.subr.bf16.mxu0 %v1735_v0 }
0x1663   :  { %v732_v10 = vpop.f32.mrf.mxu0 }
0x1664   :  { %v739_v11 = vadd.f32 %v738_v8, %v732_v10 }
0x1665   :  { %v1542_v12 = vpop.f32.mrf.mxu0 }
0x1666   :  { %1671 = vtanh.f32 %v739_v11  ;;  %v1394_v16 = vmul.f32 -1.442695, %v739_v11 }
0x1667   :  { %v735_v13 = vpop.f32.mrf.mxu0 }
0x1668   :  { %1673 = vpow2.f32 %v1394_v16 }
0x1669   :  { %v1543_v14 = vpop.f32.mrf.mxu0 }
0x1673   :  { %v1672_v15 = vpop.eup %1671 }
0x1674   :  { %749 = vrot.lane.b32.xlu1 %v1672_v15, %s1737_s20 }
0x1675   :  { %v1674_v18 = vpop.eup %1673 }
0x1676   :  { %v743_v19 = vadd.f32 1.0, %v1674_v18 }
0x1678   :  { %1675 = vrcp.f32 %v743_v19 }
0x1685   :  { %v1676_v20 = vpop.eup %1675 }
0x1686   :  { %v747_v23 = vmul.f32 %v1676_v20, %v676_v62 }
0x16e6   :  { %v750_v21 = vpop.permute.xlu1 %749 }
0x16e7   :  { %v752_v22 = vmul.f32 %v1676_v20, %v750_v21 }
0x16e9   :  { %754 = vrot.lane.b32.xlu0 %v752_v22, %s1738_s21  ;;  %v1404_v22 = vld [vmem:[%s2164_s0 + $0x16] sm:$0x3] }
0x175b   :  { %v755_v24 = vpop.permute.xlu0 %754 }
0x175c   :  { %v757_v25 = vadd.f32 %v755_v24, %v747_v23  ;;  %v981_v23 = vunpack.c.l.bf16 %v1404_v22 }
0x175e   :  { %1677 = vtanh.f32 %v757_v25 }
0x176b   :  { %v1678_v27 = vpop.eup %1677 }
0x176c   :  { %760 = vrot.lane.b32.xlu1 %v1678_v27, %s1737_s20 }
0x17de   :  { %v761_v28 = vpop.permute.xlu1 %760 }
0x17df   :  { %v1951_v29 = vmul.f32 %v1676_v20, %v761_v28 }
0x17e1   :  { %v772_v30 = vpack.c.bf16 %v1951_v29, %v1951_v29 }
0x17e3   :  { %774 = vrot.lane.b32.xlu0 %v772_v30, %s1738_s21 }
0x1855   :  { %v775_v31 = vpop.permute.xlu0 %774 }
0x1856   :  { %1549 = vmatmul.mubr.msk.bf16.vlgmr.msra.gmra.mxu1 %vm42_vm2, %v775_v31 }
0x1857   :  { %1561 = vmatpush3.bf16.msra.mxu1 %v1769_v1  ;;  %1564 = vmatprep.mubr.msk.bf16.mxu1 %vm1736_vm1, %v1735_v0 }
0x1858   :  { %1562 = vmatprep.subr.bf16.mxu1 %v1735_v0 }
0x185b   :  { %1563 = vmatpush3.bf16.msra.mxu1 %v1784_v2 }
0x185c   :  { %1576 = vmatprep.subr.bf16.mxu1 %v1735_v0 }
0x1916   :  { %v813_v35 = vpop.f32.mrf.mxu1 }
0x1917   :  { %v820_v36 = vadd.f32 %v819_v34, %v813_v35 }
0x1918   :  { %v1550_v37 = vpop.f32.mrf.mxu1 }
0x1919   :  { %1679 = vtanh.f32 %v820_v36  ;;  %v1398_v42 = vmul.f32 -1.442695, %v820_v36 }
0x191a   :  { %v816_v38 = vpop.f32.mrf.mxu1 }
0x191b   :  { %1681 = vpow2.f32 %v1398_v42 }
0x191c   :  { %v1551_v39 = vpop.f32.mrf.mxu1 }
0x1926   :  { %v1680_v40 = vpop.eup %1679 }
0x1927   :  { %830 = vrot.lane.b32.xlu1 %v1680_v40, %s1737_s20 }
0x1928   :  { %v1682_v43 = vpop.eup %1681 }
0x1929   :  { %v824_v44 = vadd.f32 1.0, %v1682_v43 }
0x192b   :  { %1683 = vrcp.f32 %v824_v44 }
0x1938   :  { %v1684_v45 = vpop.eup %1683 }
0x1939   :  { %v828_v49 = vmul.f32 %v1684_v45, %v757_v25 }
0x1999   :  { %v831_v46 = vpop.permute.xlu1 %830 }
0x199a   :  { %v833_v47 = vmul.f32 %v1684_v45, %v831_v46 }
0x199c   :  { %835 = vrot.lane.b32.xlu0 %v833_v47, %s1738_s21 }
0x1a0e   :  { %v836_v50 = vpop.permute.xlu0 %835 }
0x1a0f   :  { %v838_v51 = vadd.f32 %v836_v50, %v828_v49  ;;  %v1408_v49 = vld [vmem:[%s2164_s0 + $0x18] sm:$0x3] }
0x1a10   :  { %v1062_v50 = vunpack.c.l.bf16 %v1408_v49 }
0x1a11   :  { %1685 = vtanh.f32 %v838_v51 }
0x1a1e   :  { %v1686_v52 = vpop.eup %1685 }
0x1a1f   :  { %841 = vrot.lane.b32.xlu1 %v1686_v52, %s1737_s20 }
0x1a91   :  { %v842_v53 = vpop.permute.xlu1 %841 }
0x1a92   :  { %v1969_v54 = vmul.f32 %v1684_v45, %v842_v53 }
0x1a94   :  { %v853_v56 = vpack.c.bf16 %v1969_v54, %v1969_v54 }
0x1a96   :  { %855 = vrot.lane.b32.xlu0 %v853_v56, %s1738_s21 }
0x1b08   :  { %v856_v57 = vpop.permute.xlu0 %855 }
0x1b09   :  { %1557 = vmatmul.mubr.msk.bf16.vlgmr.msra.gmra.mxu0 %vm42_vm2, %v856_v57 }
0x1b0a   :  { %1569 = vmatpush3.bf16.msra.mxu0 %v1769_v1  ;;  %1572 = vmatprep.mubr.msk.bf16.mxu0 %vm1736_vm1, %v1735_v0 }
0x1b0b   :  { %1570 = vmatprep.subr.bf16.mxu0 %v1735_v0 }
0x1b0e   :  { %1571 = vmatpush3.bf16.msra.mxu0 %v1784_v2 }
0x1b0f   :  { %1584 = vmatprep.subr.bf16.mxu0 %v1735_v0 }
0x1bc9   :  { %v894_v60 = vpop.f32.mrf.mxu0 }
0x1bca   :  { %v901_v61 = vadd.f32 %v900_v59, %v894_v60 }
0x1bcb   :  { %v1558_v62 = vpop.f32.mrf.mxu0 }
0x1bcc   :  { %1687 = vtanh.f32 %v901_v61  ;;  %v1402_v6 = vmul.f32 -1.442695, %v901_v61 }
0x1bcd   :  { %v897_v63 = vpop.f32.mrf.mxu0 }
0x1bce   :  { %1689 = vpow2.f32 %v1402_v6 }
0x1bcf   :  { %v1559_v3 = vpop.f32.mrf.mxu0 }
0x1bd9   :  { %v1688_v5 = vpop.eup %1687 }
0x1bda   :  { %911 = vrot.lane.b32.xlu1 %v1688_v5, %s1737_s20 }
0x1bdb   :  { %v1690_v7 = vpop.eup %1689 }
0x1bdc   :  { %v905_v8 = vadd.f32 1.0, %v1690_v7 }
0x1bde   :  { %1691 = vrcp.f32 %v905_v8 }
0x1beb   :  { %v1692_v10 = vpop.eup %1691 }
0x1bec   :  { %v909_v13 = vmul.f32 %v1692_v10, %v838_v51 }
0x1c4c   :  { %v912_v11 = vpop.permute.xlu1 %911 }
0x1c4d   :  { %v914_v12 = vmul.f32 %v1692_v10, %v912_v11 }
0x1c4f   :  { %916 = vrot.lane.b32.xlu0 %v914_v12, %s1738_s21 }
0x1cc1   :  { %v917_v14 = vpop.permute.xlu0 %916 }
0x1cc2   :  { %v919_v15 = vadd.f32 %v917_v14, %v909_v13  ;;  %v1412_v14 = vld [vmem:[%s2164_s0 + $0x1a] sm:$0x3] }
0x1cc4   :  { %1693 = vtanh.f32 %v919_v15 }
0x1cd1   :  { %v1694_v16 = vpop.eup %1693 }
0x1cd2   :  { %922 = vrot.lane.b32.xlu1 %v1694_v16, %s1737_s20 }
0x1d44   :  { %v923_v18 = vpop.permute.xlu1 %922 }
0x1d45   :  { %v1987_v19 = vmul.f32 %v1692_v10, %v923_v18 }
0x1d47   :  { %v934_v20 = vpack.c.bf16 %v1987_v19, %v1987_v19 }
0x1d49   :  { %936 = vrot.lane.b32.xlu0 %v934_v20, %s1738_s21 }
0x1dbb   :  { %v937_v21 = vpop.permute.xlu0 %936 }
0x1dbc   :  { %1565 = vmatmul.mubr.msk.bf16.vlgmr.msra.gmra.mxu1 %vm42_vm2, %v937_v21 }
0x1dbd   :  { %1577 = vmatpush3.bf16.msra.mxu1 %v1769_v1  ;;  %1580 = vmatprep.mubr.msk.bf16.mxu1 %vm1736_vm1, %v1735_v0 }
0x1dbe   :  { %1578 = vmatprep.subr.bf16.mxu1 %v1735_v0 }
0x1dc1   :  { %1579 = vmatpush3.bf16.msra.mxu1 %v1784_v2 }
0x1dc2   :  { %1592 = vmatprep.subr.bf16.mxu1 %v1735_v0 }
0x1e7c   :  { %v975_v24 = vpop.f32.mrf.mxu1 }
0x1e7d   :  { %v982_v25 = vadd.f32 %v981_v23, %v975_v24 }
0x1e7e   :  { %v1566_v27 = vpop.f32.mrf.mxu1 }
0x1e7f   :  { %1695 = vtanh.f32 %v982_v25  ;;  %v1406_v33 = vmul.f32 -1.442695, %v982_v25 }
0x1e80   :  { %v978_v28 = vpop.f32.mrf.mxu1 }
0x1e81   :  { %1697 = vpow2.f32 %v1406_v33 }
0x1e82   :  { %v1567_v30 = vpop.f32.mrf.mxu1 }
0x1e8c   :  { %v1696_v31 = vpop.eup %1695 }
0x1e8d   :  { %992 = vrot.lane.b32.xlu1 %v1696_v31, %s1737_s20 }
0x1e8e   :  { %v1698_v34 = vpop.eup %1697 }
0x1e8f   :  { %v986_v35 = vadd.f32 1.0, %v1698_v34 }
0x1e91   :  { %1699 = vrcp.f32 %v986_v35 }
0x1e9e   :  { %v1700_v36 = vpop.eup %1699 }
0x1e9f   :  { %v990_v39 = vmul.f32 %v1700_v36, %v919_v15  ;;  %v1143_v15 = vunpack.c.l.bf16 %v1412_v14 }
0x1eff   :  { %v993_v37 = vpop.permute.xlu1 %992 }
0x1f00   :  { %v995_v38 = vmul.f32 %v1700_v36, %v993_v37 }
0x1f02   :  { %997 = vrot.lane.b32.xlu0 %v995_v38, %s1738_s21  ;;  %v1416_v38 = vld [vmem:[%s2164_s0 + $0x1c] sm:$0x3] }
0x1f74   :  { %v998_v40 = vpop.permute.xlu0 %997 }
0x1f75   :  { %v1000_v42 = vadd.f32 %v998_v40, %v990_v39  ;;  %v1224_v39 = vunpack.c.l.bf16 %v1416_v38 }
0x1f77   :  { %1701 = vtanh.f32 %v1000_v42 }
0x1f84   :  { %v1702_v43 = vpop.eup %1701 }
0x1f85   :  { %1003 = vrot.lane.b32.xlu1 %v1702_v43, %s1737_s20 }
0x1ff7   :  { %v1004_v44 = vpop.permute.xlu1 %1003 }
0x1ff8   :  { %v2005_v45 = vmul.f32 %v1700_v36, %v1004_v44 }
0x1ffa   :  { %v1015_v46 = vpack.c.bf16 %v2005_v45, %v2005_v45 }
0x1ffc   :  { %1017 = vrot.lane.b32.xlu0 %v1015_v46, %s1738_s21 }
0x206e   :  { %v1018_v47 = vpop.permute.xlu0 %1017 }
0x206f   :  { %1573 = vmatmul.mubr.msk.bf16.vlgmr.msra.gmra.mxu0 %vm42_vm2, %v1018_v47 }
0x2070   :  { %1585 = vmatpush3.bf16.msra.mxu0 %v1769_v1  ;;  %1588 = vmatprep.mubr.msk.bf16.mxu0 %vm1736_vm1, %v1735_v0 }
0x2071   :  { %1586 = vmatprep.subr.bf16.mxu0 %v1735_v0 }
0x2074   :  { %1587 = vmatpush3.bf16.msra.mxu0 %v1784_v2 }
0x212f   :  { %v1056_v51 = vpop.f32.mrf.mxu0 }
0x2130   :  { %v1063_v52 = vadd.f32 %v1062_v50, %v1056_v51 }
0x2131   :  { %v1574_v53 = vpop.f32.mrf.mxu0 }
0x2132   :  { %1703 = vtanh.f32 %v1063_v52  ;;  %v1410_v59 = vmul.f32 -1.442695, %v1063_v52 }
0x2133   :  { %v1059_v56 = vpop.f32.mrf.mxu0 }
0x2134   :  { %1705 = vpow2.f32 %v1410_v59 }
0x2135   :  { %v1575_v57 = vpop.f32.mrf.mxu0 }
0x213f   :  { %v1704_v58 = vpop.eup %1703 }
0x2140   :  { %1073 = vrot.lane.b32.xlu1 %v1704_v58, %s1737_s20 }
0x2141   :  { %v1706_v60 = vpop.eup %1705 }
0x2142   :  { %v1067_v61 = vadd.f32 1.0, %v1706_v60 }
0x2144   :  { %1707 = vrcp.f32 %v1067_v61 }
0x2151   :  { %v1708_v62 = vpop.eup %1707 }
0x2152   :  { %v1071_v5 = vmul.f32 %v1708_v62, %v1000_v42 }
0x21b2   :  { %v1074_v63 = vpop.permute.xlu1 %1073 }
0x21b3   :  { %v1076_v3 = vmul.f32 %v1708_v62, %v1074_v63 }
0x21b5   :  { %1078 = vrot.lane.b32.xlu0 %v1076_v3, %s1738_s21 }
0x2227   :  { %v1079_v6 = vpop.permute.xlu0 %1078 }
0x2228   :  { %v1081_v7 = vadd.f32 %v1079_v6, %v1071_v5  ;;  %v1420_v5 = vld [vmem:[%s2164_s0 + $0x1e] sm:$0x3]  ;;  %s1739_s0 = smov 96  }
0x2229   :  { %v1305_v6 = vunpack.c.l.bf16 %v1420_v5 }
0x222a   :  { %1709 = vtanh.f32 %v1081_v7 }
0x2237   :  { %v1710_v8 = vpop.eup %1709 }
0x2238   :  { %1084 = vrot.lane.b32.xlu1 %v1710_v8, %s1737_s20 }
0x22aa   :  { %v1085_v10 = vpop.permute.xlu1 %1084 }
0x22ab   :  { %v2022_v11 = vmul.f32 %v1708_v62, %v1085_v10 }
0x22ad   :  { %v1096_v12 = vpack.c.bf16 %v2022_v11, %v2022_v11 }
0x22af   :  { %1098 = vrot.lane.b32.xlu0 %v1096_v12, %s1738_s21 }
0x2321   :  { %v1099_v13 = vpop.permute.xlu0 %1098 }
0x2322   :  { %1581 = vmatmul.mubr.msk.bf16.vlgmr.msra.gmra.mxu1 %vm42_vm2, %v1099_v13 }
0x2323   :  { %1593 = vmatpush3.bf16.msra.mxu1 %v1769_v1  ;;  %1596 = vmatprep.mubr.msk.bf16.mxu1 %vm1736_vm1, %v1735_v0 }
0x2324   :  { %1594 = vmatprep.subr.bf16.mxu1 %v1735_v0 }
0x2327   :  { %1595 = vmatpush3.bf16.msra.mxu1 %v1784_v2 }
0x23e2   :  { %v1137_v16 = vpop.f32.mrf.mxu1 }
0x23e3   :  { %v1144_v18 = vadd.f32 %v1143_v15, %v1137_v16 }
0x23e4   :  { %v1582_v20 = vpop.f32.mrf.mxu1 }
0x23e5   :  { %1711 = vtanh.f32 %v1144_v18  ;;  %v1414_v1 = vmul.f32 -1.442695, %v1144_v18 }
0x23e6   :  { %v1140_v21 = vpop.f32.mrf.mxu1 }
0x23e7   :  { %1713 = vpow2.f32 %v1414_v1 }
0x23e8   :  { %v1583_v22 = vpop.f32.mrf.mxu1 }
0x23f2   :  { %v1712_v23 = vpop.eup %1711 }
0x23f3   :  { %1154 = vrot.lane.b32.xlu1 %v1712_v23, %s1737_s20 }
0x23f4   :  { %v1714_v24 = vpop.eup %1713 }
0x23f5   :  { %v1148_v0 = vadd.f32 1.0, %v1714_v24 }
0x23f7   :  { %1715 = vrcp.f32 %v1148_v0 }
0x2404   :  { %v1716_v2 = vpop.eup %1715 }
0x2405   :  { %v1152_v28 = vmul.f32 %v1716_v2, %v1081_v7 }
0x2465   :  { %v1155_v25 = vpop.permute.xlu1 %1154 }
0x2466   :  { %v1157_v27 = vmul.f32 %v1716_v2, %v1155_v25 }
0x2468   :  { %1159 = vrot.lane.b32.xlu0 %v1157_v27, %s1738_s21 }
0x24da   :  { %v1160_v30 = vpop.permute.xlu0 %1159 }
0x24db   :  { %v1162_v31 = vadd.f32 %v1160_v30, %v1152_v28 }
0x24dd   :  { %1717 = vtanh.f32 %v1162_v31 }
0x24ea   :  { %v1718_v33 = vpop.eup %1717 }
0x24eb   :  { %1165 = vrot.lane.b32.xlu1 %v1718_v33, %s1737_s20 }
0x255d   :  { %v1166_v34 = vpop.permute.xlu1 %1165 }
0x255e   :  { %v2039_v35 = vmul.f32 %v1716_v2, %v1166_v34 }
0x2560   :  { %v1177_v36 = vpack.c.bf16 %v2039_v35, %v2039_v35 }
0x2562   :  { %1179 = vrot.lane.b32.xlu0 %v1177_v36, %s1738_s21 }
0x25d4   :  { %v1180_v37 = vpop.permute.xlu0 %1179 }
0x25d5   :  { %1589 = vmatmul.mubr.msk.bf16.vlgmr.msra.gmra.mxu0 %vm42_vm2, %v1180_v37 }
0x2695   :  { %v1218_v40 = vpop.f32.mrf.mxu0 }
0x2696   :  { %v1225_v42 = vadd.f32 %v1224_v39, %v1218_v40 }
0x2697   :  { %v1590_v43 = vpop.f32.mrf.mxu0 }
0x2698   :  { %1719 = vtanh.f32 %v1225_v42  ;;  %v1418_v49 = vmul.f32 -1.442695, %v1225_v42 }
0x2699   :  { %v1221_v44 = vpop.f32.mrf.mxu0 }
0x269a   :  { %1721 = vpow2.f32 %v1418_v49 }
0x269b   :  { %v1591_v46 = vpop.f32.mrf.mxu0 }
0x26a5   :  { %v1720_v47 = vpop.eup %1719 }
0x26a6   :  { %1235 = vrot.lane.b32.xlu1 %v1720_v47, %s1737_s20 }
0x26a7   :  { %v1722_v50 = vpop.eup %1721 }
0x26a8   :  { %v1229_v51 = vadd.f32 1.0, %v1722_v50 }
0x26aa   :  { %1723 = vrcp.f32 %v1229_v51 }
0x26b7   :  { %v1724_v52 = vpop.eup %1723 }
0x26b8   :  { %v1233_v57 = vmul.f32 %v1724_v52, %v1162_v31 }
0x2718   :  { %v1236_v53 = vpop.permute.xlu1 %1235 }
0x2719   :  { %v1238_v56 = vmul.f32 %v1724_v52, %v1236_v53 }
0x271b   :  { %1240 = vrot.lane.b32.xlu0 %v1238_v56, %s1738_s21 }
0x278d   :  { %v1241_v58 = vpop.permute.xlu0 %1240 }
0x278e   :  { %v1243_v59 = vadd.f32 %v1241_v58, %v1233_v57 }
0x2790   :  { %1725 = vtanh.f32 %v1243_v59 }
0x279d   :  { %v1726_v60 = vpop.eup %1725 }
0x279e   :  { %1246 = vrot.lane.b32.xlu1 %v1726_v60, %s1737_s20 }
0x2810   :  { %v1247_v61 = vpop.permute.xlu1 %1246 }
0x2811   :  { %v1249_v62 = vmul.f32 %v1724_v52, %v1247_v61 }
0x2813   :  { %v1258_v63 = vpack.c.bf16 %v1249_v62, %v1249_v62 }
0x2815   :  { %1260 = vrot.lane.b32.xlu0 %v1258_v63, %s1738_s21 }
0x2887   :  { %v1261_v3 = vpop.permute.xlu0 %1260 }
0x2888   :  { %1597 = vmatmul.mubr.msk.bf16.vlgmr.msra.gmra.mxu1 %vm42_vm2, %v1261_v3 }
0x2948   :  { %v1299_v7 = vpop.f32.mrf.mxu1 }
0x2949   :  { %v1306_v8 = vadd.f32 %v1305_v6, %v1299_v7 }
0x294a   :  { %v1598_v10 = vpop.f32.mrf.mxu1 }
0x294b   :  { %1727 = vtanh.f32 %v1306_v8  ;;  %v1422_v15 = vmul.f32 -1.442695, %v1306_v8 }
0x294c   :  { %v1302_v12 = vpop.f32.mrf.mxu1 }
0x294d   :  { %1729 = vpow2.f32 %v1422_v15 }
0x294e   :  { %v1599_v13 = vpop.f32.mrf.mxu1 }
0x2958   :  { %v1728_v14 = vpop.eup %1727 }
0x2959   :  { %1316 = vrot.lane.b32.xlu1 %v1728_v14, %s1737_s20 }
0x295a   :  { %v1730_v16 = vpop.eup %1729 }
0x295b   :  { %v1310_v18 = vadd.f32 1.0, %v1730_v16 }
0x295d   :  { %1731 = vrcp.f32 %v1310_v18 }
0x296a   :  { %v1732_v20 = vpop.eup %1731 }
0x29cb   :  { %v1317_v21 = vpop.permute.xlu1 %1316 }
0x29cc   :  { %v1319_v22 = vmul.f32 %v1732_v20, %v1317_v21 }
0x29ce   :  { %1321 = vrot.lane.b32.xlu0 %v1319_v22, %s1738_s21 }
0x29d2   :  { %117 = vrot.lane.b32.xlu0 %v1807_v26, %s1738_s21  ;;  %v1314_v26 = vmul.f32 %v1732_v20, %v1243_v59 }
0x29d6   :  { %279 = vrot.lane.b32.xlu0 %v1843_v9, %s1738_s21 }
0x29da   :  { %441 = vrot.lane.b32.xlu0 %v1879_v55, %s1738_s21 }
0x29de   :  { %603 = vrot.lane.b32.xlu0 %v1915_v41, %s1738_s21 }
0x29e2   :  { %765 = vrot.lane.b32.xlu0 %v1951_v29, %s1738_s21 }
0x29e6   :  { %927 = vrot.lane.b32.xlu0 %v1987_v19, %s1738_s21 }
0x29ea   :  { %1089 = vrot.lane.b32.xlu0 %v2022_v11, %s1738_s21 }
0x29ee   :  { %1251 = vrot.lane.b32.xlu0 %v1249_v62, %s1738_s21 }
0x2a40   :  { %v1322_v23 = vpop.permute.xlu0 %1321 }
0x2a41   :  { %v1324_v9 = vadd.f32 %v1322_v23, %v1314_v26 }
0x2a43   :  { %1733 = vtanh.f32 %v1324_v9  ;;  %1339 = vrot.lane.b32.xlu0 %v1324_v9, %s1739_s0 }
0x2a44   :  { %v118_v55 = vpop.permute.xlu0 %117 }
0x2a45   :  { %121 = vst.msk [vmem:[%s2165_s2] sm:$0xf] %vm19_vm0, %v118_v55 }
0x2a48   :  { %v280_v41 = vpop.permute.xlu0 %279 }
0x2a49   :  { %1371 = vst.msk [vmem:[%s2165_s2 + $0x8] sm:$0xf] %vm19_vm0, %v280_v41 }
0x2a4c   :  { %v442_v29 = vpop.permute.xlu0 %441 }
0x2a4d   :  { %1379 = vst.msk [vmem:[%s2165_s2 + $0x10] sm:$0xf] %vm19_vm0, %v442_v29 }
0x2a50   :  { %v1734_v19 = vpop.eup %1733  ;;  %v604_v11 = vpop.permute.xlu0 %603 }
0x2a51   :  { %1387 = vst.msk [vmem:[%s2165_s2 + $0x18] sm:$0xf] %vm19_vm0, %v604_v11  ;;  %1327 = vrot.lane.b32.xlu1 %v1734_v19, %s1737_s20 }
0x2a54   :  { %v766_v1 = vpop.permute.xlu0 %765 }
0x2a55   :  { %1395 = vst.msk [vmem:[%s2165_s2 + $0x20] sm:$0xf] %vm19_vm0, %v766_v1  ;;  %198 = vrot.lane.b32.xlu1 %v1825_v48, %s1738_s21 }
0x2a58   :  { %v928_v24 = vpop.permute.xlu0 %927 }
0x2a59   :  { %1403 = vst.msk [vmem:[%s2165_s2 + $0x28] sm:$0xf] %vm19_vm0, %v928_v24  ;;  %360 = vrot.lane.b32.xlu1 %v1861_v32, %s1738_s21 }
0x2a5c   :  { %v1090_v0 = vpop.permute.xlu0 %1089 }
0x2a5d   :  { %1411 = vst.msk [vmem:[%s2165_s2 + $0x30] sm:$0xf] %vm19_vm0, %v1090_v0  ;;  %522 = vrot.lane.b32.xlu1 %v1897_v17, %s1738_s21 }
0x2a60   :  { %v1252_v2 = vpop.permute.xlu0 %1251 }
0x2a61   :  { %1419 = vst.msk [vmem:[%s2165_s2 + $0x38] sm:$0xf] %vm19_vm0, %v1252_v2  ;;  %684 = vrot.lane.b32.xlu1 %v1933_v4, %s1738_s21 }
0x2a65   :  { %846 = vrot.lane.b32.xlu1 %v1969_v54, %s1738_s21 }
0x2a69   :  { %1008 = vrot.lane.b32.xlu1 %v2005_v45, %s1738_s21 }
0x2a6d   :  { %1170 = vrot.lane.b32.xlu1 %v2039_v35, %s1738_s21 }
0x2ab5   :  { %v1340_v48 = vpop.permute.xlu0 %1339 }
0x2ab6   :  { %1342 = vst.msk [vmem:[#allocation3] sm:$0xf] %vm19_vm0, %v1340_v48  ;;  %1347 = vst.msk [vmem:[%s2166_s4] sm:$0xf] %vm19_vm0, %v1340_v48 }
0x2ac3   :  { %v1328_v32 = vpop.permute.xlu1 %1327 }
0x2ac4   :  { %v1330_v17 = vmul.f32 %v1732_v20, %v1328_v32 }
0x2ac6   :  { %1332 = vrot.lane.b32.xlu1 %v1330_v17, %s1738_s21 }
0x2ac7   :  { %v199_v4 = vpop.permute.xlu1 %198 }
0x2ac8   :  { %1367 = vst.msk [vmem:[%s2165_s2 + $0x4] sm:$0xf] %vm19_vm0, %v199_v4 }
0x2acb   :  { %v361_v54 = vpop.permute.xlu1 %360 }
0x2acc   :  { %1375 = vst.msk [vmem:[%s2165_s2 + $0xc] sm:$0xf] %vm19_vm0, %v361_v54 }
0x2acf   :  { %v523_v45 = vpop.permute.xlu1 %522 }
0x2ad0   :  { %1383 = vst.msk [vmem:[%s2165_s2 + $0x14] sm:$0xf] %vm19_vm0, %v523_v45 }
0x2ad3   :  { %v685_v25 = vpop.permute.xlu1 %684 }
0x2ad4   :  { %1391 = vst.msk [vmem:[%s2165_s2 + $0x1c] sm:$0xf] %vm19_vm0, %v685_v25 }
0x2ad7   :  { %v847_v27 = vpop.permute.xlu1 %846 }
0x2ad8   :  { %1399 = vst.msk [vmem:[%s2165_s2 + $0x24] sm:$0xf] %vm19_vm0, %v847_v27 }
0x2adb   :  { %v1009_v28 = vpop.permute.xlu1 %1008 }
0x2adc   :  { %1407 = vst.msk [vmem:[%s2165_s2 + $0x2c] sm:$0xf] %vm19_vm0, %v1009_v28 }
0x2adf   :  { %v1171_v30 = vpop.permute.xlu1 %1170 }
0x2ae0   :  { %1415 = vst.msk [vmem:[%s2165_s2 + $0x34] sm:$0xf] %vm19_vm0, %v1171_v30 }
0x2b38   :  { %v1333_v31 = vpop.permute.xlu1 %1332 }
0x2b39   :  { %1423 = vst.msk [vmem:[%s2165_s2 + $0x3c] sm:$0xf] %vm19_vm0, %v1333_v31  ;;  %1337 = vst.msk [vmem:[#allocation2] sm:$0xf] %vm19_vm0, %v1333_v31 }
0x2b3a   :  { %1346 = vst.msk [vmem:[%s2167_s3] sm:$0xf] %vm19_vm0, %v1333_v31 }

</bundles_post_ra>
